<compile_context>
chip_gen: v6e
topology: v6e:2x2x1
jax: 0.10.0
libtpu: 0.0.40
codegen_flags: <defaults>
</compile_context>

<pallas_src>
import jax
import jax.numpy as jnp
from jax.experimental import pallas as pl
from jax.experimental.pallas import tpu as pltpu


def _round_up(x, m):
    return ((x + m - 1) // m) * m


def _mosaic_params():
    # Per-grid-step footprint is < ~8 MiB (largest: conv3 / MLP tiles); 32 MiB
    # leaves ample headroom and stays well inside v7x's 64 MiB per-core VMEM.
    return pltpu.CompilerParams(dimension_semantics=("parallel",),
                                vmem_limit_bytes=32 * 1024 * 1024)


# ----------------------------------------------------------------------------
# Pallas kernels
# ----------------------------------------------------------------------------
def _make_conv_kernel(wq, mtot, fuse_k):
    """Fused 3x3 conv (pad=1) + 2x2/2 max-pool + bias + ReLU for one batch tile.

    xf_ref: (R, 4*Cin) bf16 flat space-to-depth buffer; row (t*Lrow + u*Wq + v)
            holds the four 2x2 phases of padded-input pixel block (2u,2v) of
            image t.  The four (dh,dw) conv/pool shifts are the same block
            read at row offsets {0, 1, Wq, Wq+1} (no shifted copy in HBM).
    w_ref : folded conv weights, 3x3 taps zero-padded in, 4 pool offsets on N.
    b_ref : (1, Cout) f32.
    o_ref : (R, Cout) bf16; only rows [0, mtot) are written (rest is junk).
    """
    shifts = (0, 1, wq, wq + 1)

    def kernel(xf_ref, w_ref, b_ref, o_ref):
        if fuse_k:
            # Tiny Cin (layer 1): concat the 4 shifted slabs along K and run a
            # single (mtot, 16*Cin) x (16*Cin, 4*Cout) MXU matmul.
            xs = jnp.concatenate(
                [xf_ref[pl.ds(s, mtot), :] for s in shifts], axis=-1)
            acc = jnp.dot(xs, w_ref[...], preferred_element_type=jnp.float32)
        else:
            # One MXU matmul per shift (K = 4*Cin = 128/256), f32 accumulation;
            # avoids materializing the 4x-wide xs slab in VMEM.
            acc = None
            for idx, s in enumerate(shifts):
                part = xf_ref[pl.ds(s, mtot), :]
                z = jnp.dot(part, w_ref[idx],
                            preferred_element_type=jnp.float32)
                acc = z if acc is None else acc + z
        cout = o_ref.shape[-1]
        pooled = jnp.maximum(
            jnp.maximum(acc[:, 0 * cout:1 * cout], acc[:, 1 * cout:2 * cout]),
            jnp.maximum(acc[:, 2 * cout:3 * cout], acc[:, 3 * cout:4 * cout]))
        y = jnp.maximum(pooled + b_ref[...], 0.0)      # bias + ReLU after pool
        o_ref[pl.ds(0, mtot), :] = y.astype(o_ref.dtype)

    return kernel


def _mlp_kernel(x_ref, w1_ref, b1_ref, w2_ref, b2_ref, o_ref):
    """fc1 + ReLU + fc2 for one batch tile (weights resident in VMEM)."""
    h = jnp.dot(x_ref[...], w1_ref[...], preferred_element_type=jnp.float32)
    h = jnp.maximum(h + b1_ref[...], 0.0)
    y = jnp.dot(h.astype(w2_ref.dtype), w2_ref[...],
                preferred_element_type=jnp.float32)
    o_ref[...] = (y + b2_ref[...]).astype(o_ref.dtype)


# ----------------------------------------------------------------------------
# Weight folding (wrapper-side, tiny, done once per call)
# ----------------------------------------------------------------------------
def _fold_conv_weights(w):
    """(3,3,Cin,Cout) -> (16*Cin, 4*Cout).

    Rows:    (dh, dw, a, b, ci)  -- row/col shift (dh,dw) and 2x2 phase (a,b)
    Columns: (ph, pw, co)        -- 2x2 max-pool offset
    Entry = w[2*dh+a-ph, 2*dw+b-pw, ci, co] when those taps exist, else 0.
    """
    Cin, Cout = w.shape[2], w.shape[3]
    zero = jnp.zeros((Cin, Cout), w.dtype)
    row_blocks = []
    for dh in range(2):
        for dw in range(2):
            for a in range(2):
                for b in range(2):
                    r, c = 2 * dh + a, 2 * dw + b
                    cols = []
                    for ph in range(2):
                        for pw in range(2):
                            ky, kx = r - ph, c - pw
                            if 0 <= ky <= 2 and 0 <= kx <= 2:
                                cols.append(w[ky, kx])
                            else:
                                cols.append(zero)
                    row_blocks.append(jnp.concatenate(cols, axis=-1))
    return jnp.concatenate(row_blocks, axis=0)


# ----------------------------------------------------------------------------
# Layer wrappers
# ----------------------------------------------------------------------------
def conv_relu_pool(x_nhwc, w, b, *, rows_per_tile=1024):
    """x: (N,H,W,Cin), w: (3,3,Cin,Cout), b: (Cout,) -> (N,H//2,W//2,Cout)."""
    n, h, wdim, cin = x_nhwc.shape
    cout = w.shape[-1]
    hp, wp = h // 2, wdim // 2
    hq, wq = hp + 1, wp + 1
    # Flat per-image row budget: holds the Hq*Wq real space-to-depth rows and
    # guarantees every real output row + max shift (Wq+1 <= 16) stays in-tile.
    lrow = _round_up(max(hp * wq + 15, hq * wq), 16)

    # Images per grid step: ~rows_per_tile matmul rows, but keep >=2 grid
    # steps whenever the batch allows (v7x megacore has 2 TensorCores).
    tb = max(1, min(max(1, rows_per_tile // lrow), n))
    if n >= 2 and tb > (n + 1) // 2:
        tb = (n + 1) // 2
    n_pad = _round_up(n, tb)

    # Space-to-depth in bf16 (~1x bytes of the feature map):
    #   F[n, u*Wq+v, (a*2+b)*Cin+ci] = xpad[n, 2u+a, 2v+b, ci], zeros elsewhere.
    xb = x_nhwc.astype(jnp.bfloat16)
    xp = jnp.pad(xb, ((0, 0), (1, 1), (1, 1), (0, 0)))
    phases = [xp[:, a:a + 2 * hq:2, bb:bb + 2 * wq:2, :]
              for a in range(2) for bb in range(2)]
    e = jnp.concatenate(phases, axis=-1)                    # (N, Hq, Wq, 4Cin)
    f = e.reshape(n, hq * wq, 4 * cin)
    f = jnp.pad(f, ((0, n_pad - n), (0, lrow - hq * wq), (0, 0)))
    f = f.reshape(n_pad * lrow, 4 * cin)

    w_folded = _fold_conv_weights(w).astype(jnp.bfloat16)   # (16*Cin, 4*Cout)
    fuse_k = (4 * cin) < 128
    if fuse_k:
        w_arg = w_folded
        w_spec = pl.BlockSpec((16 * cin, 4 * cout), lambda i: (0, 0))
    else:
        w_arg = w_folded.reshape(4, 4 * cin, 4 * cout)
        w_spec = pl.BlockSpec((4, 4 * cin, 4 * cout), lambda i: (0, 0, 0))
    b2 = b.reshape(1, cout).astype(jnp.float32)

    r = tb * lrow
    mtot = r - 16
    out = pl.pallas_call(
        _make_conv_kernel(wq, mtot, fuse_k),
        out_shape=jax.ShapeDtypeStruct((n_pad * lrow, cout), jnp.bfloat16),
        grid=(n_pad // tb,),
        in_specs=[
            pl.BlockSpec((r, 4 * cin), lambda i: (i, 0)),   # streamed F tiles
            w_spec,                                         # resident weights
            pl.BlockSpec((1, cout), lambda i: (0, 0)),      # resident bias
        ],
        out_specs=pl.BlockSpec((r, cout), lambda i: (i, 0)),
        compiler_params=_mosaic_params(),
    )(f, w_arg, b2)

    out = out.reshape(n_pad, lrow, cout)[:n, :hp * wq, :]
    return out.reshape(n, hp, wq, cout)[:, :, :wp, :]


def mlp(x, w1, b1, w2, b2, *, tile_b=512):
    """x: (N, F) -> (N, num_classes); fc1+ReLU+fc2 fused, batch-tiled."""
    n, feat = x.shape
    hd = w1.shape[1]
    c = w2.shape[1]
    cp = _round_up(c, 128)                     # lane-dense kernel output
    if cp != c:
        w2 = jnp.pad(w2, ((0, 0), (0, cp - c)))
        b2 = jnp.pad(b2, ((0, cp - c),))

    tb = min(tile_b, _round_up(n, 8))
    if n > 8 and _round_up(n, 8) <= tb:        # keep >=2 grid steps (v7x)
        tb = max(8, _round_up(tb // 2, 8))
    n_pad = _round_up(n, tb)

    xb = x.astype(jnp.bfloat16)
    if n_pad != n:
        xb = jnp.pad(xb, ((0, n_pad - n), (0, 0)))

    out = pl.pallas_call(
        _mlp_kernel,
        out_shape=jax.ShapeDtypeStruct((n_pad, cp), jnp.float32),
        grid=(n_pad // tb,),
        in_specs=[
            pl.BlockSpec((tb, feat), lambda i: (i, 0)),
            pl.BlockSpec((feat, hd), lambda i: (0, 0)),     # resident w_fc1
            pl.BlockSpec((1, hd), lambda i: (0, 0)),
            pl.BlockSpec((hd, cp), lambda i: (0, 0)),       # resident w_fc2
            pl.BlockSpec((1, cp), lambda i: (0, 0)),
        ],
        out_specs=pl.BlockSpec((tb, cp), lambda i: (i, 0)),
        compiler_params=_mosaic_params(),
    )(xb, w1.astype(jnp.bfloat16), b1.reshape(1, hd).astype(jnp.float32),
      w2.astype(jnp.bfloat16), b2.reshape(1, cp).astype(jnp.float32))
    return out[:n, :c]


def cnn8_forward(x_nchw, p):
    n = x_nchw.shape[0]
    x = jnp.transpose(x_nchw, (0, 2, 3, 1))               # NCHW -> NHWC
    x = conv_relu_pool(x, p["w1"], p["b1"])                # (N,14,14, 32)
    x = conv_relu_pool(x, p["w2"], p["b2"])                # (N, 7, 7, 64)
    x = conv_relu_pool(x, p["w3"], p["b3"])                # (N, 3, 3,128)
    # Match PyTorch flatten order (NCHW): x.view(-1, 128*3*3)
    x = jnp.transpose(x, (0, 3, 1, 2)).reshape(n, 128 * 3 * 3)
    return mlp(x, p["w_fc1"], p["b_fc1"], p["w_fc2"], p["b_fc2"])


# ----------------------------------------------------------------------------
# Pure-JAX f32 reference (for correctness check)
# ----------------------------------------------------------------------------
def reference_forward(x_nchw, p):
    x = jnp.transpose(x_nchw, (0, 2, 3, 1))

    def block(x, w, b):
        y = jax.lax.conv_general_dilated(
            x, w, window_strides=(1, 1), padding=((1, 1), (1, 1)),
            dimension_numbers=("NHWC", "HWIO", "NHWC"))
        y = jax.nn.relu(y + b)
        return jax.lax.reduce_window(y, -jnp.inf, jax.lax.max,
                                     (1, 2, 2, 1), (1, 2, 2, 1), "VALID")

    x = block(x, p["w1"], p["b1"])
    x = block(x, p["w2"], p["b2"])
    x = block(x, p["w3"], p["b3"])
    n = x.shape[0]
    x = jnp.transpose(x, (0, 3, 1, 2)).reshape(n, 128 * 3 * 3)
    h = jax.nn.relu(x @ p["w_fc1"] + p["b_fc1"])
    return h @ p["w_fc2"] + p["b_fc2"]


# ----------------------------------------------------------------------------
# Deterministic parameter init + run
# ----------------------------------------------------------------------------
def init_params(key, num_classes=10):
    ks = jax.random.split(key, 10)

    def conv_w(k, cin, cout):
        scale = 1.0 / jnp.sqrt(3.0 * 3.0 * cin)
        return scale * jax.random.normal(k, (3, 3, cin, cout), jnp.float32)

    def lin_w(k, fin, fout):
        return (1.0 / jnp.sqrt(fin)) * jax.random.normal(k, (fin, fout), jnp.float32)

    return {
        "w1": conv_w(ks[0], 1, 32),
        "b1": 0.01 * jax.random.normal(ks[1], (32,), jnp.float32),
        "w2": conv_w(ks[2], 32, 64),
        "b2": 0.01 * jax.random.normal(ks[3], (64,), jnp.float32),
        "w3": conv_w(ks[4], 64, 128),
        "b3": 0.01 * jax.random.normal(ks[5], (128,), jnp.float32),
        "w_fc1": lin_w(ks[6], 128 * 3 * 3, 512),
        "b_fc1": 0.01 * jax.random.normal(ks[7], (512,), jnp.float32),
        "w_fc2": lin_w(ks[8], 512, num_classes),
        "b_fc2": 0.01 * jax.random.normal(ks[9], (num_classes,), jnp.float32),
    }


if __name__ == "__main__":
    key = jax.random.PRNGKey(0)
    k_param, k_x = jax.random.split(key)
    params = init_params(k_param, num_classes=10)

    # Input consistent with the module: 1 channel, 28x28 (conv3+pool -> 3x3).
    x = jax.random.normal(k_x, (2, 1, 28, 28), jnp.float32)

    out = jax.jit(cnn8_forward)(x, params)
    out = jax.block_until_ready(out)

    ref = jax.block_until_ready(reference_forward(x, params))
    assert out.shape == (2, 10)
    err = jnp.max(jnp.abs(out - ref))
    # bf16 matmul inputs with f32 accumulation -> slightly looser tolerance.
    assert jnp.allclose(out, ref, atol=3e-2, rtol=3e-2), f"max abs err = {err}"

    print("KERNEL_OK")
</pallas_src>

<mosaic_0001>
module attributes {stable_mosaic.version = 11 : i64} {
  func.func @kernel(%arg0: i32, %arg1: memref<240x4xbf16, #tpu.memory_space<vmem>>, %arg2: memref<16x128xbf16, #tpu.memory_space<vmem>>, %arg3: memref<1x32xf32, #tpu.memory_space<vmem>>, %arg4: memref<240x32xbf16, #tpu.memory_space<vmem>>) attributes {dimension_semantics = [#tpu.dimension_semantics<parallel>], iteration_bounds = array<i64: 2>, scalar_prefetch = 0 : i64, scratch_operands = 0 : i64, tpu.core_type = #tpu.core_type<tc>, window_params = [{transform_indices = @transform_0, window_bounds = array<i64: 240, 4>}, {pipeline_mode = #tpu.pipeline_mode<synchronous>, transform_indices = @transform_1, window_bounds = array<i64: 16, 128>}, {pipeline_mode = #tpu.pipeline_mode<synchronous>, transform_indices = @transform_2, window_bounds = array<i64: 1, 32>}, {transform_indices = @transform_3, window_bounds = array<i64: 240, 32>}]} {
    %c0 = arith.constant 0 : index
    %c0_0 = arith.constant 0 : index
    %0 = vector.load %arg1[%c0, %c0_0] : memref<240x4xbf16, #tpu.memory_space<vmem>>, vector<224x4xbf16>
    %c1 = arith.constant 1 : index
    %c0_1 = arith.constant 0 : index
    %1 = vector.load %arg1[%c1, %c0_1] : memref<240x4xbf16, #tpu.memory_space<vmem>>, vector<224x4xbf16>
    %c15 = arith.constant 15 : index
    %c0_2 = arith.constant 0 : index
    %2 = vector.load %arg1[%c15, %c0_2] : memref<240x4xbf16, #tpu.memory_space<vmem>>, vector<224x4xbf16>
    %c16 = arith.constant 16 : index
    %c0_3 = arith.constant 0 : index
    %3 = vector.load %arg1[%c16, %c0_3] : memref<240x4xbf16, #tpu.memory_space<vmem>>, vector<224x4xbf16>
    %4 = tpu.concatenate %0, %1, %2, %3 in 1 : vector<224x4xbf16>, vector<224x4xbf16>, vector<224x4xbf16>, vector<224x4xbf16> -> vector<224x16xbf16>
    %c0_4 = arith.constant 0 : index
    %c0_5 = arith.constant 0 : index
    %5 = vector.load %arg2[%c0_4, %c0_5] : memref<16x128xbf16, #tpu.memory_space<vmem>>, vector<16x128xbf16>
    %cst = arith.constant dense<0.000000e+00> : vector<224x128xf32>
    %6 = tpu.matmul %4, %5, %cst {dimension_numbers = #tpu.dot_dimension_numbers<[1], [0], [0], [1], [0, 0, 1, 1], [], []>} : vector<224x16xbf16>, vector<16x128xbf16>, vector<224x128xf32> -> vector<224x128xf32>
    %7 = vector.extract_strided_slice %6 {offsets = [0, 0], sizes = [224, 32], strides = [1, 1]} : vector<224x128xf32> to vector<224x32xf32>
    %8 = vector.extract_strided_slice %6 {offsets = [0, 32], sizes = [224, 32], strides = [1, 1]} : vector<224x128xf32> to vector<224x32xf32>
    %9 = arith.maximumf %7, %8 : vector<224x32xf32>
    %10 = vector.extract_strided_slice %6 {offsets = [0, 64], sizes = [224, 32], strides = [1, 1]} : vector<224x128xf32> to vector<224x32xf32>
    %11 = vector.extract_strided_slice %6 {offsets = [0, 96], sizes = [224, 32], strides = [1, 1]} : vector<224x128xf32> to vector<224x32xf32>
    %12 = arith.maximumf %10, %11 : vector<224x32xf32>
    %13 = arith.maximumf %9, %12 : vector<224x32xf32>
    %c0_6 = arith.constant 0 : index
    %c0_7 = arith.constant 0 : index
    %14 = vector.load %arg3[%c0_6, %c0_7] : memref<1x32xf32, #tpu.memory_space<vmem>>, vector<1x32xf32>
    %15 = vector.broadcast %14 : vector<1x32xf32> to vector<224x32xf32>
    %16 = arith.addf %13, %15 : vector<224x32xf32>
    %cst_8 = arith.constant 0.000000e+00 : f32
    %17 = vector.broadcast %cst_8 : f32 to vector<224x32xf32>
    %18 = arith.maximumf %16, %17 : vector<224x32xf32>
    %19 = arith.truncf %18 : vector<224x32xf32> to vector<224x32xbf16>
    %c0_9 = arith.constant 0 : index
    %c0_10 = arith.constant 0 : index
    %20 = vector.load %arg4[%c0_9, %c0_10] : memref<240x32xbf16, #tpu.memory_space<vmem>>, vector<224x32xbf16>
    tpu.vector_store %arg4[%c0_9, %c0_10], %19 {strides = array<i32>} : memref<240x32xbf16, #tpu.memory_space<vmem>>, vector<224x32xbf16>,
    return
  }
  func.func @transform_0(%arg0: i32) -> (i32, i32) {
    %c0_i32 = arith.constant 0 : i32
    %c0_i32_0 = arith.constant 0 : i32
    return %arg0, %c0_i32 : i32, i32
  }
  func.func @transform_1(%arg0: i32) -> (i32, i32) {
    %c0_i32 = arith.constant 0 : i32
    %c0_i32_0 = arith.constant 0 : i32
    %c0_i32_1 = arith.constant 0 : i32
    return %c0_i32, %c0_i32_0 : i32, i32
  }
  func.func @transform_2(%arg0: i32) -> (i32, i32) {
    %c0_i32 = arith.constant 0 : i32
    %c0_i32_0 = arith.constant 0 : i32
    %c0_i32_1 = arith.constant 0 : i32
    return %c0_i32, %c0_i32_0 : i32, i32
  }
  func.func @transform_3(%arg0: i32) -> (i32, i32) {
    %c0_i32 = arith.constant 0 : i32
    %c0_i32_0 = arith.constant 0 : i32
    return %arg0, %c0_i32 : i32, i32
  }
}

module attributes {stable_mosaic.version = 11 : i64} {
  func.func @kernel(%arg0: i32, %arg1: memref<80x128xbf16, #tpu.memory_space<vmem>>, %arg2: memref<4x128x256xbf16, #tpu.memory_space<vmem>>, %arg3: memref<1x64xf32, #tpu.memory_space<vmem>>, %arg4: memref<80x64xbf16, #tpu.memory_space<vmem>>) attributes {dimension_semantics = [#tpu.dimension_semantics<parallel>], iteration_bounds = array<i64: 2>, scalar_prefetch = 0 : i64, scratch_operands = 0 : i64, tpu.core_type = #tpu.core_type<tc>, window_params = [{transform_indices = @transform_0, window_bounds = array<i64: 80, 128>}, {pipeline_mode = #tpu.pipeline_mode<synchronous>, transform_indices = @transform_1, window_bounds = array<i64: 4, 128, 256>}, {pipeline_mode = #tpu.pipeline_mode<synchronous>, transform_indices = @transform_2, window_bounds = array<i64: 1, 64>}, {transform_indices = @transform_3, window_bounds = array<i64: 80, 64>}]} {
    %c0 = arith.constant 0 : index
    %c0_0 = arith.constant 0 : index
    %0 = vector.load %arg1[%c0, %c0_0] : memref<80x128xbf16, #tpu.memory_space<vmem>>, vector<64x128xbf16>
    %c0_1 = arith.constant 0 : index
    %c0_2 = arith.constant 0 : index
    %c0_3 = arith.constant 0 : index
    %1 = vector.load %arg2[%c0_1, %c0_2, %c0_3] : memref<4x128x256xbf16, #tpu.memory_space<vmem>>, vector<1x128x256xbf16>
    %2 = vector.shape_cast %1 : vector<1x128x256xbf16> to vector<128x256xbf16>
    %cst = arith.constant dense<0.000000e+00> : vector<64x256xf32>
    %3 = tpu.matmul %0, %2, %cst {dimension_numbers = #tpu.dot_dimension_numbers<[1], [0], [0], [1], [0, 0, 1, 1], [], []>} : vector<64x128xbf16>, vector<128x256xbf16>, vector<64x256xf32> -> vector<64x256xf32>
    %c1 = arith.constant 1 : index
    %c0_4 = arith.constant 0 : index
    %4 = vector.load %arg1[%c1, %c0_4] : memref<80x128xbf16, #tpu.memory_space<vmem>>, vector<64x128xbf16>
    %c1_5 = arith.constant 1 : index
    %c0_6 = arith.constant 0 : index
    %c0_7 = arith.constant 0 : index
    %5 = vector.load %arg2[%c1_5, %c0_6, %c0_7] : memref<4x128x256xbf16, #tpu.memory_space<vmem>>, vector<1x128x256xbf16>
    %6 = vector.shape_cast %5 : vector<1x128x256xbf16> to vector<128x256xbf16>
    %cst_8 = arith.constant dense<0.000000e+00> : vector<64x256xf32>
    %7 = tpu.matmul %4, %6, %cst_8 {dimension_numbers = #tpu.dot_dimension_numbers<[1], [0], [0], [1], [0, 0, 1, 1], [], []>} : vector<64x128xbf16>, vector<128x256xbf16>, vector<64x256xf32> -> vector<64x256xf32>
    %8 = arith.addf %3, %7 : vector<64x256xf32>
    %c8 = arith.constant 8 : index
    %c0_9 = arith.constant 0 : index
    %9 = vector.load %arg1[%c8, %c0_9] : memref<80x128xbf16, #tpu.memory_space<vmem>>, vector<64x128xbf16>
    %c2 = arith.constant 2 : index
    %c0_10 = arith.constant 0 : index
    %c0_11 = arith.constant 0 : index
    %10 = vector.load %arg2[%c2, %c0_10, %c0_11] : memref<4x128x256xbf16, #tpu.memory_space<vmem>>, vector<1x128x256xbf16>
    %11 = vector.shape_cast %10 : vector<1x128x256xbf16> to vector<128x256xbf16>
    %cst_12 = arith.constant dense<0.000000e+00> : vector<64x256xf32>
    %12 = tpu.matmul %9, %11, %cst_12 {dimension_numbers = #tpu.dot_dimension_numbers<[1], [0], [0], [1], [0, 0, 1, 1], [], []>} : vector<64x128xbf16>, vector<128x256xbf16>, vector<64x256xf32> -> vector<64x256xf32>
    %13 = arith.addf %8, %12 : vector<64x256xf32>
    %c9 = arith.constant 9 : index
    %c0_13 = arith.constant 0 : index
    %14 = vector.load %arg1[%c9, %c0_13] : memref<80x128xbf16, #tpu.memory_space<vmem>>, vector<64x128xbf16>
    %c3 = arith.constant 3 : index
    %c0_14 = arith.constant 0 : index
    %c0_15 = arith.constant 0 : index
    %15 = vector.load %arg2[%c3, %c0_14, %c0_15] : memref<4x128x256xbf16, #tpu.memory_space<vmem>>, vector<1x128x256xbf16>
    %16 = vector.shape_cast %15 : vector<1x128x256xbf16> to vector<128x256xbf16>
    %cst_16 = arith.constant dense<0.000000e+00> : vector<64x256xf32>
    %17 = tpu.matmul %14, %16, %cst_16 {dimension_numbers = #tpu.dot_dimension_numbers<[1], [0], [0], [1], [0, 0, 1, 1], [], []>} : vector<64x128xbf16>, vector<128x256xbf16>, vector<64x256xf32> -> vector<64x256xf32>
    %18 = arith.addf %13, %17 : vector<64x256xf32>
    %19 = vector.extract_strided_slice %18 {offsets = [0, 0], sizes = [64, 64], strides = [1, 1]} : vector<64x256xf32> to vector<64x64xf32>
    %20 = vector.extract_strided_slice %18 {offsets = [0, 64], sizes = [64, 64], strides = [1, 1]} : vector<64x256xf32> to vector<64x64xf32>
    %21 = arith.maximumf %19, %20 : vector<64x64xf32>
    %22 = vector.extract_strided_slice %18 {offsets = [0, 128], sizes = [64, 64], strides = [1, 1]} : vector<64x256xf32> to vector<64x64xf32>
    %23 = vector.extract_strided_slice %18 {offsets = [0, 192], sizes = [64, 64], strides = [1, 1]} : vector<64x256xf32> to vector<64x64xf32>
    %24 = arith.maximumf %22, %23 : vector<64x64xf32>
    %25 = arith.maximumf %21, %24 : vector<64x64xf32>
    %c0_17 = arith.constant 0 : index
    %c0_18 = arith.constant 0 : index
    %26 = vector.load %arg3[%c0_17, %c0_18] : memref<1x64xf32, #tpu.memory_space<vmem>>, vector<1x64xf32>
    %27 = vector.broadcast %26 : vector<1x64xf32> to vector<64x64xf32>
    %28 = arith.addf %25, %27 : vector<64x64xf32>
    %cst_19 = arith.constant 0.000000e+00 : f32
    %29 = vector.broadcast %cst_19 : f32 to vector<64x64xf32>
    %30 = arith.maximumf %28, %29 : vector<64x64xf32>
    %31 = arith.truncf %30 : vector<64x64xf32> to vector<64x64xbf16>
    %c0_20 = arith.constant 0 : index
    %c0_21 = arith.constant 0 : index
    %32 = vector.load %arg4[%c0_20, %c0_21] : memref<80x64xbf16, #tpu.memory_space<vmem>>, vector<64x64xbf16>
    tpu.vector_store %arg4[%c0_20, %c0_21], %31 {strides = array<i32>} : memref<80x64xbf16, #tpu.memory_space<vmem>>, vector<64x64xbf16>,
    return
  }
  func.func @transform_0(%arg0: i32) -> (i32, i32) {
    %c0_i32 = arith.constant 0 : i32
    %c0_i32_0 = arith.constant 0 : i32
    return %arg0, %c0_i32 : i32, i32
  }
  func.func @transform_1(%arg0: i32) -> (i32, i32, i32) {
    %c0_i32 = arith.constant 0 : i32
    %c0_i32_0 = arith.constant 0 : i32
    %c0_i32_1 = arith.constant 0 : i32
    %c0_i32_2 = arith.constant 0 : i32
    return %c0_i32, %c0_i32_0, %c0_i32_1 : i32, i32, i32
  }
  func.func @transform_2(%arg0: i32) -> (i32, i32) {
    %c0_i32 = arith.constant 0 : i32
    %c0_i32_0 = arith.constant 0 : i32
    %c0_i32_1 = arith.constant 0 : i32
    return %c0_i32, %c0_i32_0 : i32, i32
  }
  func.func @transform_3(%arg0: i32) -> (i32, i32) {
    %c0_i32 = arith.constant 0 : i32
    %c0_i32_0 = arith.constant 0 : i32
    return %arg0, %c0_i32 : i32, i32
  }
}

module attributes {stable_mosaic.version = 11 : i64} {
  func.func @kernel(%arg0: i32, %arg1: memref<32x256xbf16, #tpu.memory_space<vmem>>, %arg2: memref<4x256x512xbf16, #tpu.memory_space<vmem>>, %arg3: memref<1x128xf32, #tpu.memory_space<vmem>>, %arg4: memref<32x128xbf16, #tpu.memory_space<vmem>>) attributes {dimension_semantics = [#tpu.dimension_semantics<parallel>], iteration_bounds = array<i64: 2>, scalar_prefetch = 0 : i64, scratch_operands = 0 : i64, tpu.core_type = #tpu.core_type<tc>, window_params = [{transform_indices = @transform_0, window_bounds = array<i64: 32, 256>}, {pipeline_mode = #tpu.pipeline_mode<synchronous>, transform_indices = @transform_1, window_bounds = array<i64: 4, 256, 512>}, {pipeline_mode = #tpu.pipeline_mode<synchronous>, transform_indices = @transform_2, window_bounds = array<i64: 1, 128>}, {transform_indices = @transform_3, window_bounds = array<i64: 32, 128>}]} {
    %c0 = arith.constant 0 : index
    %c0_0 = arith.constant 0 : index
    %0 = vector.load %arg1[%c0, %c0_0] : memref<32x256xbf16, #tpu.memory_space<vmem>>, vector<16x256xbf16>
    %c0_1 = arith.constant 0 : index
    %c0_2 = arith.constant 0 : index
    %c0_3 = arith.constant 0 : index
    %1 = vector.load %arg2[%c0_1, %c0_2, %c0_3] : memref<4x256x512xbf16, #tpu.memory_space<vmem>>, vector<1x256x512xbf16>
    %2 = vector.shape_cast %1 : vector<1x256x512xbf16> to vector<256x512xbf16>
    %cst = arith.constant dense<0.000000e+00> : vector<16x512xf32>
    %3 = tpu.matmul %0, %2, %cst {dimension_numbers = #tpu.dot_dimension_numbers<[1], [0], [0], [1], [0, 0, 1, 1], [], []>} : vector<16x256xbf16>, vector<256x512xbf16>, vector<16x512xf32> -> vector<16x512xf32>
    %c1 = arith.constant 1 : index
    %c0_4 = arith.constant 0 : index
    %4 = vector.load %arg1[%c1, %c0_4] : memref<32x256xbf16, #tpu.memory_space<vmem>>, vector<16x256xbf16>
    %c1_5 = arith.constant 1 : index
    %c0_6 = arith.constant 0 : index
    %c0_7 = arith.constant 0 : index
    %5 = vector.load %arg2[%c1_5, %c0_6, %c0_7] : memref<4x256x512xbf16, #tpu.memory_space<vmem>>, vector<1x256x512xbf16>
    %6 = vector.shape_cast %5 : vector<1x256x512xbf16> to vector<256x512xbf16>
    %cst_8 = arith.constant dense<0.000000e+00> : vector<16x512xf32>
    %7 = tpu.matmul %4, %6, %cst_8 {dimension_numbers = #tpu.dot_dimension_numbers<[1], [0], [0], [1], [0, 0, 1, 1], [], []>} : vector<16x256xbf16>, vector<256x512xbf16>, vector<16x512xf32> -> vector<16x512xf32>
    %8 = arith.addf %3, %7 : vector<16x512xf32>
    %c4 = arith.constant 4 : index
    %c0_9 = arith.constant 0 : index
    %9 = vector.load %arg1[%c4, %c0_9] : memref<32x256xbf16, #tpu.memory_space<vmem>>, vector<16x256xbf16>
    %c2 = arith.constant 2 : index
    %c0_10 = arith.constant 0 : index
    %c0_11 = arith.constant 0 : index
    %10 = vector.load %arg2[%c2, %c0_10, %c0_11] : memref<4x256x512xbf16, #tpu.memory_space<vmem>>, vector<1x256x512xbf16>
    %11 = vector.shape_cast %10 : vector<1x256x512xbf16> to vector<256x512xbf16>
    %cst_12 = arith.constant dense<0.000000e+00> : vector<16x512xf32>
    %12 = tpu.matmul %9, %11, %cst_12 {dimension_numbers = #tpu.dot_dimension_numbers<[1], [0], [0], [1], [0, 0, 1, 1], [], []>} : vector<16x256xbf16>, vector<256x512xbf16>, vector<16x512xf32> -> vector<16x512xf32>
    %13 = arith.addf %8, %12 : vector<16x512xf32>
    %c5 = arith.constant 5 : index
    %c0_13 = arith.constant 0 : index
    %14 = vector.load %arg1[%c5, %c0_13] : memref<32x256xbf16, #tpu.memory_space<vmem>>, vector<16x256xbf16>
    %c3 = arith.constant 3 : index
    %c0_14 = arith.constant 0 : index
    %c0_15 = arith.constant 0 : index
    %15 = vector.load %arg2[%c3, %c0_14, %c0_15] : memref<4x256x512xbf16, #tpu.memory_space<vmem>>, vector<1x256x512xbf16>
    %16 = vector.shape_cast %15 : vector<1x256x512xbf16> to vector<256x512xbf16>
    %cst_16 = arith.constant dense<0.000000e+00> : vector<16x512xf32>
    %17 = tpu.matmul %14, %16, %cst_16 {dimension_numbers = #tpu.dot_dimension_numbers<[1], [0], [0], [1], [0, 0, 1, 1], [], []>} : vector<16x256xbf16>, vector<256x512xbf16>, vector<16x512xf32> -> vector<16x512xf32>
    %18 = arith.addf %13, %17 : vector<16x512xf32>
    %19 = vector.extract_strided_slice %18 {offsets = [0, 0], sizes = [16, 128], strides = [1, 1]} : vector<16x512xf32> to vector<16x128xf32>
    %20 = vector.extract_strided_slice %18 {offsets = [0, 128], sizes = [16, 128], strides = [1, 1]} : vector<16x512xf32> to vector<16x128xf32>
    %21 = arith.maximumf %19, %20 : vector<16x128xf32>
    %22 = vector.extract_strided_slice %18 {offsets = [0, 256], sizes = [16, 128], strides = [1, 1]} : vector<16x512xf32> to vector<16x128xf32>
    %23 = vector.extract_strided_slice %18 {offsets = [0, 384], sizes = [16, 128], strides = [1, 1]} : vector<16x512xf32> to vector<16x128xf32>
    %24 = arith.maximumf %22, %23 : vector<16x128xf32>
    %25 = arith.maximumf %21, %24 : vector<16x128xf32>
    %c0_17 = arith.constant 0 : index
    %c0_18 = arith.constant 0 : index
    %26 = vector.load %arg3[%c0_17, %c0_18] : memref<1x128xf32, #tpu.memory_space<vmem>>, vector<1x128xf32>
    %27 = vector.broadcast %26 : vector<1x128xf32> to vector<16x128xf32>
    %28 = arith.addf %25, %27 : vector<16x128xf32>
    %cst_19 = arith.constant 0.000000e+00 : f32
    %29 = vector.broadcast %cst_19 : f32 to vector<16x128xf32>
    %30 = arith.maximumf %28, %29 : vector<16x128xf32>
    %31 = arith.truncf %30 : vector<16x128xf32> to vector<16x128xbf16>
    %c0_20 = arith.constant 0 : index
    %c0_21 = arith.constant 0 : index
    %32 = vector.load %arg4[%c0_20, %c0_21] : memref<32x128xbf16, #tpu.memory_space<vmem>>, vector<16x128xbf16>
    tpu.vector_store %arg4[%c0_20, %c0_21], %31 {strides = array<i32>} : memref<32x128xbf16, #tpu.memory_space<vmem>>, vector<16x128xbf16>,
    return
  }
  func.func @transform_0(%arg0: i32) -> (i32, i32) {
    %c0_i32 = arith.constant 0 : i32
    %c0_i32_0 = arith.constant 0 : i32
    return %arg0, %c0_i32 : i32, i32
  }
  func.func @transform_1(%arg0: i32) -> (i32, i32, i32) {
    %c0_i32 = arith.constant 0 : i32
    %c0_i32_0 = arith.constant 0 : i32
    %c0_i32_1 = arith.constant 0 : i32
    %c0_i32_2 = arith.constant 0 : i32
    return %c0_i32, %c0_i32_0, %c0_i32_1 : i32, i32, i32
  }
  func.func @transform_2(%arg0: i32) -> (i32, i32) {
    %c0_i32 = arith.constant 0 : i32
    %c0_i32_0 = arith.constant 0 : i32
    %c0_i32_1 = arith.constant 0 : i32
    return %c0_i32, %c0_i32_0 : i32, i32
  }
  func.func @transform_3(%arg0: i32) -> (i32, i32) {
    %c0_i32 = arith.constant 0 : i32
    %c0_i32_0 = arith.constant 0 : i32
    return %arg0, %c0_i32 : i32, i32
  }
}

module attributes {stable_mosaic.version = 11 : i64} {
  func.func @_mlp_kernel(%arg0: i32, %arg1: memref<8x1152xbf16, #tpu.memory_space<vmem>>, %arg2: memref<1152x512xbf16, #tpu.memory_space<vmem>>, %arg3: memref<1x512xf32, #tpu.memory_space<vmem>>, %arg4: memref<512x128xbf16, #tpu.memory_space<vmem>>, %arg5: memref<1x128xf32, #tpu.memory_space<vmem>>, %arg6: memref<8x128xf32, #tpu.memory_space<vmem>>) attributes {dimension_semantics = [#tpu.dimension_semantics<parallel>], iteration_bounds = array<i64: 1>, scalar_prefetch = 0 : i64, scratch_operands = 0 : i64, tpu.core_type = #tpu.core_type<tc>, window_params = [{transform_indices = @transform_0, window_bounds = array<i64: 8, 1152>}, {pipeline_mode = #tpu.pipeline_mode<synchronous>, transform_indices = @transform_1, window_bounds = array<i64: 1152, 512>}, {pipeline_mode = #tpu.pipeline_mode<synchronous>, transform_indices = @transform_2, window_bounds = array<i64: 1, 512>}, {pipeline_mode = #tpu.pipeline_mode<synchronous>, transform_indices = @transform_3, window_bounds = array<i64: 512, 128>}, {pipeline_mode = #tpu.pipeline_mode<synchronous>, transform_indices = @transform_4, window_bounds = array<i64: 1, 128>}, {transform_indices = @transform_5, window_bounds = array<i64: 8, 128>}]} {
    %c0 = arith.constant 0 : index
    %c0_0 = arith.constant 0 : index
    %0 = vector.load %arg1[%c0, %c0_0] : memref<8x1152xbf16, #tpu.memory_space<vmem>>, vector<8x1152xbf16>
    %c0_1 = arith.constant 0 : index
    %c0_2 = arith.constant 0 : index
    %1 = vector.load %arg2[%c0_1, %c0_2] : memref<1152x512xbf16, #tpu.memory_space<vmem>>, vector<1152x512xbf16>
    %cst = arith.constant dense<0.000000e+00> : vector<8x512xf32>
    %2 = tpu.matmul %0, %1, %cst {dimension_numbers = #tpu.dot_dimension_numbers<[1], [0], [0], [1], [0, 0, 1, 1], [], []>} : vector<8x1152xbf16>, vector<1152x512xbf16>, vector<8x512xf32> -> vector<8x512xf32>
    %c0_3 = arith.constant 0 : index
    %c0_4 = arith.constant 0 : index
    %3 = vector.load %arg3[%c0_3, %c0_4] : memref<1x512xf32, #tpu.memory_space<vmem>>, vector<1x512xf32>
    %4 = vector.broadcast %3 : vector<1x512xf32> to vector<8x512xf32>
    %5 = arith.addf %2, %4 : vector<8x512xf32>
    %cst_5 = arith.constant 0.000000e+00 : f32
    %6 = vector.broadcast %cst_5 : f32 to vector<8x512xf32>
    %7 = arith.maximumf %5, %6 : vector<8x512xf32>
    %8 = arith.truncf %7 : vector<8x512xf32> to vector<8x512xbf16>
    %c0_6 = arith.constant 0 : index
    %c0_7 = arith.constant 0 : index
    %9 = vector.load %arg4[%c0_6, %c0_7] : memref<512x128xbf16, #tpu.memory_space<vmem>>, vector<512x128xbf16>
    %cst_8 = arith.constant dense<0.000000e+00> : vector<8x128xf32>
    %10 = tpu.matmul %8, %9, %cst_8 {dimension_numbers = #tpu.dot_dimension_numbers<[1], [0], [0], [1], [0, 0, 1, 1], [], []>} : vector<8x512xbf16>, vector<512x128xbf16>, vector<8x128xf32> -> vector<8x128xf32>
    %c0_9 = arith.constant 0 : index
    %c0_10 = arith.constant 0 : index
    %11 = vector.load %arg5[%c0_9, %c0_10] : memref<1x128xf32, #tpu.memory_space<vmem>>, vector<1x128xf32>
    %12 = vector.broadcast %11 : vector<1x128xf32> to vector<8x128xf32>
    %13 = arith.addf %10, %12 : vector<8x128xf32>
    %c0_11 = arith.constant 0 : index
    %c0_12 = arith.constant 0 : index
    %14 = vector.load %arg6[%c0_11, %c0_12] : memref<8x128xf32, #tpu.memory_space<vmem>>, vector<8x128xf32>
    tpu.vector_store %arg6[%c0_11, %c0_12], %13 {strides = array<i32>} : memref<8x128xf32, #tpu.memory_space<vmem>>, vector<8x128xf32>,
    return
  }
  func.func @transform_0(%arg0: i32) -> (i32, i32) {
    %c0_i32 = arith.constant 0 : i32
    %c0_i32_0 = arith.constant 0 : i32
    return %arg0, %c0_i32 : i32, i32
  }
  func.func @transform_1(%arg0: i32) -> (i32, i32) {
    %c0_i32 = arith.constant 0 : i32
    %c0_i32_0 = arith.constant 0 : i32
    %c0_i32_1 = arith.constant 0 : i32
    return %c0_i32, %c0_i32_0 : i32, i32
  }
  func.func @transform_2(%arg0: i32) -> (i32, i32) {
    %c0_i32 = arith.constant 0 : i32
    %c0_i32_0 = arith.constant 0 : i32
    %c0_i32_1 = arith.constant 0 : i32
    return %c0_i32, %c0_i32_0 : i32, i32
  }
  func.func @transform_3(%arg0: i32) -> (i32, i32) {
    %c0_i32 = arith.constant 0 : i32
    %c0_i32_0 = arith.constant 0 : i32
    %c0_i32_1 = arith.constant 0 : i32
    return %c0_i32, %c0_i32_0 : i32, i32
  }
  func.func @transform_4(%arg0: i32) -> (i32, i32) {
    %c0_i32 = arith.constant 0 : i32
    %c0_i32_0 = arith.constant 0 : i32
    %c0_i32_1 = arith.constant 0 : i32
    return %c0_i32, %c0_i32_0 : i32, i32
  }
  func.func @transform_5(%arg0: i32) -> (i32, i32) {
    %c0_i32 = arith.constant 0 : i32
    %c0_i32_0 = arith.constant 0 : i32
    return %arg0, %c0_i32 : i32, i32
  }
}

</mosaic_0001>

<bundles_post_ra>
// kernel: cnn8_forward.4
= control target key start
LH: loop header
LB: loop body
LE: loop exit
PB: predicated region body
PF: predicated region fallthrough
CT: control target
= control target key end

     0   :  { %s1684_s12 = smov 0   ;;  %s2369_s0 = inlined_call_operand.vmem [shape: bf16[480,4], index: 0, kind: input, shape index: {}]   ;;  %s2370_s1 = inlined_call_operand.vmem [shape: bf16[16,128], index: 1, kind: input, shape index: {}]   ;;  %s2371_s2 = inlined_call_operand.vmem [shape: f32[1,32], index: 2, kind: input, shape index: {}]   ;;  %s2372_s3 = inlined_call_operand.vmem [shape: bf16[480,32], index: 3, kind: output, shape index: {}]  }
   0x1 LB: > { %s1447_s13 = sadd.s32 4294967295, %s1657_s12   ;;  %p1451_p0 = scmp.ge.s32.totalorder %s1657_s12, 1  ;;  %s1657_s12 = sphi %s1684_s12, %s13_s12  }
   0x2   : > { %p138_p1 = scmp.lt.s32.totalorder %s1657_s12, 3 }
   0x4   : > { %p139_p2 = pnand %p1451_p0, %p138_p1 }
   0x5   : > { %s162_s14 = smul.u32 (!%p139_p2), 30, %s1447_s13  ;;  %s1659_s21 = smov (!%p139_p2), 12  }
   0x6   : > { %142 = sbr.rel (%p139_p2) target bundleno = 670 (0x29e), region = 32  ;;  %s1660_s22 = smov (!%p139_p2), 8  }
   0x7   : > { %p163_p3 = scmp.lt.s32.totalorder (!%p139_p2), %s162_s14, 59  ;;  %s1661_s23 = smov (!%p139_p2), 4  }
   0x8   : > { %s1662_s24 = smov (!%p139_p2), 96   ;;  %s1663_s25 = smov (!%p139_p2), 64  }
   0xb   : > { %s2374_s14 = smov (!%p163_p3, %s162_s14), 59  ;;  %v1650_v0 = vld [vmem:[%s2370_s1] sm:$0xff]   ;;  %vm446_vm0 = vsmask.f32 4352  ;;  %vm280_vm1 = vsmask.f32 7424 }
   0xc   : > { %s1452_s15 = sshll.u32 %s2374_s14, 2  ;;  %1574 = vmatprep.subr.bf16.mxu0 %v1650_v0  ;;  %1604 = vmatprep.subr.bf16.mxu1 %v1650_v0  ;;  %vm638_vm2 = vcmask 31744   ;;  %vm667_vm3 = vcmask 64512   ;;  %vm696_vm4 = vcmask 97280   ;;  %vm733_vm5 = vcmask 130048  }
   0xd   : > { %s1700_s18 = scalar_lea.vmem %s2369_s0, %s1452_s15  ;;  %1575 = vmatpush3.bf16.msra.mxu0 %v1650_v0  ;;  %1605 = vmatpush3.bf16.msra.mxu1 %v1650_v0  ;;  %s2255_s30 = scalar_lea.vmem %s2372_s3, %s1452_s15  ;;  %vm1362_vm6 = vcmask 257024  }
   0xe   : > { %v179_v1 = vld [vmem:[%s1700_s18 + $0x10] sm:$0xf]  ;;  %v180_v2 = vld [vmem:[%s1700_s18 + $0x14] sm:$0xf]  ;;  %v181_v3 = vld [vmem:[%s1700_s18 + $0x18] sm:$0xf] }
   0xf   : > { %v1709_v4 = vld [vmem:[%s1700_s18 + $0x1c] sm:$0xf]  ;;  %v1711_v5 = vcombine.low %v179_v1, %v180_v2  ;;  %v1471_v6 = vcombine.low %v180_v2, %v181_v3  ;;  %v177_v7 = vld [vmem:[%s1700_s18 + $0x8] sm:$0xf]  ;;  %v178_v8 = vld [vmem:[%s1700_s18 + $0xc] sm:$0xf] }
  0x10   : > { %v1716_v9 = vcombine.low %v181_v3, %v1709_v4  ;;  %v204_v10 = vld [vmem:[%s1700_s18 + $0x4] sm:$0x8]  ;;  %v1719_v11 = vcombine.low %v177_v7, %v178_v8  ;;  %v1470_v12 = vcombine.low %v178_v8, %v179_v1  ;;  %v1728_v18 = vld [vmem:[%s1700_s18 + $0x40] sm:$0xf]  ;;  %v193_v28 = vld [vmem:[%s1700_s18 + $0x48] sm:$0xf] }
  0x11   : > { %612 = vrot.lane.b32.xlu1 %v1711_v5, %s1659_s21  ;;  %v1469_v13 = vcombine.low %v204_v10, %v177_v7  ;;  %v1724_v14 = vld [vmem:[%s1700_s18] sm:$0xff]   ;;  %v465_v15 = vshrl.u32 %v1471_v6, 16  ;;  %v468_v16 = vshll.u32 %v1471_v6, 16  ;;  %v297_v17 = vshll.u32 %v1711_v5, 16  ;;  %v194_v33 = vld [vmem:[%s1700_s18 + $0x4c] sm:$0xf] }
  0x12   : > { %610 = vrot.lane.b32.xlu0 %v1719_v11, %s1659_s21  ;;  %v456_v19 = vshrl.u32 %v1470_v12, 16  ;;  %v459_v20 = vshll.u32 %v1470_v12, 16  ;;  %v289_v21 = vshll.u32 %v1719_v11, 16  ;;  %v293_v22 = vshrl.u32 %v1719_v11, 16  ;;  %v192_v23 = vld [vmem:[%s1700_s18 + $0x44] sm:$0xf] }
  0x13   : > { %v448_v24 = vshrl.u32 %v1469_v13, 16  ;;  %v451_v25 = vshll.u32 %v1469_v13, 16  ;;  %v282_v26 = vshrl.u32 %v1724_v14, 16  ;;  %v284_v27 = vshll.u32 %v1724_v14, 16  ;;  %v195_v46 = vld [vmem:[%s1700_s18 + $0x50] sm:$0xf] }
  0x14   : > { %v458_v29 = vrot.slane %v456_v19, 3  ;;  %v461_v30 = vrot.slane %v459_v20, 4  ;;  %v291_v31 = vrot.slane %v289_v21, 1  ;;  %v467_v32 = vrot.slane %v465_v15, 3  ;;  %v196_v47 = vld [vmem:[%s1700_s18 + $0x54] sm:$0xf] }
  0x15   : > { %v450_v34 = vrot.slane %v448_v24, 3  ;;  %v453_v35 = vrot.slane %v451_v25, 4  ;;  %v286_v36 = vrot.slane %v284_v27, 1  ;;  %v470_v37 = vrot.slane %v468_v16, 4  ;;  %v183_v48 = vld [vmem:[%s1700_s18 + $0x20] sm:$0xf] }
  0x16   : > { %v462_v38 = vor.u32 %v461_v30, %v458_v29  ;;  %v295_v39 = vor.u32 %v293_v22, %v291_v31  ;;  %v299_v40 = vrot.slane %v297_v17, 1  ;;  %v1740_v41 = vcombine.low %v1728_v18, %v192_v23  ;;  %v184_v53 = vld [vmem:[%s1700_s18 + $0x24] sm:$0xf]  ;;  %v197_v24 = vld [vmem:[%s1700_s18 + $0x58] sm:$0xf] }
  0x17   : > { %v454_v42 = vor.u32 %v453_v35, %v450_v34  ;;  %v287_v43 = vor.u32 %v286_v36, %v282_v26  ;;  %v1742_v44 = vor.u32 %v470_v37, %v467_v32  ;;  %v1744_v45 = vcombine.low %v193_v28, %v194_v33  ;;  %v185_v27 = vld [vmem:[%s1700_s18 + $0x28] sm:$0xf] }
  0x18   : > { %v300_v49 = vsel %vm280_vm1, %v295_v39, %v299_v40  ;;  %v345_v50 = vshll.u32 %v1740_v41, 16  ;;  %v349_v51 = vshrl.u32 %v1740_v41, 16  ;;  %v301_v52 = vshrl.u32 %v1711_v5, 16 }
  0x19   : > { %v463_v54 = vsel %vm446_vm0, %v454_v42, %v462_v38  ;;  %v292_v55 = vsel %vm280_vm1, %v287_v43, %v291_v31  ;;  %v472_v56 = vsel %vm446_vm0, %v462_v38, %v1742_v44  ;;  %v353_v57 = vshll.u32 %v1744_v45, 16 }
  0x1a   : > { %581 = vrot.lane.b32.xlu1 %v463_v54, %s1660_s22  ;;  %397 = vrot.lane.b32.xlu0 %v292_v55, %s1661_s23  ;;  %v1761_v58 = vrot.slane %v345_v50, 1  ;;  %v303_v59 = vor.u32 %v301_v52, %v299_v40  ;;  %v305_v60 = vshll.u32 %v1716_v9, 16  ;;  %v1764_v61 = vcombine.low %v195_v46, %v196_v47  ;;  %v198_v50 = vld [vmem:[%s1700_s18 + $0x5c] sm:$0xf] }
  0x1b   : > { %v355_v62 = vrot.slane %v353_v57, 1  ;;  %v357_v63 = vshrl.u32 %v1744_v45, 16  ;;  %v1767_v0 = vcombine.low %v183_v48, %v184_v53  ;;  %v309_v1 = vshrl.u32 %v1716_v9, 16 }
  0x1c   : > { %v351_v2 = vor.u32 %v349_v51, %v1761_v58  ;;  %v307_v3 = vrot.slane %v305_v60, 1  ;;  %v361_v6 = vshll.u32 %v1764_v61, 16  ;;  %v1477_v7 = vcombine.low %v192_v23, %v193_v28  ;;  %v186_v51 = vld [vmem:[%s1700_s18 + $0x2c] sm:$0xf] }
  0x1d   : > { %v359_v8 = vor.u32 %v357_v63, %v355_v62  ;;  %v313_v10 = vshll.u32 %v1767_v0, 16  ;;  %v1478_v12 = vcombine.low %v194_v33, %v195_v46  ;;  %v1472_v13 = vcombine.low %v1709_v4, %v183_v48  ;;  %v200_v63 = vld [vmem:[%s1700_s18 + $0x64] sm:$0xf] }
  0x1e   : > { %583 = vrot.lane.b32.xlu1 %v472_v56, %s1660_s22  ;;  %399 = vrot.lane.b32.xlu0 %v300_v49, %s1661_s23  ;;  %v356_v15 = vsel %vm280_vm1, %v351_v2, %v355_v62  ;;  %v308_v16 = vsel %vm280_vm1, %v303_v59, %v307_v3  ;;  %v1778_v17 = vrot.slane %v361_v6, 1  ;;  %v311_v19 = vor.u32 %v309_v1, %v307_v3  ;;  %v199_v56 = vld [vmem:[%s1700_s18 + $0x60] sm:$0xf]  ;;  %v187_v1 = vld [vmem:[%s1700_s18 + $0x30] sm:$0xf] }
  0x1f   : > { %v1780_v20 = vrot.slane %v313_v10, 1  ;;  %v519_v21 = vshrl.u32 %v1477_v7, 16  ;;  %v522_v22 = vshll.u32 %v1477_v7, 16  ;;  %v528_v23 = vshrl.u32 %v1478_v12, 16  ;;  %v188_v2 = vld [vmem:[%s1700_s18 + $0x34] sm:$0xf] }
  0x20   : > { %v531_v25 = vshll.u32 %v1478_v12, 16  ;;  %v474_v26 = vshrl.u32 %v1472_v13, 16  ;;  %v477_v4 = vshll.u32 %v1472_v13, 16  ;;  %v364_v31 = vsel %vm280_vm1, %v359_v8, %v1778_v17 }
  0x21   : > { %v521_v28 = vrot.slane %v519_v21, 3  ;;  %v524_v29 = vrot.slane %v522_v22, 4  ;;  %v530_v30 = vrot.slane %v528_v23, 3  ;;  %v316_v35 = vsel %vm280_vm1, %v311_v19, %v1780_v20 }
  0x22   : > { %413 = vrot.lane.b32.xlu1 %v356_v15, %s1661_s23  ;;  %401 = vrot.lane.b32.xlu0 %v308_v16, %s1661_s23  ;;  %v533_v32 = vrot.slane %v531_v25, 4  ;;  %v476_v33 = vrot.slane %v474_v26, 3  ;;  %v479_v34 = vrot.slane %v477_v4, 4  ;;  %v1479_v37 = vcombine.low %v196_v47, %v197_v24  ;;  %v1828_v16 = vld [vmem:[%s1700_s18 + $0x68] sm:$0xf] }
  0x23   : > { %v1790_v36 = vor.u32 %v524_v29, %v521_v28  ;;  %v1473_v38 = vcombine.low %v184_v53, %v185_v27  ;;  %v1801_v57 = vcombine.low %v197_v24, %v198_v50  ;;  %v1805_v60 = vcombine.low %v185_v27, %v186_v51  ;;  %v1836_v25 = vld [vmem:[%s1700_s18 + $0x38] sm:$0xf] }
  0x24   : > { %v534_v39 = vor.u32 %v533_v32, %v530_v30  ;;  %v480_v40 = vor.u32 %v479_v34, %v476_v33  ;;  %v537_v42 = vshrl.u32 %v1479_v37, 16  ;;  %v540_v43 = vshll.u32 %v1479_v37, 16 }
  0x25   : > { %v483_v46 = vshrl.u32 %v1473_v38, 16  ;;  %v486_v48 = vshll.u32 %v1473_v38, 16  ;;  %v1818_v6 = vcombine.low %v199_v56, %v200_v63  ;;  %v1820_v7 = vcombine.low %v187_v1, %v188_v2 }
  0x26   : > { %415 = vrot.lane.b32.xlu1 %v364_v31, %s1661_s23  ;;  %403 = vrot.lane.b32.xlu0 %v316_v35, %s1661_s23  ;;  %v535_v49 = vsel %vm446_vm0, %v1790_v36, %v534_v39  ;;  %v481_v47 = vsel %vm446_vm0, %v1742_v44, %v480_v40  ;;  %v539_v52 = vrot.slane %v537_v42, 3  ;;  %v542_v53 = vrot.slane %v540_v43, 4 }
  0x27   : > { %v485_v54 = vrot.slane %v483_v46, 3  ;;  %v488_v55 = vrot.slane %v486_v48, 4  ;;  %v365_v8 = vshrl.u32 %v1764_v61, 16  ;;  %v369_v10 = vshll.u32 %v1801_v57, 16 }
  0x28   : > { %v1803_v59 = vor.u32 %v542_v53, %v539_v52  ;;  %v321_v12 = vshll.u32 %v1805_v60, 16  ;;  %v1480_v13 = vcombine.low %v198_v50, %v199_v56  ;;  %v1474_v15 = vcombine.low %v186_v51, %v187_v1 }
  0x29   : > { %v1807_v62 = vor.u32 %v488_v55, %v485_v54  ;;  %v317_v19 = vshrl.u32 %v1767_v0, 16  ;;  %v373_v21 = vshrl.u32 %v1801_v57, 16  ;;  %v377_v22 = vshll.u32 %v1818_v6, 16  ;;  %v1862_v54 = vld [vmem:[%s1700_s18 + $0x74] sm:$0xf] }
  0x2a   : > { %597 = vrot.lane.b32.xlu1 %v535_v49, %s1660_s22  ;;  %585 = vrot.lane.b32.xlu0 %v481_v47, %s1660_s22  ;;  %v544_v44 = vsel %vm446_vm0, %v534_v39, %v1803_v59  ;;  %v325_v23 = vshrl.u32 %v1805_v60, 16  ;;  %v329_v24 = vshll.u32 %v1820_v7, 16  ;;  %v367_v26 = vor.u32 %v365_v8, %v1778_v17  ;;  %v1851_v39 = vld [vmem:[%s1700_s18 + $0x70] sm:$0xf]  ;;  %v202_v47 = vld [vmem:[%s1700_s18 + $0x6c] sm:$0xf] }
  0x2b   : > { %v490_v3 = vsel %vm446_vm0, %v480_v40, %v1807_v62  ;;  %v371_v4 = vrot.slane %v369_v10, 1  ;;  %v323_v27 = vrot.slane %v321_v12, 1  ;;  %v1481_v28 = vcombine.low %v200_v63, %v1828_v16 }
  0x2c   : > { %v546_v29 = vshrl.u32 %v1480_v13, 16  ;;  %v549_v30 = vshll.u32 %v1480_v13, 16  ;;  %v492_v31 = vshrl.u32 %v1474_v15, 16  ;;  %v495_v32 = vshll.u32 %v1474_v15, 16 }
  0x2d   : > { %v319_v33 = vor.u32 %v317_v19, %v1780_v20  ;;  %v1475_v17 = vcombine.low %v188_v2, %v1836_v25  ;;  %v375_v34 = vor.u32 %v373_v21, %v371_v4  ;;  %v1846_v35 = vrot.slane %v377_v22, 1 }
  0x2e   : > { %599 = vrot.lane.b32.xlu1 %v544_v44, %s1660_s22  ;;  %587 = vrot.lane.b32.xlu0 %v490_v3, %s1660_s22  ;;  %v327_v37 = vor.u32 %v325_v23, %v323_v27  ;;  %v1848_v38 = vrot.slane %v329_v24, 1  ;;  %v372_v40 = vsel %vm280_vm1, %v367_v26, %v371_v4  ;;  %v555_v42 = vshrl.u32 %v1481_v28, 16 }
  0x2f   : > { %v558_v43 = vshll.u32 %v1481_v28, 16  ;;  %v548_v20 = vrot.slane %v546_v29, 3  ;;  %v551_v46 = vrot.slane %v549_v30, 4  ;;  %v494_v48 = vrot.slane %v492_v31, 3  ;;  %v190_v31 = vld [vmem:[%s1700_s18 + $0x3c] sm:$0xf] }
  0x30   : > { %v497_v49 = vrot.slane %v495_v32, 4  ;;  %v324_v50 = vsel %vm280_vm1, %v319_v33, %v323_v27  ;;  %v501_v51 = vshrl.u32 %v1475_v17, 16  ;;  %v504_v52 = vshll.u32 %v1475_v17, 16 }
  0x31   : > { %v1482_v53 = vcombine.low %v202_v47, %v1851_v39  ;;  %v380_v55 = vsel %vm280_vm1, %v375_v34, %v1846_v35  ;;  %v332_v56 = vsel %vm280_vm1, %v327_v37, %v1848_v38  ;;  %v557_v63 = vrot.slane %v555_v42, 3  ;;  %v1645_v42 = vld [vmem:[%s1700_s18 + $0x70] ss:$0 sps:$4 sm:$0x11]  }
  0x32   : > { %626 = vrot.lane.b32.xlu1 %v1744_v45, %s1659_s21  ;;  %614 = vrot.lane.b32.xlu0 %v1716_v9, %s1659_s21  ;;  %v560_v1 = vrot.slane %v558_v43, 4  ;;  %v552_v3 = vor.u32 %v551_v46, %v548_v20  ;;  %v498_v8 = vor.u32 %v497_v49, %v494_v48  ;;  %v1483_v10 = vcombine.low %v1862_v54, %v1862_v54 }
  0x33   : > { %v564_v2 = vshrl.u32 %v1482_v53, 16  ;;  %v567_v44 = vshll.u32 %v1482_v53, 16  ;;  %v503_v12 = vrot.slane %v501_v51, 3  ;;  %v506_v13 = vrot.slane %v504_v52, 4 }
  0x34   : > { %v573_v21 = vshrl.u32 %v1483_v10, 16  ;;  %v576_v22 = vshll.u32 %v1483_v10, 16  ;;  %v561_v23 = vor.u32 %v560_v1, %v557_v63  ;;  %v553_v27 = vsel %vm446_vm0, %v1803_v59, %v552_v3 }
  0x35   : > { %v566_v15 = vrot.slane %v564_v2, 3  ;;  %v569_v19 = vrot.slane %v567_v44, 4  ;;  %v499_v28 = vsel %vm446_vm0, %v1807_v62, %v498_v8  ;;  %v507_v29 = vor.u32 %v506_v13, %v503_v12 }
  0x36   : > { %628 = vrot.lane.b32.xlu1 %v1764_v61, %s1659_s21  ;;  %616 = vrot.lane.b32.xlu0 %v1767_v0, %s1659_s21  ;;  %v575_v26 = vrot.slane %v573_v21, 3  ;;  %v578_v4 = vrot.slane %v576_v22, 4  ;;  %v1883_v33 = vcombine.low %v1828_v16, %v202_v47  ;;  %v562_v59 = vsel %vm446_vm0, %v552_v3, %v561_v23 }
  0x37   : > { %v570_v24 = vor.u32 %v569_v19, %v566_v15  ;;  %v1888_v34 = vcombine.low %v1836_v25, %v190_v31  ;;  %v508_v62 = vsel %vm446_vm0, %v498_v8, %v507_v29  ;;  %v381_v37 = vshrl.u32 %v1818_v6, 16 }
  0x38   : > { %v579_v32 = vor.u32 %v578_v4, %v575_v26  ;;  %v333_v16 = vshrl.u32 %v1820_v7, 16  ;;  %v1476_v20 = vcombine.low %v190_v31, %v1728_v18  ;;  %v389_v49 = vshrl.u32 %v1883_v33, 16 }
  0x39   : > { %v571_v30 = vsel %vm446_vm0, %v561_v23, %v570_v24  ;;  %v337_v43 = vshll.u32 %v1888_v34, 16  ;;  %v383_v25 = vor.u32 %v381_v37, %v1846_v35  ;;  %v393_v47 = vshll.u32 %v1645_v42, 16 }
  0x3a   : > { %417 = vrot.lane.b32.xlu1 %v372_v40, %s1661_s23  ;;  %405 = vrot.lane.b32.xlu0 %v324_v50, %s1661_s23  ;;  %v580_v17 = vsel %vm446_vm0, %v570_v24, %v579_v32  ;;  %v385_v40 = vshll.u32 %v1883_v33, 16  ;;  %v335_v48 = vor.u32 %v333_v16, %v1848_v38  ;;  %v341_v51 = vshrl.u32 %v1888_v34, 16 }
  0x3b   : > { %v339_v50 = vrot.slane %v337_v43, 1  ;;  %v510_v52 = vshrl.u32 %v1476_v20, 16  ;;  %v513_v53 = vshll.u32 %v1476_v20, 16 }
  0x3c   : > { %v387_v46 = vrot.slane %v385_v40, 1 }
  0x3d   : > { %v340_v38 = vsel %vm280_vm1, %v335_v48, %v339_v50  ;;  %v512_v63 = vrot.slane %v510_v52, 3  ;;  %v515_v1 = vrot.slane %v513_v53, 4 }
  0x3e   : > { %419 = vrot.lane.b32.xlu1 %v380_v55, %s1661_s23  ;;  %407 = vrot.lane.b32.xlu0 %v332_v56, %s1661_s23  ;;  %v388_v18 = vsel %vm280_vm1, %v383_v25, %v387_v46  ;;  %v391_v35 = vor.u32 %v389_v49, %v387_v46  ;;  %v395_v55 = vrot.slane %v393_v47, 1  ;;  %v343_v56 = vor.u32 %v341_v51, %v339_v50 }
  0x3f   : > { %v516_v3 = vor.u32 %v515_v1, %v512_v63 }
  0x40   : > { %v396_v2 = vsel %vm280_vm1, %v391_v35, %v395_v55  ;;  %v348_v44 = vsel %vm280_vm1, %v343_v56, %v1761_v58  ;;  %v1484_v58 = vcombine.low %v1851_v39, %v1862_v54 }
  0x41   : > { %v517_v8 = vsel %vm446_vm0, %v507_v29, %v516_v3  ;;  %v526_v10 = vsel %vm446_vm0, %v516_v3, %v1790_v36 }
  0x42   : > { %601 = vrot.lane.b32.xlu1 %v553_v27, %s1660_s22  ;;  %589 = vrot.lane.b32.xlu0 %v499_v28, %s1660_s22 }
  0x46   : > { %603 = vrot.lane.b32.xlu1 %v562_v59, %s1660_s22  ;;  %591 = vrot.lane.b32.xlu0 %v508_v62, %s1660_s22 }
  0x4a   : > { %630 = vrot.lane.b32.xlu1 %v1801_v57, %s1659_s21  ;;  %618 = vrot.lane.b32.xlu0 %v1805_v60, %s1659_s21 }
  0x4e   : > { %632 = vrot.lane.b32.xlu1 %v1818_v6, %s1659_s21  ;;  %620 = vrot.lane.b32.xlu0 %v1820_v7, %s1659_s21 }
  0x52   : > { %421 = vrot.lane.b32.xlu1 %v388_v18, %s1661_s23  ;;  %409 = vrot.lane.b32.xlu0 %v340_v38, %s1661_s23 }
  0x56   : > { %423 = vrot.lane.b32.xlu1 %v396_v2, %s1661_s23  ;;  %411 = vrot.lane.b32.xlu0 %v348_v44, %s1661_s23 }
  0x5a   : > { %605 = vrot.lane.b32.xlu1 %v571_v30, %s1660_s22  ;;  %593 = vrot.lane.b32.xlu0 %v517_v8, %s1660_s22 }
  0x5e   : > { %607 = vrot.lane.b32.xlu1 %v580_v17, %s1660_s22  ;;  %595 = vrot.lane.b32.xlu0 %v526_v10, %s1660_s22 }
  0x62   : > { %634 = vrot.lane.b32.xlu1 %v1883_v33, %s1659_s21  ;;  %622 = vrot.lane.b32.xlu0 %v1888_v34, %s1659_s21 }
  0x66   : > { %636 = vrot.lane.b32.xlu1 %v1484_v58, %s1659_s21  ;;  %624 = vrot.lane.b32.xlu0 %v1740_v41, %s1659_s21 }
  0x83   : > { %v613_v12 = vpop.permute.xlu1 %612 }
  0x84   : > { %v611_v36 = vpop.permute.xlu0 %610 }
  0x8c   : > { %v582_v13 = vpop.permute.xlu1 %581  ;;  %v398_v15 = vpop.permute.xlu0 %397 }
  0x8d   : > { %v640_v19 = vsel %vm638_vm2, %v1724_v14, %v398_v15 }
  0x8e   : > { %v669_v21 = vsel %vm667_vm3, %v640_v19, %v582_v13 }
  0x8f   : > { %v698_v39 = vsel %vm696_vm4, %v669_v21, %v611_v36 }
  0x90   : > { %v584_v54 = vpop.permute.xlu1 %583  ;;  %1576 = vmatprep.mubr.msk.bf16.mxu0 %vm733_vm5, %v698_v39  ;;  %v400_v22 = vpop.permute.xlu0 %399 }
  0x91   : > { %v642_v23 = vsel %vm638_vm2, %v1719_v11, %v400_v22 }
  0x92   : > { %v671_v24 = vsel %vm667_vm3, %v642_v23, %v584_v54 }
  0x93   : > { %v700_v26 = vsel %vm696_vm4, %v671_v24, %v613_v12 }
  0x94   : > { %v414_v4 = vpop.permute.xlu1 %413  ;;  %1577 = vmatmul.mubr.msk.bf16.vlgmr.msra.gmra.mxu0 %vm733_vm5, %v700_v26  ;;  %v402_v14 = vpop.permute.xlu0 %401 }
  0x95   : > { %v644_v17 = vsel %vm638_vm2, %v1711_v5, %v402_v14  ;;  %v656_v11 = vsel %vm638_vm2, %v1740_v41, %v414_v4 }
  0x98   : > { %v416_v27 = vpop.permute.xlu1 %415  ;;  %v404_v28 = vpop.permute.xlu0 %403 }
  0x99   : > { %v646_v16 = vsel %vm638_vm2, %v1716_v9, %v404_v28  ;;  %v658_v5 = vsel %vm638_vm2, %v1744_v45, %v416_v27 }
  0x9c   : > { %v598_v29 = vpop.permute.xlu1 %597  ;;  %v586_v30 = vpop.permute.xlu0 %585 }
  0x9d   : > { %v685_v59 = vsel %vm667_vm3, %v656_v11, %v598_v29  ;;  %v673_v62 = vsel %vm667_vm3, %v644_v17, %v586_v30 }
  0xa0   : > { %v600_v31 = vpop.permute.xlu1 %599  ;;  %v588_v32 = vpop.permute.xlu0 %587 }
  0xa1   : > { %v687_v41 = vsel %vm667_vm3, %v658_v5, %v600_v31  ;;  %v675_v20 = vsel %vm667_vm3, %v646_v16, %v588_v32 }
  0xa4   : > { %v627_v37 = vpop.permute.xlu1 %626  ;;  %v615_v40 = vpop.permute.xlu0 %614 }
  0xa5   : > { %v702_v42 = vsel %vm696_vm4, %v673_v62, %v615_v40  ;;  %v714_v43 = vsel %vm696_vm4, %v685_v59, %v627_v37 }
  0xa6   : > { %1580 = vmatprep.mubr.msk.bf16.mxu0 %vm733_vm5, %v702_v42  ;;  %1592 = vmatprep.mubr.msk.bf16.mxu1 %vm733_vm5, %v714_v43 }
  0xa8   : > { %v629_v25 = vpop.permute.xlu1 %628  ;;  %v617_v46 = vpop.permute.xlu0 %616 }
  0xa9   : > { %v716_v48 = vsel %vm696_vm4, %v687_v41, %v629_v25  ;;  %v704_v9 = vsel %vm696_vm4, %v675_v20, %v617_v46 }
  0xaa   : > { %1581 = vmatmul.mubr.msk.bf16.gmra.mxu0 %vm733_vm5, %v704_v9  ;;  %1593 = vmatmul.mubr.msk.bf16.vlgmr.msra.gmra.mxu1 %vm733_vm5, %v716_v48 }
  0xac   : > { %v418_v49 = vpop.permute.xlu1 %417  ;;  %v406_v47 = vpop.permute.xlu0 %405 }
  0xad   : > { %v648_v35 = vsel %vm638_vm2, %v1767_v0, %v406_v47  ;;  %v660_v55 = vsel %vm638_vm2, %v1764_v61, %v418_v49 }
  0xb0   : > { %v420_v50 = vpop.permute.xlu1 %419  ;;  %v408_v51 = vpop.permute.xlu0 %407 }
  0xb1   : > { %v650_v2 = vsel %vm638_vm2, %v1805_v60, %v408_v51  ;;  %v662_v61 = vsel %vm638_vm2, %v1801_v57, %v420_v50 }
  0xb4   : > { %v602_v52 = vpop.permute.xlu1 %601  ;;  %v590_v45 = vpop.permute.xlu0 %589 }
  0xb5   : > { %v689_v38 = vsel %vm667_vm3, %v660_v55, %v602_v52  ;;  %v677_v56 = vsel %vm667_vm3, %v648_v35, %v590_v45 }
  0xb8   : > { %v604_v53 = vpop.permute.xlu1 %603  ;;  %v592_v18 = vpop.permute.xlu0 %591 }
  0xb9   : > { %v691_v0 = vsel %vm667_vm3, %v662_v61, %v604_v53  ;;  %v679_v8 = vsel %vm667_vm3, %v650_v2, %v592_v18 }
  0xbc   : > { %v631_v63 = vpop.permute.xlu1 %630  ;;  %v619_v1 = vpop.permute.xlu0 %618 }
  0xbd   : > { %v718_v44 = vsel %vm696_vm4, %v689_v38, %v631_v63  ;;  %v706_v3 = vsel %vm696_vm4, %v677_v56, %v619_v1 }
  0xbe   : > { %1584 = vmatprep.mubr.msk.bf16.mxu0 %vm733_vm5, %v706_v3  ;;  %1596 = vmatprep.mubr.msk.bf16.mxu1 %vm733_vm5, %v718_v44 }
  0xc0   : > { %v633_v10 = vpop.permute.xlu1 %632  ;;  %v621_v58 = vpop.permute.xlu0 %620 }
  0xc1   : > { %v720_v12 = vsel %vm696_vm4, %v691_v0, %v633_v10  ;;  %v708_v60 = vsel %vm696_vm4, %v679_v8, %v621_v58 }
  0xc2   : > { %1585 = vmatmul.mubr.msk.bf16.gmra.mxu0 %vm733_vm5, %v708_v60  ;;  %1597 = vmatmul.mubr.msk.bf16.gmra.mxu1 %vm733_vm5, %v720_v12 }
  0xc4   : > { %v422_v36 = vpop.permute.xlu1 %421  ;;  %v410_v13 = vpop.permute.xlu0 %409 }
  0xc5   : > { %v652_v22 = vsel %vm638_vm2, %v1820_v7, %v410_v13  ;;  %v664_v23 = vsel %vm638_vm2, %v1818_v6, %v422_v36 }
  0xc8   : > { %v424_v15 = vpop.permute.xlu1 %423  ;;  %v412_v19 = vpop.permute.xlu0 %411 }
  0xc9   : > { %v654_v27 = vsel %vm638_vm2, %v1888_v34, %v412_v19  ;;  %v666_v6 = vsel %vm638_vm2, %v1883_v33, %v424_v15 }
  0xcc   : > { %v606_v21 = vpop.permute.xlu1 %605  ;;  %v594_v57 = vpop.permute.xlu0 %593 }
  0xcd   : > { %v693_v24 = vsel %vm667_vm3, %v664_v23, %v606_v21  ;;  %v681_v26 = vsel %vm667_vm3, %v652_v22, %v594_v57 }
  0xd0   : > { %v608_v39 = vpop.permute.xlu1 %607  ;;  %v596_v54 = vpop.permute.xlu0 %595 }
  0xd1   : > { %v695_v7 = vsel %vm667_vm3, %v666_v6, %v608_v39  ;;  %v683_v30 = vsel %vm667_vm3, %v654_v27, %v596_v54 }
  0xd4   : > { %v635_v4 = vpop.permute.xlu1 %634  ;;  %v623_v14 = vpop.permute.xlu0 %622 }
  0xd5   : > { %v722_v28 = vsel %vm696_vm4, %v693_v24, %v635_v4  ;;  %v710_v29 = vsel %vm696_vm4, %v681_v26, %v623_v14 }
  0xd6   : > { %1588 = vmatprep.mubr.msk.bf16.mxu0 %vm733_vm5, %v710_v29  ;;  %1600 = vmatprep.mubr.msk.bf16.mxu1 %vm733_vm5, %v722_v28 }
  0xd8   : > { %v637_v31 = vpop.permute.xlu1 %636  ;;  %v625_v32 = vpop.permute.xlu0 %624 }
  0xd9   : > { %v724_v17 = vsel %vm696_vm4, %v695_v7, %v637_v31  ;;  %v712_v34 = vsel %vm696_vm4, %v683_v30, %v625_v32 }
  0xda   : > { %1589 = vmatmul.mubr.msk.bf16.gmra.mxu0 %vm733_vm5, %v712_v34  ;;  %1601 = vmatmul.mubr.msk.bf16.gmra.mxu1 %vm733_vm5, %v724_v17 }
 0x154   : > { %v1578_v11 = vpop.f32.mrf.mxu0 }
 0x155   : > { %939 = vrot.lane.b32.xlu0 %v1578_v11, %s1662_s24 }
 0x156   : > { %v2007_v59 = vpop.f32.mrf.mxu0 }
 0x158   : > { %v1579_v33 = vpop.f32.mrf.mxu0 }
 0x159   : > { %941 = vrot.lane.b32.xlu1 %v1579_v33, %s1662_s24 }
 0x15a   : > { %v2016_v16 = vpop.f32.mrf.mxu0 }
 0x16a   : > { %v1594_v62 = vpop.f32.mrf.mxu1  ;;  %v2018_v42 = vpop.f32.mrf.mxu0 }
 0x16b   : > { %971 = vrot.lane.b32.xlu0 %v1594_v62, %s1662_s24 }
 0x16c   : > { %v2011_v37 = vpop.f32.mrf.mxu1  ;;  %v2024_v43 = vpop.f32.mrf.mxu0 }
 0x16e   : > { %v1595_v40 = vpop.f32.mrf.mxu1  ;;  %v2032_v41 = vpop.f32.mrf.mxu0 }
 0x16f   : > { %935 = vrot.lane.b32.xlu0 %v2007_v59, %s1662_s24  ;;  %973 = vrot.lane.b32.xlu1 %v1595_v40, %s1662_s24 }
 0x170   : > { %v2026_v5 = vpop.f32.mrf.mxu1  ;;  %v2048_v48 = vpop.f32.mrf.mxu0 }
 0x173   : > { %967 = vrot.lane.b32.xlu0 %v2011_v37, %s1662_s24  ;;  %937 = vrot.lane.b32.xlu1 %v2016_v16, %s1662_s24 }
 0x177   : > { %969 = vrot.lane.b32.xlu1 %v2026_v5, %s1662_s24  ;;  %947 = vrot.lane.b32.xlu0 %v2018_v42, %s1662_s24 }
 0x17b   : > { %949 = vrot.lane.b32.xlu1 %v2032_v41, %s1662_s24 }
 0x182   : > { %v2036_v20 = vpop.f32.mrf.mxu1  ;;  %v2050_v9 = vpop.f32.mrf.mxu0 }
 0x183   : > { %979 = vrot.lane.b32.xlu0 %v2036_v20, %s1662_s24 }
 0x184   : > { %v2040_v25 = vpop.f32.mrf.mxu1  ;;  %v2056_v49 = vpop.f32.mrf.mxu0 }
 0x186   : > { %v2042_v46 = vpop.f32.mrf.mxu1  ;;  %v2064_v50 = vpop.f32.mrf.mxu0 }
 0x187   : > { %943 = vrot.lane.b32.xlu0 %v2024_v43, %s1662_s24  ;;  %981 = vrot.lane.b32.xlu1 %v2042_v46, %s1662_s24 }
 0x188   : > { %v2058_v47 = vpop.f32.mrf.mxu1  ;;  %v2070_v51 = vpop.f32.mrf.mxu0 }
 0x18b   : > { %975 = vrot.lane.b32.xlu0 %v2040_v25, %s1662_s24  ;;  %945 = vrot.lane.b32.xlu1 %v2048_v48, %s1662_s24 }
 0x18f   : > { %977 = vrot.lane.b32.xlu1 %v2058_v47, %s1662_s24  ;;  %955 = vrot.lane.b32.xlu0 %v2050_v9, %s1662_s24 }
 0x193   : > { %951 = vrot.lane.b32.xlu0 %v2056_v49, %s1662_s24  ;;  %957 = vrot.lane.b32.xlu1 %v2064_v50, %s1662_s24 }
 0x197   : > { %953 = vrot.lane.b32.xlu1 %v2070_v51, %s1662_s24 }
 0x19a   : > { %v2074_v52 = vpop.f32.mrf.mxu1  ;;  %v2076_v45 = vpop.f32.mrf.mxu0 }
 0x19c   : > { %v2078_v53 = vpop.f32.mrf.mxu1  ;;  %v2084_v35 = vpop.f32.mrf.mxu0 }
 0x19d   : > { %983 = vrot.lane.b32.xlu0 %v2078_v53, %s1662_s24 }
 0x19e   : > { %v2082_v18 = vpop.f32.mrf.mxu1  ;;  %v2092_v38 = vpop.f32.mrf.mxu0 }
 0x1a0   : > { %v2086_v55 = vpop.f32.mrf.mxu1  ;;  %v2098_v56 = vpop.f32.mrf.mxu0 }
 0x1a1   : > { %985 = vrot.lane.b32.xlu1 %v2086_v55, %s1662_s24  ;;  %963 = vrot.lane.b32.xlu0 %v2076_v45, %s1662_s24 }
 0x1a5   : > { %959 = vrot.lane.b32.xlu0 %v2084_v35, %s1662_s24  ;;  %965 = vrot.lane.b32.xlu1 %v2092_v38, %s1662_s24 }
 0x1a9   : > { %987 = vrot.lane.b32.xlu0 %v2074_v52, %s1662_s24  ;;  %961 = vrot.lane.b32.xlu1 %v2098_v56, %s1662_s24 }
 0x1ad   : > { %989 = vrot.lane.b32.xlu1 %v2082_v18, %s1662_s24 }
 0x1c7   : > { %v940_v63 = vpop.permute.xlu0 %939 }
 0x1c8   : > { %v2106_v1 = vmax.f32 %v1578_v11, %v940_v63 }
 0x1ca   : > { %1079 = vrot.lane.b32.xlu0 %v2106_v1, %s1663_s25 }
 0x1cb   : > { %v942_v2 = vpop.permute.xlu1 %941 }
 0x1cc   : > { %v2110_v44 = vmax.f32 %v1579_v33, %v942_v2 }
 0x1ce   : > { %1081 = vrot.lane.b32.xlu1 %v2110_v44, %s1663_s25 }
 0x1dd   : > { %v972_v3 = vpop.permute.xlu0 %971 }
 0x1de   : > { %v2114_v61 = vmax.f32 %v1594_v62, %v972_v3 }
 0x1e0   : > { %1111 = vrot.lane.b32.xlu0 %v2114_v61, %s1663_s25 }
 0x1e1   : > { %v974_v0 = vpop.permute.xlu1 %973  ;;  %v936_v8 = vpop.permute.xlu0 %935 }
 0x1e2   : > { %v2118_v10 = vmax.f32 %v1595_v40, %v974_v0  ;;  %v2121_v58 = vmax.f32 %v2007_v59, %v936_v8 }
 0x1e4   : > { %1113 = vrot.lane.b32.xlu1 %v2118_v10, %s1663_s25  ;;  %1075 = vrot.lane.b32.xlu0 %v2121_v58, %s1663_s25 }
 0x1e5   : > { %v938_v12 = vpop.permute.xlu1 %937  ;;  %v968_v60 = vpop.permute.xlu0 %967 }
 0x1e6   : > { %v2128_v36 = vmax.f32 %v2016_v16, %v938_v12  ;;  %v2131_v13 = vmax.f32 %v2011_v37, %v968_v60 }
 0x1e8   : > { %1077 = vrot.lane.b32.xlu1 %v2128_v36, %s1663_s25  ;;  %1107 = vrot.lane.b32.xlu0 %v2131_v13, %s1663_s25 }
 0x1e9   : > { %v970_v15 = vpop.permute.xlu1 %969  ;;  %v948_v19 = vpop.permute.xlu0 %947 }
 0x1ea   : > { %v2138_v21 = vmax.f32 %v2026_v5, %v970_v15  ;;  %v2141_v57 = vmax.f32 %v2018_v42, %v948_v19 }
 0x1ec   : > { %1109 = vrot.lane.b32.xlu1 %v2138_v21, %s1663_s25  ;;  %1087 = vrot.lane.b32.xlu0 %v2141_v57, %s1663_s25 }
 0x1ed   : > { %v950_v39 = vpop.permute.xlu1 %949 }
 0x1ee   : > { %v2148_v54 = vmax.f32 %v2032_v41, %v950_v39 }
 0x1f0   : > { %1089 = vrot.lane.b32.xlu1 %v2148_v54, %s1663_s25 }
 0x1f5   : > { %v980_v22 = vpop.permute.xlu0 %979 }
 0x1f6   : > { %v2153_v23 = vmax.f32 %v2036_v20, %v980_v22 }
 0x1f8   : > { %1119 = vrot.lane.b32.xlu0 %v2153_v23, %s1663_s25 }
 0x1f9   : > { %v982_v24 = vpop.permute.xlu1 %981  ;;  %v944_v26 = vpop.permute.xlu0 %943 }
 0x1fa   : > { %v2158_v4 = vmax.f32 %v2042_v46, %v982_v24  ;;  %v2161_v14 = vmax.f32 %v2024_v43, %v944_v26 }
 0x1fc   : > { %1121 = vrot.lane.b32.xlu1 %v2158_v4, %s1663_s25  ;;  %1083 = vrot.lane.b32.xlu0 %v2161_v14, %s1663_s25 }
 0x1fd   : > { %v946_v27 = vpop.permute.xlu1 %945  ;;  %v976_v28 = vpop.permute.xlu0 %975 }
 0x1fe   : > { %v2168_v29 = vmax.f32 %v2048_v48, %v946_v27  ;;  %v2171_v6 = vmax.f32 %v2040_v25, %v976_v28 }
 0x200   : > { %1085 = vrot.lane.b32.xlu1 %v2168_v29, %s1663_s25  ;;  %1115 = vrot.lane.b32.xlu0 %v2171_v6, %s1663_s25 }
 0x201   : > { %v978_v7 = vpop.permute.xlu1 %977  ;;  %v956_v30 = vpop.permute.xlu0 %955 }
 0x202   : > { %v2178_v31 = vmax.f32 %v2058_v47, %v978_v7  ;;  %v2181_v32 = vmax.f32 %v2050_v9, %v956_v30 }
 0x204   : > { %1117 = vrot.lane.b32.xlu1 %v2178_v31, %s1663_s25  ;;  %1095 = vrot.lane.b32.xlu0 %v2181_v32, %s1663_s25 }
 0x205   : > { %v958_v17 = vpop.permute.xlu1 %957  ;;  %v952_v34 = vpop.permute.xlu0 %951 }
 0x206   : > { %v2188_v11 = vmax.f32 %v2064_v50, %v958_v17  ;;  %v2191_v59 = vmax.f32 %v2056_v49, %v952_v34 }
 0x208   : > { %1097 = vrot.lane.b32.xlu1 %v2188_v11, %s1663_s25  ;;  %1091 = vrot.lane.b32.xlu0 %v2191_v59, %s1663_s25 }
 0x209   : > { %v954_v33 = vpop.permute.xlu1 %953 }
 0x20a   : > { %v2198_v62 = vmax.f32 %v2070_v51, %v954_v33 }
 0x20c   : > { %1093 = vrot.lane.b32.xlu1 %v2198_v62, %s1663_s25 }
 0x20f   : > { %v984_v37 = vpop.permute.xlu0 %983 }
 0x210   : > { %v2203_v40 = vmax.f32 %v2078_v53, %v984_v37 }
 0x212   : > { %1123 = vrot.lane.b32.xlu0 %v2203_v40, %s1663_s25 }
 0x213   : > { %v986_v16 = vpop.permute.xlu1 %985  ;;  %v964_v42 = vpop.permute.xlu0 %963 }
 0x214   : > { %v2208_v43 = vmax.f32 %v2086_v55, %v986_v16  ;;  %v2211_v5 = vmax.f32 %v2076_v45, %v964_v42  ;;  %v2245_v45 = vld [vmem:[%s2371_s2] ss:$0 sm:$0xff] }
 0x216   : > { %1125 = vrot.lane.b32.xlu1 %v2208_v43, %s1663_s25  ;;  %1103 = vrot.lane.b32.xlu0 %v2211_v5, %s1663_s25 }
 0x217   : > { %v966_v41 = vpop.permute.xlu1 %965  ;;  %v960_v20 = vpop.permute.xlu0 %959 }
 0x218   : > { %v2218_v25 = vmax.f32 %v2092_v38, %v966_v41  ;;  %v2221_v46 = vmax.f32 %v2084_v35, %v960_v20 }
 0x21a   : > { %1105 = vrot.lane.b32.xlu1 %v2218_v25, %s1663_s25  ;;  %1099 = vrot.lane.b32.xlu0 %v2221_v46, %s1663_s25 }
 0x21b   : > { %v962_v48 = vpop.permute.xlu1 %961  ;;  %v988_v9 = vpop.permute.xlu0 %987 }
 0x21c   : > { %v2228_v49 = vmax.f32 %v2098_v56, %v962_v48  ;;  %v2231_v47 = vmax.f32 %v2074_v52, %v988_v9 }
 0x21e   : > { %1101 = vrot.lane.b32.xlu1 %v2228_v49, %s1663_s25  ;;  %1127 = vrot.lane.b32.xlu0 %v2231_v47, %s1663_s25 }
 0x21f   : > { %v990_v50 = vpop.permute.xlu1 %989 }
 0x220   : > { %v2238_v51 = vmax.f32 %v2082_v18, %v990_v50 }
 0x222   : > { %1129 = vrot.lane.b32.xlu1 %v2238_v51, %s1663_s25 }
 0x23c   : > { %v1080_v52 = vpop.permute.xlu0 %1079 }
 0x23d   : > { %v1161_v53 = vmax.f32 %v2106_v1, %v1080_v52 }
 0x23f   : > { %v1196_v35 = vadd.f32 %v2245_v45, %v1161_v53 }
 0x240   : > { %v1082_v55 = vpop.permute.xlu1 %1081 }
 0x241   : > { %v1224_v38 = vmax.f32 %v1196_v35, 0.0  ;;  %v1162_v56 = vmax.f32 %v2110_v44, %v1082_v55 }
 0x243   : > { %v1533_v18 = vpack.c.bf16 %v1224_v38, %v1224_v38  ;;  %v1197_v63 = vadd.f32 %v2245_v45, %v1162_v56 }
 0x245   : > { %1365 = vst.msk [vmem:[%s2255_s30 + $0x8] sm:$0xf] %vm1362_vm6, %v1533_v18  ;;  %v1225_v1 = vmax.f32 %v1197_v63, 0.0 }
 0x247   : > { %v1534_v2 = vpack.c.bf16 %v1225_v1, %v1225_v1 }
 0x249   : > { %1366 = vst.msk [vmem:[%s2255_s30 + $0xc] sm:$0xf] %vm1362_vm6, %v1534_v2 }
 0x252   : > { %v1112_v44 = vpop.permute.xlu0 %1111 }
 0x253   : > { %v1177_v3 = vmax.f32 %v2114_v61, %v1112_v44 }
 0x255   : > { %v1212_v0 = vadd.f32 %v2245_v45, %v1177_v3 }
 0x256   : > { %v1114_v8 = vpop.permute.xlu1 %1113  ;;  %v1076_v12 = vpop.permute.xlu0 %1075 }
 0x257   : > { %v1240_v60 = vmax.f32 %v1212_v0, 0.0  ;;  %v1178_v15 = vmax.f32 %v2118_v10, %v1114_v8  ;;  %v1159_v19 = vmax.f32 %v2121_v58, %v1076_v12 }
 0x259   : > { %v1549_v39 = vpack.c.bf16 %v1240_v60, %v1240_v60  ;;  %v1213_v22 = vadd.f32 %v2245_v45, %v1178_v15  ;;  %v1194_v24 = vadd.f32 %v2245_v45, %v1159_v19 }
 0x25a   : > { %v1078_v26 = vpop.permute.xlu1 %1077  ;;  %v1108_v27 = vpop.permute.xlu0 %1107 }
 0x25b   : > { %1381 = vst.msk [vmem:[%s2255_s30 + $0x48] sm:$0xf] %vm1362_vm6, %v1549_v39  ;;  %v1241_v61 = vmax.f32 %v1213_v22, 0.0  ;;  %v1222_v28 = vmax.f32 %v1194_v24, 0.0  ;;  %v1160_v7 = vmax.f32 %v2128_v36, %v1078_v26  ;;  %v1175_v30 = vmax.f32 %v2131_v13, %v1108_v27 }
 0x25d   : > { %v1550_v10 = vpack.c.bf16 %v1241_v61, %v1241_v61  ;;  %v1531_v17 = vpack.c.bf16 %v1222_v28, %v1222_v28  ;;  %v1195_v58 = vadd.f32 %v2245_v45, %v1160_v7  ;;  %v1210_v34 = vadd.f32 %v2245_v45, %v1175_v30 }
 0x25e   : > { %v1110_v33 = vpop.permute.xlu1 %1109  ;;  %v1088_v37 = vpop.permute.xlu0 %1087 }
 0x25f   : > { %1382 = vst.msk [vmem:[%s2255_s30 + $0x4c] sm:$0xf] %vm1362_vm6, %v1550_v10  ;;  %1363 = vst.msk [vmem:[%s2255_s30] sm:$0xf] %vm1362_vm6, %v1531_v17  ;;  %v1223_v16 = vmax.f32 %v1195_v58, 0.0  ;;  %v1238_v42 = vmax.f32 %v1210_v34, 0.0  ;;  %v1176_v36 = vmax.f32 %v2138_v21, %v1110_v33  ;;  %v1165_v13 = vmax.f32 %v2141_v57, %v1088_v37 }
 0x261   : > { %v1532_v41 = vpack.c.bf16 %v1223_v16, %v1223_v16  ;;  %v1547_v20 = vpack.c.bf16 %v1238_v42, %v1238_v42  ;;  %v1211_v48 = vadd.f32 %v2245_v45, %v1176_v36  ;;  %v1200_v9 = vadd.f32 %v2245_v45, %v1165_v13 }
 0x262   : > { %v1090_v50 = vpop.permute.xlu1 %1089 }
 0x263   : > { %1364 = vst.msk [vmem:[%s2255_s30 + $0x4] sm:$0xf] %vm1362_vm6, %v1532_v41  ;;  %1379 = vst.msk [vmem:[%s2255_s30 + $0x40] sm:$0xf] %vm1362_vm6, %v1547_v20  ;;  %v1239_v52 = vmax.f32 %v1211_v48, 0.0  ;;  %v1228_v53 = vmax.f32 %v1200_v9, 0.0  ;;  %v1166_v35 = vmax.f32 %v2148_v54, %v1090_v50 }
 0x265   : > { %v1548_v21 = vpack.c.bf16 %v1239_v52, %v1239_v52  ;;  %v1537_v55 = vpack.c.bf16 %v1228_v53, %v1228_v53  ;;  %v1201_v57 = vadd.f32 %v2245_v45, %v1166_v35 }
 0x267   : > { %1380 = vst.msk [vmem:[%s2255_s30 + $0x44] sm:$0xf] %vm1362_vm6, %v1548_v21  ;;  %1369 = vst.msk [vmem:[%s2255_s30 + $0x18] sm:$0xf] %vm1362_vm6, %v1537_v55  ;;  %v1229_v38 = vmax.f32 %v1201_v57, 0.0 }
 0x269   : > { %v1538_v56 = vpack.c.bf16 %v1229_v38, %v1229_v38 }
 0x26a   : > { %v1120_v18 = vpop.permute.xlu0 %1119 }
 0x26b   : > { %1370 = vst.msk [vmem:[%s2255_s30 + $0x1c] sm:$0xf] %vm1362_vm6, %v1538_v56  ;;  %v1181_v63 = vmax.f32 %v2153_v23, %v1120_v18 }
 0x26d   : > { %v1216_v1 = vadd.f32 %v2245_v45, %v1181_v63 }
 0x26e   : > { %v1122_v2 = vpop.permute.xlu1 %1121  ;;  %v1084_v54 = vpop.permute.xlu0 %1083 }
 0x26f   : > { %v1244_v44 = vmax.f32 %v1216_v1, 0.0  ;;  %v1182_v3 = vmax.f32 %v2158_v4, %v1122_v2  ;;  %v1163_v0 = vmax.f32 %v2161_v14, %v1084_v54 }
 0x271   : > { %v1553_v8 = vpack.c.bf16 %v1244_v44, %v1244_v44  ;;  %v1217_v12 = vadd.f32 %v2245_v45, %v1182_v3  ;;  %v1198_v60 = vadd.f32 %v2245_v45, %v1163_v0 }
 0x272   : > { %v1086_v15 = vpop.permute.xlu1 %1085  ;;  %v1116_v19 = vpop.permute.xlu0 %1115 }
 0x273   : > { %1385 = vst.msk [vmem:[%s2255_s30 + $0x58] sm:$0xf] %vm1362_vm6, %v1553_v8  ;;  %v1245_v23 = vmax.f32 %v1217_v12, 0.0  ;;  %v1226_v39 = vmax.f32 %v1198_v60, 0.0  ;;  %v1164_v22 = vmax.f32 %v2168_v29, %v1086_v15  ;;  %v1179_v24 = vmax.f32 %v2171_v6, %v1116_v19 }
 0x275   : > { %v1554_v4 = vpack.c.bf16 %v1245_v23, %v1245_v23  ;;  %v1535_v26 = vpack.c.bf16 %v1226_v39, %v1226_v39  ;;  %v1199_v14 = vadd.f32 %v2245_v45, %v1164_v22  ;;  %v1214_v27 = vadd.f32 %v2245_v45, %v1179_v24 }
 0x276   : > { %v1118_v61 = vpop.permute.xlu1 %1117  ;;  %v1096_v28 = vpop.permute.xlu0 %1095 }
 0x277   : > { %1386 = vst.msk [vmem:[%s2255_s30 + $0x5c] sm:$0xf] %vm1362_vm6, %v1554_v4  ;;  %1367 = vst.msk [vmem:[%s2255_s30 + $0x10] sm:$0xf] %vm1362_vm6, %v1535_v26  ;;  %v1227_v7 = vmax.f32 %v1199_v14, 0.0  ;;  %v1242_v30 = vmax.f32 %v1214_v27, 0.0  ;;  %v1180_v29 = vmax.f32 %v2178_v31, %v1118_v61  ;;  %v1169_v6 = vmax.f32 %v2181_v32, %v1096_v28 }
 0x279   : > { %v1536_v10 = vpack.c.bf16 %v1227_v7, %v1227_v7  ;;  %v1551_v17 = vpack.c.bf16 %v1242_v30, %v1242_v30  ;;  %v1215_v58 = vadd.f32 %v2245_v45, %v1180_v29  ;;  %v1204_v34 = vadd.f32 %v2245_v45, %v1169_v6 }
 0x27a   : > { %v1098_v33 = vpop.permute.xlu1 %1097  ;;  %v1092_v37 = vpop.permute.xlu0 %1091 }
 0x27b   : > { %1368 = vst.msk [vmem:[%s2255_s30 + $0x14] sm:$0xf] %vm1362_vm6, %v1536_v10  ;;  %1383 = vst.msk [vmem:[%s2255_s30 + $0x50] sm:$0xf] %vm1362_vm6, %v1551_v17  ;;  %v1243_v16 = vmax.f32 %v1215_v58, 0.0  ;;  %v1232_v42 = vmax.f32 %v1204_v34, 0.0  ;;  %v1170_v31 = vmax.f32 %v2188_v11, %v1098_v33  ;;  %v1167_v32 = vmax.f32 %v2191_v59, %v1092_v37 }
 0x27d   : > { %v1552_v36 = vpack.c.bf16 %v1243_v16, %v1243_v16  ;;  %v1541_v13 = vpack.c.bf16 %v1232_v42, %v1232_v42  ;;  %v1205_v41 = vadd.f32 %v2245_v45, %v1170_v31  ;;  %v1202_v20 = vadd.f32 %v2245_v45, %v1167_v32 }
 0x27e   : > { %v1094_v48 = vpop.permute.xlu1 %1093 }
 0x27f   : > { %1384 = vst.msk [vmem:[%s2255_s30 + $0x54] sm:$0xf] %vm1362_vm6, %v1552_v36  ;;  %1373 = vst.msk [vmem:[%s2255_s30 + $0x28] sm:$0xf] %vm1362_vm6, %v1541_v13  ;;  %v1233_v9 = vmax.f32 %v1205_v41, 0.0  ;;  %v1230_v50 = vmax.f32 %v1202_v20, 0.0  ;;  %v1168_v52 = vmax.f32 %v2198_v62, %v1094_v48 }
 0x281   : > { %v1542_v11 = vpack.c.bf16 %v1233_v9, %v1233_v9  ;;  %v1539_v53 = vpack.c.bf16 %v1230_v50, %v1230_v50  ;;  %v1203_v59 = vadd.f32 %v2245_v45, %v1168_v52 }
 0x283   : > { %1374 = vst.msk [vmem:[%s2255_s30 + $0x2c] sm:$0xf] %vm1362_vm6, %v1542_v11  ;;  %1371 = vst.msk [vmem:[%s2255_s30 + $0x20] sm:$0xf] %vm1362_vm6, %v1539_v53  ;;  %v1231_v35 = vmax.f32 %v1203_v59, 0.0 }
 0x284   : > { %v1124_v21 = vpop.permute.xlu0 %1123 }
 0x285   : > { %v1540_v55 = vpack.c.bf16 %v1231_v35, %v1231_v35  ;;  %v1183_v57 = vmax.f32 %v2203_v40, %v1124_v21 }
 0x287   : > { %1372 = vst.msk [vmem:[%s2255_s30 + $0x24] sm:$0xf] %vm1362_vm6, %v1540_v55  ;;  %v1218_v38 = vadd.f32 %v2245_v45, %v1183_v57 }
 0x288   : > { %v1126_v56 = vpop.permute.xlu1 %1125  ;;  %v1104_v62 = vpop.permute.xlu0 %1103 }
 0x289   : > { %v1246_v18 = vmax.f32 %v1218_v38, 0.0  ;;  %v1184_v63 = vmax.f32 %v2208_v43, %v1126_v56  ;;  %v1173_v1 = vmax.f32 %v2211_v5, %v1104_v62 }
 0x28b   : > { %v1555_v2 = vpack.c.bf16 %v1246_v18, %v1246_v18  ;;  %v1219_v54 = vadd.f32 %v2245_v45, %v1184_v63  ;;  %v1208_v44 = vadd.f32 %v2245_v45, %v1173_v1 }
 0x28c   : > { %v1106_v3 = vpop.permute.xlu1 %1105  ;;  %v1100_v40 = vpop.permute.xlu0 %1099 }
 0x28d   : > { %1387 = vst.msk [vmem:[%s2255_s30 + $0x60] sm:$0xf] %vm1362_vm6, %v1555_v2  ;;  %v1247_v0 = vmax.f32 %v1219_v54, 0.0  ;;  %v1236_v8 = vmax.f32 %v1208_v44, 0.0  ;;  %v1174_v12 = vmax.f32 %v2218_v25, %v1106_v3  ;;  %v1171_v60 = vmax.f32 %v2221_v46, %v1100_v40 }
 0x28f   : > { %v1556_v43 = vpack.c.bf16 %v1247_v0, %v1247_v0  ;;  %v1545_v15 = vpack.c.bf16 %v1236_v8, %v1236_v8  ;;  %v1209_v5 = vadd.f32 %v2245_v45, %v1174_v12  ;;  %v1206_v19 = vadd.f32 %v2245_v45, %v1171_v60 }
 0x290   : > { %v1102_v23 = vpop.permute.xlu1 %1101  ;;  %v1128_v39 = vpop.permute.xlu0 %1127 }
 0x291   : > { %1388 = vst.msk [vmem:[%s2255_s30 + $0x64] sm:$0xf] %vm1362_vm6, %v1556_v43  ;;  %1377 = vst.msk [vmem:[%s2255_s30 + $0x38] sm:$0xf] %vm1362_vm6, %v1545_v15  ;;  %v1237_v22 = vmax.f32 %v1209_v5, 0.0  ;;  %v1234_v24 = vmax.f32 %v1206_v19, 0.0  ;;  %v1172_v25 = vmax.f32 %v2228_v49, %v1102_v23  ;;  %v1185_v46 = vmax.f32 %v2231_v47, %v1128_v39 }
 0x293   : > { %v1546_v4 = vpack.c.bf16 %v1237_v22, %v1237_v22  ;;  %v1543_v26 = vpack.c.bf16 %v1234_v24, %v1234_v24  ;;  %v1207_v14 = vadd.f32 %v2245_v45, %v1172_v25  ;;  %v1220_v27 = vadd.f32 %v2245_v45, %v1185_v46 }
 0x294   : > { %v1130_v61 = vpop.permute.xlu1 %1129 }
 0x295   : > { %1378 = vst.msk [vmem:[%s2255_s30 + $0x3c] sm:$0xf] %vm1362_vm6, %v1546_v4  ;;  %1375 = vst.msk [vmem:[%s2255_s30 + $0x30] sm:$0xf] %vm1362_vm6, %v1543_v26  ;;  %v1235_v28 = vmax.f32 %v1207_v14, 0.0  ;;  %v1248_v7 = vmax.f32 %v1220_v27, 0.0  ;;  %v1186_v30 = vmax.f32 %v2238_v51, %v1130_v61 }
 0x297   : > { %v1544_v49 = vpack.c.bf16 %v1235_v28, %v1235_v28  ;;  %v1557_v29 = vpack.c.bf16 %v1248_v7, %v1248_v7  ;;  %v1221_v47 = vadd.f32 %v2245_v45, %v1186_v30 }
 0x299   : > { %1376 = vst.msk [vmem:[%s2255_s30 + $0x34] sm:$0xf] %vm1362_vm6, %v1544_v49  ;;  %1389 = vst.msk [vmem:[%s2255_s30 + $0x68] sm:$0xf] %vm1362_vm6, %v1557_v29  ;;  %v1249_v6 = vmax.f32 %v1221_v47, 0.0 }
 0x29b   : > { %v1558_v10 = vpack.c.bf16 %v1249_v6, %v1249_v6 }
 0x29d   : > { %1390 = vst.msk [vmem:[%s2255_s30 + $0x6c] sm:$0xf] %vm1362_vm6, %v1558_v10 }
 0x29e PF: > { %s13_s12 = sadd.s32 1, %s1657_s12  }
 0x29f   : > { %p10_p4 = scmp.ge.s32.totalorder %s13_s12, 4  }
 0x2a1   :  { %12 = sbr.rel (!%p10_p4) target bundleno = 1 (0x1), region = 62 }

// kernel: cnn8_forward.5
= control target key start
LH: loop header
LB: loop body
LE: loop exit
PB: predicated region body
PF: predicated region fallthrough
CT: control target
= control target key end

     0   :  { %s1556_s12 = smov 0   ;;  %s2003_s0 = inlined_call_operand.vmem [shape: bf16[160,128], index: 0, kind: input, shape index: {}]   ;;  %s2004_s1 = inlined_call_operand.vmem [shape: bf16[4,128,256], index: 1, kind: input, shape index: {}]   ;;  %s2005_s2 = inlined_call_operand.vmem [shape: f32[1,64], index: 2, kind: input, shape index: {}]   ;;  %s2006_s3 = inlined_call_operand.vmem [shape: bf16[160,64], index: 3, kind: output, shape index: {}]  }
   0x1 LB: > { %s1254_s13 = sadd.s32 4294967295, %s1532_s12   ;;  %p1258_p0 = scmp.ge.s32.totalorder %s1532_s12, 1  ;;  %s1532_s12 = sphi %s1556_s12, %s13_s12  }
   0x2   : > { %p138_p1 = scmp.lt.s32.totalorder %s1532_s12, 3 }
   0x4   : > { %p139_p2 = pnand %p1258_p0, %p138_p1 }
   0x5   : > { %s162_s22 = smul.u32 (!%p139_p2), 10, %s1254_s13 }
   0x6   : > { %142 = sbr.rel (%p139_p2) target bundleno = 434 (0x1b2), region = 32 }
   0x7   : > { %p163_p3 = scmp.lt.s32.totalorder (!%p139_p2), %s162_s22, 19 }
   0xb   : > { %v1416_v0 = vld [vmem:[%s2004_s1 + $0xf4] ss:$8 sps:$4 sm:$0xff]   ;;  %v1534_v2 = vmov 0   ;;  %v1420_v3 = vld [vmem:[%s2004_s1 + $0xf0] ss:$8 sps:$4 sm:$0xff]   ;;  %s2008_s22 = smov (!%p163_p3, %s162_s22), 19 }
   0xc   : > { %v1418_v1 = vld [vmem:[%s2004_s1 + $0x74] ss:$8 sps:$4 sm:$0xff]   ;;  %393 = vmatprep.mubr.bf16.mxu0 %v1534_v2  ;;  %550 = vmatprep.mubr.bf16.mxu1 %v1534_v2  ;;  %v1421_v4 = vld [vmem:[%s2004_s1 + $0x70] ss:$8 sps:$4 sm:$0xff]   ;;  %v1422_v5 = vld [vmem:[%s2004_s1 + $0xe4] ss:$8 sps:$4 sm:$0xff]  }
   0xd   : > { %361 = vmatprep.subr.bf16.mxu0 %v1416_v0  ;;  %518 = vmatprep.subr.bf16.mxu1 %v1418_v1  ;;  %v1424_v6 = vld [vmem:[%s2004_s1 + $0x64] ss:$8 sps:$4 sm:$0xff]   ;;  %v1426_v7 = vld [vmem:[%s2004_s1 + $0xe0] ss:$8 sps:$4 sm:$0xff]   ;;  %v1428_v9 = vld [vmem:[%s2004_s1 + $0xd4] ss:$8 sps:$4 sm:$0xff]  }
   0xe   : > { %362 = vmatpush1.bf16.msra.mxu0 %v1420_v3  ;;  %519 = vmatpush1.bf16.msra.mxu1 %v1421_v4  ;;  %v1427_v8 = vld [vmem:[%s2004_s1 + $0x60] ss:$8 sps:$4 sm:$0xff]   ;;  %v1430_v10 = vld [vmem:[%s2004_s1 + $0x54] ss:$8 sps:$4 sm:$0xff]   ;;  %v1432_v11 = vld [vmem:[%s2004_s1 + $0xd0] ss:$8 sps:$4 sm:$0xff]  }
   0xf   : > { %363 = vmatprep.subr.bf16.mxu0 %v1422_v5  ;;  %520 = vmatprep.subr.bf16.mxu1 %v1424_v6  ;;  %v1433_v12 = vld [vmem:[%s2004_s1 + $0x50] ss:$8 sps:$4 sm:$0xff]   ;;  %v1434_v13 = vld [vmem:[%s2004_s1 + $0xc4] ss:$8 sps:$4 sm:$0xff]   ;;  %v1438_v15 = vld [vmem:[%s2004_s1 + $0xc0] ss:$8 sps:$4 sm:$0xff]  }
  0x10   : > { %v1436_v14 = vld [vmem:[%s2004_s1 + $0x44] ss:$8 sps:$4 sm:$0xff]   ;;  %v1439_v16 = vld [vmem:[%s2004_s1 + $0x40] ss:$8 sps:$4 sm:$0xff]   ;;  %v1440_v17 = vld [vmem:[%s2004_s1 + $0xb4] ss:$8 sps:$4 sm:$0xff]  }
  0x11   : > { %v1442_v18 = vld [vmem:[%s2004_s1 + $0x34] ss:$8 sps:$4 sm:$0xff]   ;;  %v1444_v19 = vld [vmem:[%s2004_s1 + $0xb0] ss:$8 sps:$4 sm:$0xff]   ;;  %s1259_s30 = sshll.u32 %s2008_s22, 2  ;;  %vm1189_vm1 = vcmask 519168  }
  0x12   : > { %364 = vmatpush1.bf16.msra.mxu0 %v1426_v7  ;;  %521 = vmatpush1.bf16.msra.mxu1 %v1427_v8  ;;  %v1445_v20 = vld [vmem:[%s2004_s1 + $0x30] ss:$8 sps:$4 sm:$0xff]   ;;  %v1446_v21 = vld [vmem:[%s2004_s1 + $0xa4] ss:$8 sps:$4 sm:$0xff]   ;;  %s1640_s10 = scalar_lea.vmem %s2003_s0, %s1259_s30  ;;  %v1450_v23 = vld [vmem:[%s2004_s1 + $0xa0] ss:$8 sps:$4 sm:$0xff]   ;;  %s1963_s6 = scalar_lea.vmem %s2006_s3, %s1259_s30 }
  0x13   : > { %365 = vmatprep.subr.bf16.mxu0 %v1428_v9  ;;  %522 = vmatprep.subr.bf16.mxu1 %v1430_v10  ;;  %v1448_v22 = vld [vmem:[%s2004_s1 + $0x24] ss:$8 sps:$4 sm:$0xff]   ;;  %v1451_v24 = vld [vmem:[%s2004_s1 + $0x20] ss:$8 sps:$4 sm:$0xff]   ;;  %v1452_v25 = vld [vmem:[%s2004_s1 + $0x94] ss:$8 sps:$4 sm:$0xff]  }
  0x14   : > { %v1454_v26 = vld [vmem:[%s2004_s1 + $0x14] ss:$8 sps:$4 sm:$0xff]   ;;  %v175_v27 = vld [vmem:[%s1640_s10] sm:$0xf]  ;;  %v1656_v28 = vld [vmem:[%s1640_s10 + $0x4] sm:$0xf] }
  0x15   : > { %v1659_v29 = vld [vmem:[%s1640_s10 + $0x8] sm:$0xf]  ;;  %v1662_v30 = vld [vmem:[%s1640_s10 + $0xc] sm:$0xf]  ;;  %v1277_v31 = vcombine.low %v175_v27, %v1656_v28  ;;  %v1456_v32 = vld [vmem:[%s2004_s1 + $0x90] ss:$8 sps:$4 sm:$0xff]  }
  0x16   : > { %366 = vmatpush1.bf16.msra.mxu0 %v1432_v11  ;;  %523 = vmatpush1.bf16.msra.mxu1 %v1433_v12  ;;  %v1457_v33 = vld [vmem:[%s2004_s1 + $0x10] ss:$8 sps:$4 sm:$0xff]   ;;  %v1673_v34 = vcombine.low %v1659_v29, %v1662_v30  ;;  %v1458_v35 = vld [vmem:[%s2004_s1 + $0x84] ss:$8 sps:$4 sm:$0xff]   ;;  %vm240_vm0 = vsmask.f32 7424 }
  0x17   : > { %367 = vmatprep.subr.bf16.mxu0 %v1434_v13  ;;  %524 = vmatprep.subr.bf16.mxu1 %v1436_v14  ;;  %v242_v36 = vshrl.u32 %v1277_v31, 16  ;;  %v244_v37 = vshll.u32 %v1277_v31, 16  ;;  %v1460_v38 = vld [vmem:[%s2004_s1 + $0x4] ss:$8 sps:$4 sm:$0xff]   ;;  %v1462_v41 = vld [vmem:[%s2004_s1 + $0x80] ss:$8 sps:$4 sm:$0xff]  }
  0x18   : > { %v249_v39 = vshll.u32 %v1673_v34, 16  ;;  %v1463_v42 = vld [vmem:[%s2004_s1] ss:$8 sps:$4 sm:$0xff]   ;;  %v1689_v45 = vld [vmem:[%s1640_s10 + $0x10] sm:$0xf]  ;;  %v253_v53 = vshrl.u32 %v1673_v34, 16 }
  0x19   : > { %v246_v40 = vrot.slane %v244_v37, 1  ;;  %v1692_v46 = vld [vmem:[%s1640_s10 + $0x14] sm:$0xf]  ;;  %v1466_v50 = vld [vmem:[%s2004_s1 + $0x170] ss:$8 sps:$4 sm:$0xff]  }
  0x1a   : > { %368 = vmatpush1.bf16.msra.mxu0 %v1438_v15  ;;  %525 = vmatpush1.bf16.msra.mxu1 %v1439_v16  ;;  %v251_v44 = vrot.slane %v249_v39, 1  ;;  %v1468_v47 = vld [vmem:[%s2004_s1 + $0x174] ss:$8 sps:$4 sm:$0xff]   ;;  %v1702_v49 = vcombine.low %v1689_v45, %v1692_v46  ;;  %v1469_v52 = vld [vmem:[%s2004_s1 + $0x1f0] ss:$8 sps:$4 sm:$0xff]  }
  0x1b   : > { %369 = vmatprep.subr.bf16.mxu0 %v1440_v17  ;;  %526 = vmatprep.subr.bf16.mxu1 %v1442_v18  ;;  %v247_v43 = vor.u32 %v246_v40, %v242_v36  ;;  %v1471_v48 = vld [vmem:[%s2004_s1 + $0x1f4] ss:$8 sps:$4 sm:$0xff]   ;;  %v1474_v55 = vld [vmem:[%s2004_s1 + $0x164] ss:$8 sps:$4 sm:$0xff]   ;;  %v1720_v57 = vld [vmem:[%s1640_s10 + $0x18] sm:$0xf] }
  0x1c   : > { %v257_v54 = vshll.u32 %v1702_v49, 16  ;;  %v1477_v56 = vld [vmem:[%s2004_s1 + $0x1e4] ss:$8 sps:$4 sm:$0xff]   ;;  %v1723_v58 = vld [vmem:[%s1640_s10 + $0x1c] sm:$0xf]  ;;  %v255_v61 = vor.u32 %v253_v53, %v251_v44  ;;  %v261_v6 = vshrl.u32 %v1702_v49, 16 }
  0x1d   : > { %v252_v51 = vsel %vm240_vm0, %v247_v43, %v251_v44  ;;  %v1472_v59 = vld [vmem:[%s2004_s1 + $0x160] ss:$8 sps:$4 sm:$0xff]   ;;  %v1481_v63 = vld [vmem:[%s2004_s1 + $0x154] ss:$8 sps:$4 sm:$0xff]   ;;  %v1736_v0 = vcombine.low %v1720_v57, %v1723_v58  ;;  %v1479_v3 = vld [vmem:[%s2004_s1 + $0x150] ss:$8 sps:$4 sm:$0xff]  }
  0x1e   : > { %370 = vmatpush1.bf16.msra.mxu0 %v1444_v19  ;;  %527 = vmatpush1.bf16.msra.mxu1 %v1445_v20  ;;  %v1475_v60 = vld [vmem:[%s2004_s1 + $0x1e0] ss:$8 sps:$4 sm:$0xff]   ;;  %v259_v62 = vrot.slane %v257_v54, 1  ;;  %v1484_v1 = vld [vmem:[%s2004_s1 + $0x1d4] ss:$8 sps:$4 sm:$0xff]  }
  0x1f   : > { %371 = vmatprep.subr.bf16.mxu0 %v1446_v21  ;;  %528 = vmatprep.subr.bf16.mxu1 %v1448_v22  ;;  %v1482_v4 = vld [vmem:[%s2004_s1 + $0x1d0] ss:$8 sps:$4 sm:$0xff]   ;;  %v265_v7 = vshll.u32 %v1736_v0, 16  ;;  %v1487_v8 = vld [vmem:[%s2004_s1 + $0x144] ss:$8 sps:$4 sm:$0xff]   ;;  %v269_v19 = vshrl.u32 %v1736_v0, 16 }
  0x20   : > { %v260_v5 = vsel %vm240_vm0, %v255_v61, %v259_v62  ;;  %v1490_v9 = vld [vmem:[%s2004_s1 + $0x1c4] ss:$8 sps:$4 sm:$0xff]   ;;  %v1485_v10 = vld [vmem:[%s2004_s1 + $0x140] ss:$8 sps:$4 sm:$0xff]   ;;  %v263_v12 = vor.u32 %v261_v6, %v259_v62  ;;  %v1494_v15 = vld [vmem:[%s2004_s1 + $0x134] ss:$8 sps:$4 sm:$0xff]  }
  0x21   : > { %v1488_v11 = vld [vmem:[%s2004_s1 + $0x1c0] ss:$8 sps:$4 sm:$0xff]   ;;  %v267_v13 = vrot.slane %v265_v7, 1  ;;  %v1497_v16 = vld [vmem:[%s2004_s1 + $0x1b4] ss:$8 sps:$4 sm:$0xff]  }
  0x22   : > { %372 = vmatpush1.bf16.msra.mxu0 %v1450_v23  ;;  %529 = vmatpush1.bf16.msra.mxu1 %v1451_v24  ;;  %v1504_v14 = vld [vmem:[%s1640_s10 + $0x20] ss:$0 sps:$4 sm:$0x11]   ;;  %v1492_v17 = vld [vmem:[%s2004_s1 + $0x130] ss:$8 sps:$4 sm:$0xff]   ;;  %v1518_v22 = vld [vmem:[%s1640_s10 + $0x4] sm:$0xff]  }
  0x23   : > { %373 = vmatprep.subr.bf16.mxu0 %v1452_v25  ;;  %530 = vmatprep.subr.bf16.mxu1 %v1454_v26  ;;  %v1495_v18 = vld [vmem:[%s2004_s1 + $0x1b0] ss:$8 sps:$4 sm:$0xff]   ;;  %v268_v20 = vsel %vm240_vm0, %v263_v12, %v267_v13  ;;  %v273_v21 = vshll.u32 %v1504_v14, 16  ;;  %v1500_v23 = vld [vmem:[%s2004_s1 + $0x124] ss:$8 sps:$4 sm:$0xff]   ;;  %v271_v27 = vor.u32 %v269_v19, %v267_v13  ;;  %v838_v39 = vshrl.u32 %v1518_v22, 16 }
  0x24   : > { %v1503_v24 = vld [vmem:[%s2004_s1 + $0x1a4] ss:$8 sps:$4 sm:$0xff]   ;;  %v1498_v25 = vld [vmem:[%s2004_s1 + $0x120] ss:$8 sps:$4 sm:$0xff]   ;;  %v1505_v36 = vld [vmem:[%s2004_s1 + $0x110] ss:$8 sps:$4 sm:$0xff]  }
  0x25   : > { %v1501_v26 = vld [vmem:[%s2004_s1 + $0x1a0] ss:$8 sps:$4 sm:$0xff]   ;;  %v1516_v43 = vld [vmem:[%s2004_s1 + $0x184] ss:$8 sps:$4 sm:$0xff]  }
  0x26   : > { %374 = vmatpush1.bf16.msra.mxu0 %v1456_v32  ;;  %531 = vmatpush1.bf16.msra.mxu1 %v1457_v33  ;;  %v1519_v32 = vld [vmem:[%s1640_s10 + $0xc] sm:$0xff]   ;;  %v840_v33 = vshll.u32 %v1518_v22, 16  ;;  %v1511_v44 = vld [vmem:[%s2004_s1 + $0x100] ss:$8 sps:$4 sm:$0xff]  }
  0x27   : > { %375 = vmatprep.subr.bf16.mxu0 %v1458_v35  ;;  %532 = vmatprep.subr.bf16.mxu1 %v1460_v38  ;;  %v1510_v35 = vld [vmem:[%s2004_s1 + $0x194] ss:$8 sps:$4 sm:$0xff]   ;;  %v1508_v38 = vld [vmem:[%s2004_s1 + $0x190] ss:$8 sps:$4 sm:$0xff]   ;;  %v849_v53 = vshrl.u32 %v1519_v32, 16 }
  0x28   : > { %v842_v40 = vrot.slane %v840_v33, 1 }
  0x2a   : > { %376 = vmatpush1.bf16.msra.mxu0 %v1462_v41  ;;  %533 = vmatpush1.bf16.msra.mxu1 %v1463_v42  ;;  %v845_v41 = vshll.u32 %v1519_v32, 16  ;;  %v1513_v42 = vld [vmem:[%s2004_s1 + $0x104] ss:$8 sps:$4 sm:$0xff]  }
  0x2b   : > { %699 = vmatprep.subr.bf16.mxu0 %v1468_v47  ;;  %957 = vmatprep.subr.bf16.mxu1 %v1471_v48  ;;  %v1514_v47 = vld [vmem:[%s2004_s1 + $0x180] ss:$8 sps:$4 sm:$0xff]   ;;  %v843_v48 = vor.u32 %v842_v40, %v838_v39 }
  0x2d   : > { %394 = vmatmul.mubr.bf16.vlgmr.msra.gmra.mxu0 %v252_v51  ;;  %551 = vmatmul.mubr.bf16.vlgmr.msra.gmra.mxu1 %v1277_v31  ;;  %v275_v31 = vrot.slane %v273_v21, 1  ;;  %v1330_v51 = vcombine.low %v1656_v28, %v1659_v29 }
  0x2e   : > { %700 = vmatpush1.bf16.msra.mxu0 %v1466_v50  ;;  %958 = vmatpush1.bf16.msra.mxu1 %v1469_v52  ;;  %v1521_v50 = vld [vmem:[%s1640_s10 + $0x14] sm:$0xff]  }
  0x2f   : > { %701 = vmatprep.subr.bf16.mxu0 %v1474_v55  ;;  %959 = vmatprep.subr.bf16.mxu1 %v1477_v56  ;;  %v276_v37 = vsel %vm240_vm0, %v271_v27, %v275_v31  ;;  %v853_v54 = vshll.u32 %v1521_v50, 16  ;;  %v857_v29 = vshrl.u32 %v1521_v50, 16 }
  0x30   : > { %403 = vmatprep.mubr.bf16.mxu0 %v1534_v2  ;;  %560 = vmatprep.mubr.bf16.mxu1 %v1534_v2 }
  0x31   : > { %v855_v56 = vrot.slane %v853_v54, 1 }
  0x32   : > { %702 = vmatpush1.bf16.msra.mxu0 %v1472_v59  ;;  %960 = vmatpush1.bf16.msra.mxu1 %v1475_v60  ;;  %v1523_v59 = vld [vmem:[%s1640_s10 + $0x1c] sm:$0xff]   ;;  %v1331_v60 = vcombine.low %v1662_v30, %v1689_v45 }
  0x33   : > { %703 = vmatprep.subr.bf16.mxu0 %v1481_v63  ;;  %961 = vmatprep.subr.bf16.mxu1 %v1484_v1  ;;  %v861_v61 = vshll.u32 %v1523_v59, 16  ;;  %v859_v62 = vor.u32 %v857_v29, %v855_v56  ;;  %v1332_v1 = vcombine.low %v1692_v46, %v1720_v57  ;;  %v865_v30 = vshrl.u32 %v1523_v59, 16 }
  0x35   : > { %404 = vmatmul.mubr.bf16.gmra.mxu0 %v260_v5  ;;  %561 = vmatmul.mubr.bf16.gmra.mxu1 %v1673_v34  ;;  %v1507_v34 = vld [vmem:[%s2004_s1 + $0x114] ss:$8 sps:$4 sm:$0xff]   ;;  %v863_v63 = vrot.slane %v861_v61, 1 }
  0x36   : > { %704 = vmatpush1.bf16.msra.mxu0 %v1479_v3  ;;  %962 = vmatpush1.bf16.msra.mxu1 %v1482_v4  ;;  %v591_v4 = vld [vmem:[%s1640_s10 + $0x20] sm:$0xf] }
  0x37   : > { %705 = vmatprep.subr.bf16.mxu0 %v1487_v8  ;;  %963 = vmatprep.subr.bf16.mxu1 %v1490_v9  ;;  %v864_v3 = vsel %vm240_vm0, %v859_v62, %v863_v63  ;;  %v867_v5 = vor.u32 %v865_v30, %v863_v63  ;;  %v1333_v7 = vcombine.low %v1723_v58, %v591_v4 }
  0x38   : > { %413 = vmatprep.mubr.bf16.mxu0 %v1534_v2  ;;  %570 = vmatprep.mubr.bf16.mxu1 %v1534_v2 }
  0x3a   : > { %706 = vmatpush1.bf16.msra.mxu0 %v1485_v10  ;;  %964 = vmatpush1.bf16.msra.mxu1 %v1488_v11 }
  0x3b   : > { %707 = vmatprep.subr.bf16.mxu0 %v1494_v15  ;;  %965 = vmatprep.subr.bf16.mxu1 %v1497_v16 }
  0x3d   : > { %414 = vmatmul.mubr.bf16.gmra.mxu0 %v268_v20  ;;  %571 = vmatmul.mubr.bf16.gmra.mxu1 %v1702_v49  ;;  %v847_v49 = vrot.slane %v845_v41, 1 }
  0x3e   : > { %708 = vmatpush1.bf16.msra.mxu0 %v1492_v17  ;;  %966 = vmatpush1.bf16.msra.mxu1 %v1495_v18 }
  0x3f   : > { %709 = vmatprep.subr.bf16.mxu0 %v1500_v23  ;;  %967 = vmatprep.subr.bf16.mxu1 %v1503_v24  ;;  %v848_v52 = vsel %vm240_vm0, %v843_v48, %v847_v49  ;;  %v851_v55 = vor.u32 %v849_v53, %v847_v49 }
  0x40   : > { %423 = vmatprep.mubr.bf16.mxu0 %v1534_v2  ;;  %580 = vmatprep.mubr.bf16.mxu1 %v1534_v2 }
  0x41   : > { %v856_v28 = vsel %vm240_vm0, %v851_v55, %v855_v56 }
  0x42   : > { %710 = vmatpush1.bf16.msra.mxu0 %v1498_v25  ;;  %968 = vmatpush1.bf16.msra.mxu1 %v1501_v26 }
  0x43   : > { %711 = vmatprep.subr.bf16.mxu0 %v1507_v34  ;;  %969 = vmatprep.subr.bf16.mxu1 %v1510_v35 }
  0x45   : > { %424 = vmatmul.mubr.bf16.gmra.mxu0 %v276_v37  ;;  %581 = vmatmul.mubr.bf16.gmra.mxu1 %v1736_v0  ;;  %v1525_v0 = vld [vmem:[%s1640_s10 + $0x24] ss:$0 sps:$4 sm:$0x11]   ;;  %s1535_s10 = smov 64  }
  0x46   : > { %712 = vmatpush1.bf16.msra.mxu0 %v1505_v36  ;;  %970 = vmatpush1.bf16.msra.mxu1 %v1508_v38  ;;  %v869_v45 = vshll.u32 %v1525_v0, 16 }
  0x47   : > { %713 = vmatprep.subr.bf16.mxu0 %v1513_v42  ;;  %971 = vmatprep.subr.bf16.mxu1 %v1516_v43 }
  0x48   : > { %731 = vmatprep.mubr.bf16.mxu0 %v1534_v2  ;;  %989 = vmatprep.mubr.bf16.mxu1 %v1534_v2  ;;  %v871_v6 = vrot.slane %v869_v45, 1 }
  0x4a   : > { %714 = vmatpush1.bf16.msra.mxu0 %v1511_v44  ;;  %972 = vmatpush1.bf16.msra.mxu1 %v1514_v47  ;;  %v872_v8 = vsel %vm240_vm0, %v867_v5, %v871_v6 }
  0x4d   : > { %732 = vmatmul.mubr.bf16.vlgmr.msra.gmra.mxu0 %v1330_v51  ;;  %990 = vmatmul.mubr.bf16.vlgmr.msra.gmra.mxu1 %v848_v52 }
  0x4e   : > { %741 = vmatprep.mubr.bf16.mxu0 %v1534_v2  ;;  %999 = vmatprep.mubr.bf16.mxu1 %v1534_v2 }
  0x55   : > { %742 = vmatmul.mubr.bf16.gmra.mxu0 %v1331_v60  ;;  %1000 = vmatmul.mubr.bf16.gmra.mxu1 %v856_v28 }
  0x56   : > { %751 = vmatprep.mubr.bf16.mxu0 %v1534_v2  ;;  %1009 = vmatprep.mubr.bf16.mxu1 %v1534_v2 }
  0x5d   : > { %752 = vmatmul.mubr.bf16.gmra.mxu0 %v1332_v1  ;;  %1010 = vmatmul.mubr.bf16.gmra.mxu1 %v864_v3 }
  0x5e   : > { %761 = vmatprep.mubr.bf16.mxu0 %v1534_v2  ;;  %1019 = vmatprep.mubr.bf16.mxu1 %v1534_v2 }
  0x65   : > { %762 = vmatmul.mubr.bf16.gmra.mxu0 %v1333_v7  ;;  %1020 = vmatmul.mubr.bf16.gmra.mxu1 %v872_v8 }
  0xed   : > { %v395_v46 = vpop.f32.mrf.mxu0  ;;  %v552_v57 = vpop.f32.mrf.mxu1 }
  0xee   : > { %v553_v40 = vadd.f32 %v552_v57, %v395_v46 }
  0xef   : > { %v397_v9 = vpop.f32.mrf.mxu0  ;;  %v554_v10 = vpop.f32.mrf.mxu1 }
  0xf0   : > { %v555_v43 = vadd.f32 %v554_v10, %v397_v9 }
  0xf1   : > { %v399_v11 = vpop.f32.mrf.mxu0  ;;  %v556_v12 = vpop.f32.mrf.mxu1 }
  0xf2   : > { %v557_v53 = vadd.f32 %v556_v12, %v399_v11 }
  0xf3   : > { %v401_v13 = vpop.f32.mrf.mxu0  ;;  %v558_v14 = vpop.f32.mrf.mxu1 }
  0xf4   : > { %v559_v54 = vadd.f32 %v558_v14, %v401_v13 }
  0xf5   : > { %v405_v15 = vpop.f32.mrf.mxu0  ;;  %v562_v16 = vpop.f32.mrf.mxu1 }
  0xf6   : > { %v563_v59 = vadd.f32 %v562_v16, %v405_v15 }
  0xf7   : > { %v407_v2 = vpop.f32.mrf.mxu0  ;;  %v564_v17 = vpop.f32.mrf.mxu1 }
  0xf8   : > { %v565_v63 = vadd.f32 %v564_v17, %v407_v2 }
  0xf9   : > { %v409_v18 = vpop.f32.mrf.mxu0  ;;  %v566_v19 = vpop.f32.mrf.mxu1 }
  0xfa   : > { %v567_v45 = vadd.f32 %v566_v19, %v409_v18 }
  0xfb   : > { %v411_v20 = vpop.f32.mrf.mxu0  ;;  %v568_v58 = vpop.f32.mrf.mxu1 }
  0xfc   : > { %v569_v10 = vadd.f32 %v568_v58, %v411_v20 }
  0xfd   : > { %v415_v21 = vpop.f32.mrf.mxu0  ;;  %v572_v22 = vpop.f32.mrf.mxu1 }
  0xfe   : > { %v573_v11 = vadd.f32 %v572_v22, %v415_v21 }
  0xff   : > { %v417_v23 = vpop.f32.mrf.mxu0  ;;  %v574_v24 = vpop.f32.mrf.mxu1 }
 0x100   : > { %v575_v15 = vadd.f32 %v574_v24, %v417_v23 }
 0x101   : > { %v1848_v25 = vpop.f32.mrf.mxu0  ;;  %v1850_v26 = vpop.f32.mrf.mxu1 }
 0x102   : > { %v577_v20 = vadd.f32 %v1850_v26, %v1848_v25 }
 0x103   : > { %v1852_v27 = vpop.f32.mrf.mxu0  ;;  %v1854_v31 = vpop.f32.mrf.mxu1 }
 0x105   : > { %v1856_v32 = vpop.f32.mrf.mxu0  ;;  %v1858_v33 = vpop.f32.mrf.mxu1 }
 0x106   : > { %v583_v25 = vadd.f32 %v1858_v33, %v1856_v32 }
 0x107   : > { %v1860_v34 = vpop.f32.mrf.mxu0  ;;  %v1862_v35 = vpop.f32.mrf.mxu1 }
 0x109   : > { %v1864_v36 = vpop.f32.mrf.mxu0  ;;  %v1866_v37 = vpop.f32.mrf.mxu1 }
 0x10b   : > { %v1868_v38 = vpop.f32.mrf.mxu0  ;;  %v1870_v39 = vpop.f32.mrf.mxu1 }
 0x10d   : > { %v733_v41 = vpop.f32.mrf.mxu0  ;;  %v991_v42 = vpop.f32.mrf.mxu1 }
 0x10e   : > { %v772_v44 = vadd.f32 %v733_v41, %v553_v40 }
 0x10f   : > { %v735_v47 = vpop.f32.mrf.mxu0  ;;  %v993_v48 = vpop.f32.mrf.mxu1 }
 0x110   : > { %v1872_v49 = vadd.f32 %v991_v42, %v772_v44  ;;  %v773_v50 = vadd.f32 %v735_v47, %v555_v43  ;;  %v579_v43 = vadd.f32 %v1854_v31, %v1852_v27  ;;  %v587_v31 = vadd.f32 %v1866_v37, %v1864_v36 }
 0x111   : > { %v737_v51 = vpop.f32.mrf.mxu0  ;;  %v995_v52 = vpop.f32.mrf.mxu1 }
 0x112   : > { %1054 = vrot.lane.b32.xlu0 %v1872_v49, %s1535_s10  ;;  %v1876_v60 = vadd.f32 %v993_v48, %v773_v50  ;;  %v774_v28 = vadd.f32 %v737_v51, %v557_v53  ;;  %v585_v48 = vadd.f32 %v1862_v35, %v1860_v34 }
 0x113   : > { %v739_v55 = vpop.f32.mrf.mxu0  ;;  %v997_v56 = vpop.f32.mrf.mxu1 }
 0x114   : > { %v775_v29 = vadd.f32 %v739_v55, %v559_v54  ;;  %v1882_v4 = vadd.f32 %v995_v52, %v774_v28 }
 0x115   : > { %v743_v61 = vpop.f32.mrf.mxu0  ;;  %v1001_v62 = vpop.f32.mrf.mxu1 }
 0x116   : > { %v1878_v0 = vadd.f32 %v997_v56, %v775_v29  ;;  %v776_v1 = vadd.f32 %v743_v61, %v563_v59  ;;  %1094 = vrot.lane.b32.xlu0 %v1876_v60, %s1535_s10  ;;  %v589_v56 = vadd.f32 %v1870_v39, %v1868_v38 }
 0x117   : > { %v745_v3 = vpop.f32.mrf.mxu0  ;;  %v1003_v30 = vpop.f32.mrf.mxu1 }
 0x118   : > { %v777_v5 = vadd.f32 %v745_v3, %v565_v63  ;;  %1096 = vrot.lane.b32.xlu1 %v1878_v0, %s1535_s10  ;;  %v1886_v8 = vadd.f32 %v1001_v62, %v776_v1  ;;  %v1953_v1 = vld [vmem:[%s2005_s2] ss:$0 sm:$0xff] }
 0x119   : > { %v747_v6 = vpop.f32.mrf.mxu0  ;;  %v1005_v7 = vpop.f32.mrf.mxu1 }
 0x11a   : > { %v778_v46 = vadd.f32 %v747_v6, %v567_v45  ;;  %1056 = vrot.lane.b32.xlu0 %v1882_v4, %s1535_s10  ;;  %v1890_v12 = vadd.f32 %v1003_v30, %v777_v5 }
 0x11b   : > { %v749_v57 = vpop.f32.mrf.mxu0  ;;  %v1007_v9 = vpop.f32.mrf.mxu1 }
 0x11c   : > { %1058 = vrot.lane.b32.xlu1 %v1886_v8, %s1535_s10  ;;  %v1894_v16 = vadd.f32 %v1005_v7, %v778_v46  ;;  %v779_v2 = vadd.f32 %v749_v57, %v569_v10 }
 0x11d   : > { %v753_v13 = vpop.f32.mrf.mxu0  ;;  %v1011_v14 = vpop.f32.mrf.mxu1 }
 0x11e   : > { %v780_v17 = vadd.f32 %v753_v13, %v573_v11  ;;  %1098 = vrot.lane.b32.xlu0 %v1890_v12, %s1535_s10  ;;  %v1904_v24 = vadd.f32 %v1007_v9, %v779_v2 }
 0x11f   : > { %v755_v18 = vpop.f32.mrf.mxu0  ;;  %v1013_v19 = vpop.f32.mrf.mxu1 }
 0x120   : > { %v1900_v58 = vadd.f32 %v1011_v14, %v780_v17  ;;  %v781_v21 = vadd.f32 %v755_v18, %v575_v15  ;;  %1060 = vrot.lane.b32.xlu1 %v1894_v16, %s1535_s10 }
 0x121   : > { %v757_v22 = vpop.f32.mrf.mxu0  ;;  %v1015_v23 = vpop.f32.mrf.mxu1 }
 0x122   : > { %v782_v40 = vadd.f32 %v757_v22, %v577_v20  ;;  %1062 = vrot.lane.b32.xlu0 %v1900_v58, %s1535_s10  ;;  %v1912_v26 = vadd.f32 %v1013_v19, %v781_v21 }
 0x123   : > { %v759_v41 = vpop.f32.mrf.mxu0  ;;  %v1017_v42 = vpop.f32.mrf.mxu1 }
 0x124   : > { %1100 = vrot.lane.b32.xlu1 %v1904_v24, %s1535_s10  ;;  %v1918_v50 = vadd.f32 %v1015_v23, %v782_v40  ;;  %v783_v51 = vadd.f32 %v759_v41, %v579_v43 }
 0x125   : > { %v763_v44 = vpop.f32.mrf.mxu0  ;;  %v1021_v47 = vpop.f32.mrf.mxu1 }
 0x126   : > { %v784_v52 = vadd.f32 %v763_v44, %v583_v25  ;;  %1102 = vrot.lane.b32.xlu0 %v1912_v26, %s1535_s10  ;;  %v1928_v34 = vadd.f32 %v1017_v42, %v783_v51 }
 0x127   : > { %v765_v27 = vpop.f32.mrf.mxu0  ;;  %v1023_v53 = vpop.f32.mrf.mxu1 }
 0x128   : > { %v1924_v32 = vadd.f32 %v1021_v47, %v784_v52  ;;  %v785_v33 = vadd.f32 %v765_v27, %v585_v48  ;;  %1064 = vrot.lane.b32.xlu1 %v1918_v50, %s1535_s10 }
 0x129   : > { %v767_v54 = vpop.f32.mrf.mxu0  ;;  %v1025_v36 = vpop.f32.mrf.mxu1 }
 0x12a   : > { %v786_v35 = vadd.f32 %v767_v54, %v587_v31  ;;  %1066 = vrot.lane.b32.xlu0 %v1924_v32, %s1535_s10  ;;  %v1934_v59 = vadd.f32 %v1023_v53, %v785_v33 }
 0x12b   : > { %v769_v55 = vpop.f32.mrf.mxu0  ;;  %v1027_v29 = vpop.f32.mrf.mxu1 }
 0x12c   : > { %1104 = vrot.lane.b32.xlu1 %v1928_v34, %s1535_s10  ;;  %v1938_v37 = vadd.f32 %v1025_v36, %v786_v35  ;;  %v787_v28 = vadd.f32 %v769_v55, %v589_v56 }
 0x12e   : > { %1106 = vrot.lane.b32.xlu0 %v1934_v59, %s1535_s10  ;;  %v1944_v61 = vadd.f32 %v1027_v29, %v787_v28 }
 0x130   : > { %1068 = vrot.lane.b32.xlu1 %v1938_v37, %s1535_s10 }
 0x134   : > { %1108 = vrot.lane.b32.xlu1 %v1944_v61, %s1535_s10 }
 0x184   : > { %v1055_v38 = vpop.permute.xlu0 %1054 }
 0x185   : > { %v1078_v62 = vmax.f32 %v1872_v49, %v1055_v38 }
 0x188   : > { %v1095_v39 = vpop.permute.xlu0 %1094 }
 0x189   : > { %v1118_v63 = vmax.f32 %v1876_v60, %v1095_v39 }
 0x18a   : > { %v1097_v3 = vpop.permute.xlu1 %1096 }
 0x18b   : > { %v1126_v30 = vmax.f32 %v1078_v62, %v1118_v63  ;;  %v1119_v6 = vmax.f32 %v1878_v0, %v1097_v3 }
 0x18c   : > { %v1057_v45 = vpop.permute.xlu0 %1056 }
 0x18d   : > { %v1141_v5 = vadd.f32 %v1953_v1, %v1126_v30  ;;  %v1079_v7 = vmax.f32 %v1882_v4, %v1057_v45 }
 0x18e   : > { %v1059_v46 = vpop.permute.xlu1 %1058 }
 0x18f   : > { %v1149_v57 = vmax.f32 %v1141_v5, 0.0  ;;  %v1127_v9 = vmax.f32 %v1079_v7, %v1119_v6  ;;  %v1080_v0 = vmax.f32 %v1886_v8, %v1059_v46 }
 0x190   : > { %v1099_v49 = vpop.permute.xlu0 %1098 }
 0x191   : > { %v1398_v60 = vpack.c.bf16 %v1149_v57, %v1149_v57  ;;  %v1142_v10 = vadd.f32 %v1953_v1, %v1127_v9  ;;  %v1120_v4 = vmax.f32 %v1890_v12, %v1099_v49 }
 0x192   : > { %v1061_v11 = vpop.permute.xlu1 %1060 }
 0x193   : > { %1190 = vst.msk [vmem:[%s1963_s6] sm:$0xf] %vm1189_vm1, %v1398_v60  ;;  %v1150_v13 = vmax.f32 %v1142_v10, 0.0  ;;  %v1128_v14 = vmax.f32 %v1080_v0, %v1120_v4  ;;  %v1081_v20 = vmax.f32 %v1894_v16, %v1061_v11 }
 0x194   : > { %v1063_v15 = vpop.permute.xlu0 %1062 }
 0x195   : > { %v1399_v2 = vpack.c.bf16 %v1150_v13, %v1150_v13  ;;  %v1143_v17 = vadd.f32 %v1953_v1, %v1128_v14  ;;  %v1082_v22 = vmax.f32 %v1900_v58, %v1063_v15 }
 0x196   : > { %v1101_v18 = vpop.permute.xlu1 %1100 }
 0x197   : > { %1191 = vst.msk [vmem:[%s1963_s6 + $0x4] sm:$0xf] %vm1189_vm1, %v1399_v2  ;;  %v1151_v19 = vmax.f32 %v1143_v17, 0.0  ;;  %v1121_v8 = vmax.f32 %v1904_v24, %v1101_v18 }
 0x198   : > { %v1103_v21 = vpop.permute.xlu0 %1102 }
 0x199   : > { %v1400_v12 = vpack.c.bf16 %v1151_v19, %v1151_v19  ;;  %v1129_v23 = vmax.f32 %v1081_v20, %v1121_v8  ;;  %v1122_v40 = vmax.f32 %v1912_v26, %v1103_v21 }
 0x19a   : > { %v1065_v41 = vpop.permute.xlu1 %1064 }
 0x19b   : > { %1192 = vst.msk [vmem:[%s1963_s6 + $0x8] sm:$0xf] %vm1189_vm1, %v1400_v12  ;;  %v1144_v42 = vadd.f32 %v1953_v1, %v1129_v23  ;;  %v1130_v43 = vmax.f32 %v1082_v22, %v1122_v40  ;;  %v1083_v58 = vmax.f32 %v1918_v50, %v1065_v41 }
 0x19c   : > { %v1067_v25 = vpop.permute.xlu0 %1066 }
 0x19d   : > { %v1152_v44 = vmax.f32 %v1144_v42, 0.0  ;;  %v1145_v16 = vadd.f32 %v1953_v1, %v1130_v43  ;;  %v1084_v27 = vmax.f32 %v1924_v32, %v1067_v25 }
 0x19e   : > { %v1105_v24 = vpop.permute.xlu1 %1104 }
 0x19f   : > { %v1401_v47 = vpack.c.bf16 %v1152_v44, %v1152_v44  ;;  %v1153_v48 = vmax.f32 %v1145_v16, 0.0  ;;  %v1123_v51 = vmax.f32 %v1928_v34, %v1105_v24 }
 0x1a0   : > { %v1107_v52 = vpop.permute.xlu0 %1106 }
 0x1a1   : > { %1193 = vst.msk [vmem:[%s1963_s6 + $0xc] sm:$0xf] %vm1189_vm1, %v1401_v47  ;;  %v1402_v26 = vpack.c.bf16 %v1153_v48, %v1153_v48  ;;  %v1131_v31 = vmax.f32 %v1083_v58, %v1123_v51  ;;  %v1124_v33 = vmax.f32 %v1934_v59, %v1107_v52 }
 0x1a2   : > { %v1069_v53 = vpop.permute.xlu1 %1068 }
 0x1a3   : > { %1194 = vst.msk [vmem:[%s1963_s6 + $0x10] sm:$0xf] %vm1189_vm1, %v1402_v26  ;;  %v1146_v54 = vadd.f32 %v1953_v1, %v1131_v31  ;;  %v1132_v50 = vmax.f32 %v1084_v27, %v1124_v33  ;;  %v1085_v28 = vmax.f32 %v1938_v37, %v1069_v53 }
 0x1a5   : > { %v1154_v35 = vmax.f32 %v1146_v54, 0.0  ;;  %v1147_v34 = vadd.f32 %v1953_v1, %v1132_v50 }
 0x1a6   : > { %v1109_v55 = vpop.permute.xlu1 %1108 }
 0x1a7   : > { %v1403_v56 = vpack.c.bf16 %v1154_v35, %v1154_v35  ;;  %v1155_v36 = vmax.f32 %v1147_v34, 0.0  ;;  %v1125_v32 = vmax.f32 %v1944_v61, %v1109_v55 }
 0x1a9   : > { %1195 = vst.msk [vmem:[%s1963_s6 + $0x14] sm:$0xf] %vm1189_vm1, %v1403_v56  ;;  %v1404_v59 = vpack.c.bf16 %v1155_v36, %v1155_v36  ;;  %v1133_v29 = vmax.f32 %v1085_v28, %v1125_v32 }
 0x1ab   : > { %1196 = vst.msk [vmem:[%s1963_s6 + $0x18] sm:$0xf] %vm1189_vm1, %v1404_v59  ;;  %v1148_v38 = vadd.f32 %v1953_v1, %v1133_v29 }
 0x1ad   : > { %v1156_v39 = vmax.f32 %v1148_v38, 0.0 }
 0x1af   : > { %v1405_v62 = vpack.c.bf16 %v1156_v39, %v1156_v39 }
 0x1b1   : > { %1197 = vst.msk [vmem:[%s1963_s6 + $0x1c] sm:$0xf] %vm1189_vm1, %v1405_v62 }
 0x1b2 PF: > { %s13_s12 = sadd.s32 1, %s1532_s12  }
 0x1b3   : > { %p10_p4 = scmp.ge.s32.totalorder %s13_s12, 4  }
 0x1b5   :  { %12 = sbr.rel (!%p10_p4) target bundleno = 1 (0x1), region = 65 }

// kernel: cnn8_forward.6
= control target key start
LH: loop header
LB: loop body
LE: loop exit
PB: predicated region body
PF: predicated region fallthrough
CT: control target
= control target key end

     0   :  { %s3180_s12 = smov 0   ;;  %s4032_s0 = inlined_call_operand.vmem [shape: bf16[64,256], index: 0, kind: input, shape index: {}]   ;;  %s4033_s1 = inlined_call_operand.vmem [shape: bf16[4,256,512], index: 1, kind: input, shape index: {}]   ;;  %s4034_s2 = inlined_call_operand.vmem [shape: f32[1,128], index: 2, kind: input, shape index: {}]   ;;  %s4035_s3 = inlined_call_operand.vmem [shape: bf16[64,128], index: 3, kind: output, shape index: {}]  }
   0x1 LB: > { %s2268_s13 = sadd.s32 4294967295, %s3158_s12   ;;  %p2272_p0 = scmp.ge.s32.totalorder %s3158_s12, 1  ;;  %s3158_s12 = sphi %s3180_s12, %s13_s12  }
   0x2   : > { %p139_p1 = scmp.lt.s32.totalorder %s3158_s12, 3 }
   0x4   : > { %p140_p2 = pnand %p2272_p0, %p139_p1 }
   0x5   : > { %s2273_s24 = sshll.u32 (!%p140_p2), %s2268_s13, 2 }
   0x6   : > { %143 = sbr.rel (%p140_p2) target bundleno = 480 (0x1e0), region = 32  ;;  %p165_p3 = scmp.lt.s32.totalorder (!%p140_p2), %s2273_s24, 7 }
   0xb   : > { %v2757_v0 = vld [vmem:[%s4033_s1 + $0x2e4] ss:$16 sps:$4 sm:$0xff]   ;;  %v2759_v1 = vld [vmem:[%s4033_s1 + $0x2ec] ss:$16 sps:$4 sm:$0xff]   ;;  %v2761_v2 = vld [vmem:[%s4033_s1 + $0x2e0] ss:$16 sps:$4 sm:$0xff]  }
   0xc   : > { %669 = vmatprep.subr.bf16.mxu0 %v2757_v0  ;;  %v2762_v3 = vld [vmem:[%s4033_s1 + $0x2e8] ss:$16 sps:$4 sm:$0xff]   ;;  %712 = vmatprep.subr.bf16.mxu1 %v2759_v1  ;;  %v2763_v4 = vld [vmem:[%s4033_s1 + $0x2c4] ss:$16 sps:$4 sm:$0xff]   ;;  %v2765_v5 = vld [vmem:[%s4033_s1 + $0x2cc] ss:$16 sps:$4 sm:$0xff]  }
   0xd   : > { %670 = vmatpush1.bf16.msra.mxu0 %v2761_v2  ;;  %713 = vmatpush1.bf16.msra.mxu1 %v2762_v3  ;;  %v2767_v6 = vld [vmem:[%s4033_s1 + $0x2c0] ss:$16 sps:$4 sm:$0xff]   ;;  %v2768_v7 = vld [vmem:[%s4033_s1 + $0x2c8] ss:$16 sps:$4 sm:$0xff]   ;;  %v2769_v8 = vld [vmem:[%s4033_s1 + $0x2a4] ss:$16 sps:$4 sm:$0xff]  }
   0xe   : > { %671 = vmatprep.subr.bf16.mxu0 %v2763_v4  ;;  %714 = vmatprep.subr.bf16.mxu1 %v2765_v5  ;;  %v2771_v9 = vld [vmem:[%s4033_s1 + $0x2ac] ss:$16 sps:$4 sm:$0xff]   ;;  %v2773_v10 = vld [vmem:[%s4033_s1 + $0x2a0] ss:$16 sps:$4 sm:$0xff]   ;;  %v2774_v11 = vld [vmem:[%s4033_s1 + $0x2a8] ss:$16 sps:$4 sm:$0xff]  }
   0xf   : > { %v2775_v12 = vld [vmem:[%s4033_s1 + $0x284] ss:$16 sps:$4 sm:$0xff]   ;;  %v2777_v13 = vld [vmem:[%s4033_s1 + $0x28c] ss:$16 sps:$4 sm:$0xff]   ;;  %v2779_v14 = vld [vmem:[%s4033_s1 + $0x280] ss:$16 sps:$4 sm:$0xff]  }
  0x10   : > { %v2780_v15 = vld [vmem:[%s4033_s1 + $0x288] ss:$16 sps:$4 sm:$0xff]   ;;  %v2781_v16 = vld [vmem:[%s4033_s1 + $0x264] ss:$16 sps:$4 sm:$0xff]   ;;  %v2783_v17 = vld [vmem:[%s4033_s1 + $0x26c] ss:$16 sps:$4 sm:$0xff]  }
  0x11   : > { %672 = vmatpush1.bf16.msra.mxu0 %v2767_v6  ;;  %715 = vmatpush1.bf16.msra.mxu1 %v2768_v7  ;;  %v2785_v18 = vld [vmem:[%s4033_s1 + $0x260] ss:$16 sps:$4 sm:$0xff]   ;;  %v2786_v19 = vld [vmem:[%s4033_s1 + $0x268] ss:$16 sps:$4 sm:$0xff]   ;;  %v2787_v20 = vld [vmem:[%s4033_s1 + $0x244] ss:$16 sps:$4 sm:$0xff]  }
  0x12   : > { %673 = vmatprep.subr.bf16.mxu0 %v2769_v8  ;;  %716 = vmatprep.subr.bf16.mxu1 %v2771_v9  ;;  %v2789_v21 = vld [vmem:[%s4033_s1 + $0x24c] ss:$16 sps:$4 sm:$0xff]   ;;  %v2791_v22 = vld [vmem:[%s4033_s1 + $0x240] ss:$16 sps:$4 sm:$0xff]   ;;  %v2792_v23 = vld [vmem:[%s4033_s1 + $0x248] ss:$16 sps:$4 sm:$0xff]  }
  0x13   : > { %v2793_v24 = vld [vmem:[%s4033_s1 + $0x224] ss:$16 sps:$4 sm:$0xff]   ;;  %v2795_v25 = vld [vmem:[%s4033_s1 + $0x22c] ss:$16 sps:$4 sm:$0xff]   ;;  %v2797_v26 = vld [vmem:[%s4033_s1 + $0x220] ss:$16 sps:$4 sm:$0xff]  }
  0x14   : > { %v2798_v27 = vld [vmem:[%s4033_s1 + $0x228] ss:$16 sps:$4 sm:$0xff]   ;;  %v2799_v28 = vld [vmem:[%s4033_s1 + $0x204] ss:$16 sps:$4 sm:$0xff]   ;;  %v2801_v29 = vld [vmem:[%s4033_s1 + $0x20c] ss:$16 sps:$4 sm:$0xff]  }
  0x15   : > { %674 = vmatpush1.bf16.msra.mxu0 %v2773_v10  ;;  %717 = vmatpush1.bf16.msra.mxu1 %v2774_v11  ;;  %v2803_v30 = vld [vmem:[%s4033_s1 + $0x200] ss:$16 sps:$4 sm:$0xff]   ;;  %v2804_v31 = vld [vmem:[%s4033_s1 + $0x208] ss:$16 sps:$4 sm:$0xff]   ;;  %v2805_v32 = vld [vmem:[%s4033_s1 + $0x3e4] ss:$16 sps:$4 sm:$0xff]  }
  0x16   : > { %675 = vmatprep.subr.bf16.mxu0 %v2775_v12  ;;  %718 = vmatprep.subr.bf16.mxu1 %v2777_v13  ;;  %v2807_v33 = vld [vmem:[%s4033_s1 + $0x3ec] ss:$16 sps:$4 sm:$0xff]   ;;  %v2809_v34 = vld [vmem:[%s4033_s1 + $0x3e0] ss:$16 sps:$4 sm:$0xff]   ;;  %v2810_v35 = vld [vmem:[%s4033_s1 + $0x3e8] ss:$16 sps:$4 sm:$0xff]  }
  0x17   : > { %v2811_v36 = vld [vmem:[%s4033_s1 + $0x3c4] ss:$16 sps:$4 sm:$0xff]   ;;  %s4037_s24 = smov (!%p165_p3, %s2273_s24), 7  ;;  %v2813_v37 = vld [vmem:[%s4033_s1 + $0x3cc] ss:$16 sps:$4 sm:$0xff]   ;;  %vm1240_vm1 = vcmask 1045504  }
  0x18   : > { %v2815_v38 = vld [vmem:[%s4033_s1 + $0x3c0] ss:$16 sps:$4 sm:$0xff]   ;;  %v2816_v39 = vld [vmem:[%s4033_s1 + $0x3c8] ss:$16 sps:$4 sm:$0xff]   ;;  %v2817_v40 = vld [vmem:[%s4033_s1 + $0x3a4] ss:$16 sps:$4 sm:$0xff]  }
  0x19   : > { %676 = vmatpush1.bf16.msra.mxu0 %v2779_v14  ;;  %719 = vmatpush1.bf16.msra.mxu1 %v2780_v15  ;;  %s2741_s21 = sshll.u32 %s4037_s24, 3  ;;  %v2819_v41 = vld [vmem:[%s4033_s1 + $0x3ac] ss:$16 sps:$4 sm:$0xff]   ;;  %v2821_v42 = vld [vmem:[%s4033_s1 + $0x3a0] ss:$16 sps:$4 sm:$0xff]   ;;  %s2277_s18 = sshll.u32 %s4037_s24, 2 }
  0x1a   : > { %677 = vmatprep.subr.bf16.mxu0 %v2781_v16  ;;  %720 = vmatprep.subr.bf16.mxu1 %v2783_v17  ;;  %v2822_v43 = vld [vmem:[%s4033_s1 + $0x3a8] ss:$16 sps:$4 sm:$0xff]   ;;  %s3328_s4 = scalar_lea.vmem %s4032_s0, %s2741_s21  ;;  %v2823_v44 = vld [vmem:[%s4033_s1 + $0x384] ss:$16 sps:$4 sm:$0xff]   ;;  %v2825_v45 = vld [vmem:[%s4033_s1 + $0x38c] ss:$16 sps:$4 sm:$0xff]   ;;  %s175_s21 = scalar_lea.vmem %s4035_s3, %s2277_s18 }
  0x1b   : > { %v2827_v46 = vld [vmem:[%s4033_s1 + $0x380] ss:$16 sps:$4 sm:$0xff]   ;;  %v3341_v48 = vld [vmem:[%s3328_s4 + $0x8] sm:$0xff]  ;;  %v2829_v51 = vld [vmem:[%s4033_s1 + $0x364] ss:$16 sps:$4 sm:$0xff]  }
  0x1c   : > { %v177_v47 = vld [vmem:[%s3328_s4] sm:$0xff]  ;;  %v243_v49 = vld [vmem:[%s3328_s4 + $0x10] sm:$0x11]  ;;  %v2828_v50 = vld [vmem:[%s4033_s1 + $0x388] ss:$16 sps:$4 sm:$0xff]  }
  0x1d   : > { %678 = vmatpush1.bf16.msra.mxu0 %v2785_v18  ;;  %721 = vmatpush1.bf16.msra.mxu1 %v2786_v19  ;;  %v3351_v52 = vcombine.high %v177_v47, %v3341_v48  ;;  %v2345_v53 = vcombine.high %v243_v49, %v243_v49  ;;  %v2831_v54 = vld [vmem:[%s4033_s1 + $0x36c] ss:$16 sps:$4 sm:$0xff]   ;;  %v2833_v58 = vld [vmem:[%s4033_s1 + $0x360] ss:$16 sps:$4 sm:$0xff]   ;;  %v2834_v59 = vld [vmem:[%s4033_s1 + $0x368] ss:$16 sps:$4 sm:$0xff]   ;;  %v3365_v62 = vcombine.low %v177_v47, %v3341_v48 }
  0x1e   : > { %679 = vmatprep.subr.bf16.mxu0 %v2787_v20  ;;  %722 = vmatprep.subr.bf16.mxu1 %v2789_v21  ;;  %v2835_v63 = vld [vmem:[%s4033_s1 + $0x344] ss:$16 sps:$4 sm:$0xff]   ;;  %v2837_v0 = vld [vmem:[%s4033_s1 + $0x34c] ss:$16 sps:$4 sm:$0xff]   ;;  %vm322_vm0 = vsmask.f32 7424  ;;  %v2344_v5 = vcombine.low %v243_v49, %v243_v49 }
  0x1f   : > { %v336_v55 = vshrl.u32 %v3351_v52, 16  ;;  %v338_v56 = vshll.u32 %v3351_v52, 16  ;;  %v343_v57 = vshll.u32 %v2345_v53, 16  ;;  %v2839_v2 = vld [vmem:[%s4033_s1 + $0x340] ss:$16 sps:$4 sm:$0xff]   ;;  %v326_v6 = vshll.u32 %v3365_v62, 16 }
  0x20   : > { %v2840_v3 = vld [vmem:[%s4033_s1 + $0x348] ss:$16 sps:$4 sm:$0xff]   ;;  %v2841_v7 = vld [vmem:[%s4033_s1 + $0x324] ss:$16 sps:$4 sm:$0xff]   ;;  %v2843_v8 = vld [vmem:[%s4033_s1 + $0x32c] ss:$16 sps:$4 sm:$0xff]  }
  0x21   : > { %680 = vmatpush1.bf16.msra.mxu0 %v2791_v22  ;;  %723 = vmatpush1.bf16.msra.mxu1 %v2792_v23  ;;  %v340_v60 = vrot.slane %v338_v56, 1  ;;  %v345_v61 = vrot.slane %v343_v57, 1  ;;  %v2845_v9 = vld [vmem:[%s4033_s1 + $0x320] ss:$16 sps:$4 sm:$0xff]   ;;  %v2846_v10 = vld [vmem:[%s4033_s1 + $0x328] ss:$16 sps:$4 sm:$0xff]  }
  0x22   : > { %681 = vmatprep.subr.bf16.mxu0 %v2793_v24  ;;  %724 = vmatprep.subr.bf16.mxu1 %v2795_v25  ;;  %v324_v11 = vshrl.u32 %v3365_v62, 16  ;;  %v328_v12 = vrot.slane %v326_v6, 1  ;;  %v331_v13 = vshll.u32 %v2344_v5, 16  ;;  %v2847_v14 = vld [vmem:[%s4033_s1 + $0x304] ss:$16 sps:$4 sm:$0xff]  }
  0x23   : > { %v341_v1 = vor.u32 %v340_v60, %v336_v55  ;;  %v2849_v15 = vld [vmem:[%s4033_s1 + $0x30c] ss:$16 sps:$4 sm:$0xff]   ;;  %v2851_v16 = vld [vmem:[%s4033_s1 + $0x300] ss:$16 sps:$4 sm:$0xff]   ;;  %v2852_v17 = vld [vmem:[%s4033_s1 + $0x308] ss:$16 sps:$4 sm:$0xff]  }
  0x24   : > { %v329_v18 = vor.u32 %v328_v12, %v324_v11  ;;  %v333_v19 = vrot.slane %v331_v13, 1  ;;  %v2859_v20 = vld [vmem:[%s4033_s1 + $0xe4] ss:$16 sps:$4 sm:$0xff]   ;;  %v2862_v21 = vld [vmem:[%s4033_s1 + $0xec] ss:$16 sps:$4 sm:$0xff]  }
  0x25   : > { %682 = vmatpush1.bf16.msra.mxu0 %v2797_v26  ;;  %725 = vmatpush1.bf16.msra.mxu1 %v2798_v27  ;;  %v346_v4 = vsel %vm322_vm0, %v341_v1, %v345_v61  ;;  %v2857_v23 = vld [vmem:[%s4033_s1 + $0xe0] ss:$16 sps:$4 sm:$0xff]   ;;  %v2860_v24 = vld [vmem:[%s4033_s1 + $0xe8] ss:$16 sps:$4 sm:$0xff]   ;;  %v2865_v25 = vld [vmem:[%s4033_s1 + $0xc4] ss:$16 sps:$4 sm:$0xff]  }
  0x26   : > { %683 = vmatprep.subr.bf16.mxu0 %v2799_v28  ;;  %726 = vmatprep.subr.bf16.mxu1 %v2801_v29  ;;  %v334_v22 = vsel %vm322_vm0, %v329_v18, %v333_v19  ;;  %v2868_v26 = vld [vmem:[%s4033_s1 + $0xcc] ss:$16 sps:$4 sm:$0xff]   ;;  %v2863_v27 = vld [vmem:[%s4033_s1 + $0xc0] ss:$16 sps:$4 sm:$0xff]   ;;  %v2866_v28 = vld [vmem:[%s4033_s1 + $0xc8] ss:$16 sps:$4 sm:$0xff]  }
  0x27   : > { %701 = vmatprep.mubr.bf16.mxu0 %v346_v4  ;;  %744 = vmatprep.mubr.bf16.mxu1 %v346_v4  ;;  %v2871_v29 = vld [vmem:[%s4033_s1 + $0xa4] ss:$16 sps:$4 sm:$0xff]   ;;  %v2893_v47 = vld [vmem:[%s4033_s1 + $0x20] ss:$16 sps:$4 sm:$0xff]   ;;  %v2896_v49 = vld [vmem:[%s4033_s1 + $0x28] ss:$16 sps:$4 sm:$0xff]  }
  0x28   : > { %v2902_v53 = vld [vmem:[%s4033_s1 + $0x8] ss:$16 sps:$4 sm:$0xff]   ;;  %v2910_v55 = vld [vmem:[%s4033_s1 + $0x1ec] ss:$16 sps:$4 sm:$0xff]   ;;  %v2905_v56 = vld [vmem:[%s4033_s1 + $0x1e0] ss:$16 sps:$4 sm:$0xff]  }
  0x29   : > { %684 = vmatpush1.bf16.msra.mxu0 %v2803_v30  ;;  %727 = vmatpush1.bf16.msra.mxu1 %v2804_v31  ;;  %v2874_v30 = vld [vmem:[%s4033_s1 + $0xac] ss:$16 sps:$4 sm:$0xff]   ;;  %v2869_v31 = vld [vmem:[%s4033_s1 + $0xa0] ss:$16 sps:$4 sm:$0xff]   ;;  %v2908_v57 = vld [vmem:[%s4033_s1 + $0x1e8] ss:$16 sps:$4 sm:$0xff]  }
  0x2a   : > { %685 = vmatprep.subr.bf16.mxu0 %v2805_v32  ;;  %728 = vmatprep.subr.bf16.mxu1 %v2807_v33  ;;  %v2872_v32 = vld [vmem:[%s4033_s1 + $0xa8] ss:$16 sps:$4 sm:$0xff]   ;;  %v2877_v33 = vld [vmem:[%s4033_s1 + $0x84] ss:$16 sps:$4 sm:$0xff]   ;;  %v2911_v60 = vld [vmem:[%s4033_s1 + $0x1c0] ss:$16 sps:$4 sm:$0xff]  }
  0x2b   : > { %v2914_v61 = vld [vmem:[%s4033_s1 + $0x1c8] ss:$16 sps:$4 sm:$0xff]   ;;  %v2917_v1 = vld [vmem:[%s4033_s1 + $0x1a0] ss:$16 sps:$4 sm:$0xff]   ;;  %v2928_v4 = vld [vmem:[%s4033_s1 + $0x18c] ss:$16 sps:$4 sm:$0xff]  }
  0x2c   : > { %v2923_v5 = vld [vmem:[%s4033_s1 + $0x180] ss:$16 sps:$4 sm:$0xff]   ;;  %v2926_v6 = vld [vmem:[%s4033_s1 + $0x188] ss:$16 sps:$4 sm:$0xff]   ;;  %v2937_v11 = vld [vmem:[%s4033_s1 + $0x144] ss:$16 sps:$4 sm:$0xff]  }
  0x2d   : > { %686 = vmatpush2.bf16.msra.mxu0 %v2809_v34  ;;  %729 = vmatpush2.bf16.msra.mxu1 %v2810_v35  ;;  %v2880_v34 = vld [vmem:[%s4033_s1 + $0x8c] ss:$16 sps:$4 sm:$0xff]   ;;  %v2875_v35 = vld [vmem:[%s4033_s1 + $0x80] ss:$16 sps:$4 sm:$0xff]   ;;  %v2944_v18 = vld [vmem:[%s4033_s1 + $0x128] ss:$16 sps:$4 sm:$0xff]  }
  0x2e   : > { %687 = vmatprep.subr.bf16.mxu0 %v2811_v36  ;;  %730 = vmatprep.subr.bf16.mxu1 %v2813_v37  ;;  %v2878_v36 = vld [vmem:[%s4033_s1 + $0x88] ss:$16 sps:$4 sm:$0xff]   ;;  %v2883_v37 = vld [vmem:[%s4033_s1 + $0x64] ss:$16 sps:$4 sm:$0xff]   ;;  %v2940_v12 = vld [vmem:[%s4033_s1 + $0x14c] ss:$16 sps:$4 sm:$0xff]  }
  0x2f   : > { %v2935_v13 = vld [vmem:[%s4033_s1 + $0x140] ss:$16 sps:$4 sm:$0xff]   ;;  %v2949_v19 = vld [vmem:[%s4033_s1 + $0x104] ss:$16 sps:$4 sm:$0xff]   ;;  %vm1734_vm2 = vsmask.f32 5376 }
  0x31   : > { %688 = vmatpush2.bf16.msra.mxu0 %v2815_v38  ;;  %731 = vmatpush2.bf16.msra.mxu1 %v2816_v39  ;;  %v2886_v38 = vld [vmem:[%s4033_s1 + $0x6c] ss:$16 sps:$4 sm:$0xff]   ;;  %v2881_v39 = vld [vmem:[%s4033_s1 + $0x60] ss:$16 sps:$4 sm:$0xff]  }
  0x32   : > { %689 = vmatprep.subr.bf16.mxu0 %v2817_v40  ;;  %732 = vmatprep.subr.bf16.mxu1 %v2819_v41  ;;  %v2884_v40 = vld [vmem:[%s4033_s1 + $0x68] ss:$16 sps:$4 sm:$0xff]   ;;  %v2889_v41 = vld [vmem:[%s4033_s1 + $0x44] ss:$16 sps:$4 sm:$0xff]  }
  0x35   : > { %690 = vmatpush2.bf16.msra.mxu0 %v2821_v42  ;;  %733 = vmatpush2.bf16.msra.mxu1 %v2822_v43  ;;  %v2892_v42 = vld [vmem:[%s4033_s1 + $0x4c] ss:$16 sps:$4 sm:$0xff]   ;;  %v2887_v43 = vld [vmem:[%s4033_s1 + $0x40] ss:$16 sps:$4 sm:$0xff]  }
  0x36   : > { %691 = vmatprep.subr.bf16.mxu0 %v2823_v44  ;;  %734 = vmatprep.subr.bf16.mxu1 %v2825_v45  ;;  %v2890_v44 = vld [vmem:[%s4033_s1 + $0x48] ss:$16 sps:$4 sm:$0xff]   ;;  %v2895_v45 = vld [vmem:[%s4033_s1 + $0x24] ss:$16 sps:$4 sm:$0xff]  }
  0x39   : > { %692 = vmatpush2.bf16.msra.mxu0 %v2827_v46  ;;  %735 = vmatpush2.bf16.msra.mxu1 %v2828_v50  ;;  %v2898_v46 = vld [vmem:[%s4033_s1 + $0x2c] ss:$16 sps:$4 sm:$0xff]   ;;  %v2901_v50 = vld [vmem:[%s4033_s1 + $0x4] ss:$16 sps:$4 sm:$0xff]  }
  0x3a   : > { %693 = vmatprep.subr.bf16.mxu0 %v2829_v51  ;;  %736 = vmatprep.subr.bf16.mxu1 %v2831_v54  ;;  %v2904_v51 = vld [vmem:[%s4033_s1 + $0xc] ss:$16 sps:$4 sm:$0xff]   ;;  %v2907_v54 = vld [vmem:[%s4033_s1 + $0x1e4] ss:$16 sps:$4 sm:$0xff]  }
  0x3d   : > { %694 = vmatpush2.bf16.msra.mxu0 %v2833_v58  ;;  %737 = vmatpush2.bf16.msra.mxu1 %v2834_v59  ;;  %v2913_v58 = vld [vmem:[%s4033_s1 + $0x1c4] ss:$16 sps:$4 sm:$0xff]   ;;  %v2916_v59 = vld [vmem:[%s4033_s1 + $0x1cc] ss:$16 sps:$4 sm:$0xff]  }
  0x3e   : > { %695 = vmatprep.subr.bf16.mxu0 %v2835_v63  ;;  %738 = vmatprep.subr.bf16.mxu1 %v2837_v0  ;;  %v2919_v63 = vld [vmem:[%s4033_s1 + $0x1a4] ss:$16 sps:$4 sm:$0xff]   ;;  %v2922_v0 = vld [vmem:[%s4033_s1 + $0x1ac] ss:$16 sps:$4 sm:$0xff]  }
  0x41   : > { %696 = vmatpush2.bf16.msra.mxu0 %v2839_v2  ;;  %739 = vmatpush2.bf16.msra.mxu1 %v2840_v3  ;;  %v2920_v2 = vld [vmem:[%s4033_s1 + $0x1a8] ss:$16 sps:$4 sm:$0xff]   ;;  %v2925_v3 = vld [vmem:[%s4033_s1 + $0x184] ss:$16 sps:$4 sm:$0xff]  }
  0x42   : > { %697 = vmatprep.subr.bf16.mxu0 %v2841_v7  ;;  %740 = vmatprep.subr.bf16.mxu1 %v2843_v8  ;;  %v2931_v7 = vld [vmem:[%s4033_s1 + $0x164] ss:$16 sps:$4 sm:$0xff]   ;;  %v2934_v8 = vld [vmem:[%s4033_s1 + $0x16c] ss:$16 sps:$4 sm:$0xff]  }
  0x45   : > { %698 = vmatpush2.bf16.msra.mxu0 %v2845_v9  ;;  %741 = vmatpush2.bf16.msra.mxu1 %v2846_v10  ;;  %v2929_v9 = vld [vmem:[%s4033_s1 + $0x160] ss:$16 sps:$4 sm:$0xff]   ;;  %v2932_v10 = vld [vmem:[%s4033_s1 + $0x168] ss:$16 sps:$4 sm:$0xff]  }
  0x46   : > { %699 = vmatprep.subr.bf16.mxu0 %v2847_v14  ;;  %742 = vmatprep.subr.bf16.mxu1 %v2849_v15  ;;  %v2938_v14 = vld [vmem:[%s4033_s1 + $0x148] ss:$16 sps:$4 sm:$0xff]   ;;  %v2943_v15 = vld [vmem:[%s4033_s1 + $0x124] ss:$16 sps:$4 sm:$0xff]  }
  0x49   : > { %700 = vmatpush2.bf16.msra.mxu0 %v2851_v16  ;;  %743 = vmatpush2.bf16.msra.mxu1 %v2852_v17  ;;  %v2946_v16 = vld [vmem:[%s4033_s1 + $0x12c] ss:$16 sps:$4 sm:$0xff]   ;;  %v2941_v17 = vld [vmem:[%s4033_s1 + $0x120] ss:$16 sps:$4 sm:$0xff]  }
  0x4a   : > { %1077 = vmatprep.subr.bf16.mxu0 %v2859_v20  ;;  %1120 = vmatprep.subr.bf16.mxu1 %v2862_v21  ;;  %v2952_v20 = vld [vmem:[%s4033_s1 + $0x10c] ss:$16 sps:$4 sm:$0xff]   ;;  %v2947_v21 = vld [vmem:[%s4033_s1 + $0x100] ss:$16 sps:$4 sm:$0xff]  }
  0x4c   : > { %702 = vmatmul.mubr.bf16.vlgmr.msra.gmra.mxu0 %v334_v22  ;;  %745 = vmatmul.mubr.bf16.vlgmr.msra.gmra.mxu1 %v334_v22  ;;  %v2950_v22 = vld [vmem:[%s4033_s1 + $0x108] ss:$16 sps:$4 sm:$0xff]  }
  0x4d   : > { %1078 = vmatpush1.bf16.msra.mxu0 %v2857_v23  ;;  %1121 = vmatpush1.bf16.msra.mxu1 %v2860_v24  ;;  %v2955_v23 = vld [vmem:[%s4033_s1 + $0x4e4] ss:$16 sps:$4 sm:$0xff]   ;;  %v2958_v24 = vld [vmem:[%s4033_s1 + $0x4ec] ss:$16 sps:$4 sm:$0xff]  }
  0x4e   : > { %1079 = vmatprep.subr.bf16.mxu0 %v2865_v25  ;;  %1122 = vmatprep.subr.bf16.mxu1 %v2868_v26  ;;  %v2953_v25 = vld [vmem:[%s4033_s1 + $0x4e0] ss:$16 sps:$4 sm:$0xff]   ;;  %v2956_v26 = vld [vmem:[%s4033_s1 + $0x4e8] ss:$16 sps:$4 sm:$0xff]  }
  0x4f   : > { %1109 = vmatprep.mubr.bf16.mxu0 %v3351_v52  ;;  %1152 = vmatprep.mubr.bf16.mxu1 %v3351_v52  ;;  %v2899_v52 = vld [vmem:[%s4033_s1] ss:$16 sps:$4 sm:$0xff]  }
  0x51   : > { %1080 = vmatpush1.bf16.msra.mxu0 %v2863_v27  ;;  %1123 = vmatpush1.bf16.msra.mxu1 %v2866_v28  ;;  %v2961_v27 = vld [vmem:[%s4033_s1 + $0x4c4] ss:$16 sps:$4 sm:$0xff]   ;;  %v2964_v28 = vld [vmem:[%s4033_s1 + $0x4cc] ss:$16 sps:$4 sm:$0xff]  }
  0x52   : > { %1081 = vmatprep.subr.bf16.mxu0 %v2871_v29  ;;  %1124 = vmatprep.subr.bf16.mxu1 %v2874_v30  ;;  %v3620_v29 = vld [vmem:[%s3328_s4] sm:$0xcc]  ;;  %v3623_v30 = vld [vmem:[%s3328_s4 + $0x10] sm:$0x33] }
  0x55   : > { %1082 = vmatpush1.bf16.msra.mxu0 %v2869_v31  ;;  %1125 = vmatpush1.bf16.msra.mxu1 %v2872_v32  ;;  %v2959_v31 = vld [vmem:[%s4033_s1 + $0x4c0] ss:$16 sps:$4 sm:$0xff]   ;;  %v2962_v32 = vld [vmem:[%s4033_s1 + $0x4c8] ss:$16 sps:$4 sm:$0xff]  }
  0x56   : > { %1083 = vmatprep.subr.bf16.mxu0 %v2877_v33  ;;  %1126 = vmatprep.subr.bf16.mxu1 %v2880_v34  ;;  %v3635_v33 = vcombine.high %v3620_v29, %v3341_v48  ;;  %v2541_v34 = vcombine.high %v3623_v30, %v3623_v30 }
  0x58   : > { %v1245_v48 = vrot.slane %v2541_v34, 2  ;;  %v3040_v34 = vld [vmem:[%s4033_s1 + $0x528] ss:$16 sps:$4 sm:$0xff]  }
  0x59   : > { %1084 = vmatpush1.bf16.msra.mxu0 %v2875_v35  ;;  %1127 = vmatpush1.bf16.msra.mxu1 %v2878_v36  ;;  %v2970_v35 = vld [vmem:[%s4033_s1 + $0x4ac] ss:$16 sps:$4 sm:$0xff]   ;;  %v1244_v36 = vrot.slane %v3635_v33, 2 }
  0x5a   : > { %1085 = vmatprep.subr.bf16.mxu0 %v2883_v37  ;;  %1128 = vmatprep.subr.bf16.mxu1 %v2886_v38  ;;  %v2965_v37 = vld [vmem:[%s4033_s1 + $0x4a0] ss:$16 sps:$4 sm:$0xff]  }
  0x5b   : > { %v1246_v38 = vsel %vm1240_vm1, %v1244_v36, %v1245_v48  ;;  %v2540_v36 = vcombine.low %v3623_v30, %v3623_v30  ;;  %v3048_v48 = vld [vmem:[%s4033_s1 + $0x50c] ss:$16 sps:$4 sm:$0xff]   ;;  %v3046_v30 = vld [vmem:[%s4033_s1 + $0x508] ss:$16 sps:$4 sm:$0xff]  }
  0x5d   : > { %1086 = vmatpush1.bf16.msra.mxu0 %v2881_v39  ;;  %1129 = vmatpush1.bf16.msra.mxu1 %v2884_v40  ;;  %v2968_v39 = vld [vmem:[%s4033_s1 + $0x4a8] ss:$16 sps:$4 sm:$0xff]   ;;  %v2973_v40 = vld [vmem:[%s4033_s1 + $0x484] ss:$16 sps:$4 sm:$0xff]  }
  0x5e   : > { %1087 = vmatprep.subr.bf16.mxu0 %v2889_v41  ;;  %1130 = vmatprep.subr.bf16.mxu1 %v2892_v42  ;;  %v2976_v41 = vld [vmem:[%s4033_s1 + $0x48c] ss:$16 sps:$4 sm:$0xff]   ;;  %v2971_v42 = vld [vmem:[%s4033_s1 + $0x480] ss:$16 sps:$4 sm:$0xff]  }
  0x61   : > { %1088 = vmatpush1.bf16.msra.mxu0 %v2887_v43  ;;  %1131 = vmatpush1.bf16.msra.mxu1 %v2890_v44  ;;  %v2974_v43 = vld [vmem:[%s4033_s1 + $0x488] ss:$16 sps:$4 sm:$0xff]   ;;  %v2979_v44 = vld [vmem:[%s4033_s1 + $0x464] ss:$16 sps:$4 sm:$0xff]  }
  0x62   : > { %1089 = vmatprep.subr.bf16.mxu0 %v2895_v45  ;;  %1132 = vmatprep.subr.bf16.mxu1 %v2898_v46  ;;  %v2982_v45 = vld [vmem:[%s4033_s1 + $0x46c] ss:$16 sps:$4 sm:$0xff]   ;;  %v2977_v46 = vld [vmem:[%s4033_s1 + $0x460] ss:$16 sps:$4 sm:$0xff]  }
  0x65   : > { %1090 = vmatpush1.bf16.msra.mxu0 %v2893_v47  ;;  %1133 = vmatpush1.bf16.msra.mxu1 %v2896_v49  ;;  %v2980_v47 = vld [vmem:[%s4033_s1 + $0x468] ss:$16 sps:$4 sm:$0xff]   ;;  %v2985_v49 = vld [vmem:[%s4033_s1 + $0x444] ss:$16 sps:$4 sm:$0xff]  }
  0x66   : > { %1091 = vmatprep.subr.bf16.mxu0 %v2901_v50  ;;  %1134 = vmatprep.subr.bf16.mxu1 %v2904_v51  ;;  %v2988_v50 = vld [vmem:[%s4033_s1 + $0x44c] ss:$16 sps:$4 sm:$0xff]   ;;  %v2983_v51 = vld [vmem:[%s4033_s1 + $0x440] ss:$16 sps:$4 sm:$0xff]  }
  0x69   : > { %1092 = vmatpush1.bf16.msra.mxu0 %v2899_v52  ;;  %1135 = vmatpush1.bf16.msra.mxu1 %v2902_v53  ;;  %v2986_v52 = vld [vmem:[%s4033_s1 + $0x448] ss:$16 sps:$4 sm:$0xff]   ;;  %v2991_v53 = vld [vmem:[%s4033_s1 + $0x424] ss:$16 sps:$4 sm:$0xff]  }
  0x6a   : > { %1093 = vmatprep.subr.bf16.mxu0 %v2907_v54  ;;  %1136 = vmatprep.subr.bf16.mxu1 %v2910_v55  ;;  %v2994_v54 = vld [vmem:[%s4033_s1 + $0x42c] ss:$16 sps:$4 sm:$0xff]   ;;  %v2989_v55 = vld [vmem:[%s4033_s1 + $0x420] ss:$16 sps:$4 sm:$0xff]  }
  0x6d   : > { %1094 = vmatpush2.bf16.msra.mxu0 %v2905_v56  ;;  %1137 = vmatpush2.bf16.msra.mxu1 %v2908_v57  ;;  %v2992_v56 = vld [vmem:[%s4033_s1 + $0x428] ss:$16 sps:$4 sm:$0xff]   ;;  %v2997_v57 = vld [vmem:[%s4033_s1 + $0x404] ss:$16 sps:$4 sm:$0xff]  }
  0x6e   : > { %1095 = vmatprep.subr.bf16.mxu0 %v2913_v58  ;;  %1138 = vmatprep.subr.bf16.mxu1 %v2916_v59  ;;  %v3000_v58 = vld [vmem:[%s4033_s1 + $0x40c] ss:$16 sps:$4 sm:$0xff]   ;;  %v2995_v59 = vld [vmem:[%s4033_s1 + $0x400] ss:$16 sps:$4 sm:$0xff]  }
  0x71   : > { %1096 = vmatpush2.bf16.msra.mxu0 %v2911_v60  ;;  %1139 = vmatpush2.bf16.msra.mxu1 %v2914_v61  ;;  %v2998_v60 = vld [vmem:[%s4033_s1 + $0x408] ss:$16 sps:$4 sm:$0xff]   ;;  %v3003_v61 = vld [vmem:[%s4033_s1 + $0x5e4] ss:$16 sps:$4 sm:$0xff]  }
  0x72   : > { %1097 = vmatprep.subr.bf16.mxu0 %v2919_v63  ;;  %1140 = vmatprep.subr.bf16.mxu1 %v2922_v0  ;;  %v3006_v63 = vld [vmem:[%s4033_s1 + $0x5ec] ss:$16 sps:$4 sm:$0xff]   ;;  %v3001_v0 = vld [vmem:[%s4033_s1 + $0x5e0] ss:$16 sps:$4 sm:$0xff]  }
  0x75   : > { %1098 = vmatpush2.bf16.msra.mxu0 %v2917_v1  ;;  %1141 = vmatpush2.bf16.msra.mxu1 %v2920_v2  ;;  %v3004_v1 = vld [vmem:[%s4033_s1 + $0x5e8] ss:$16 sps:$4 sm:$0xff]   ;;  %v3009_v2 = vld [vmem:[%s4033_s1 + $0x5c4] ss:$16 sps:$4 sm:$0xff]  }
  0x76   : > { %1099 = vmatprep.subr.bf16.mxu0 %v2925_v3  ;;  %1142 = vmatprep.subr.bf16.mxu1 %v2928_v4  ;;  %v3012_v3 = vld [vmem:[%s4033_s1 + $0x5cc] ss:$16 sps:$4 sm:$0xff]   ;;  %v3007_v4 = vld [vmem:[%s4033_s1 + $0x5c0] ss:$16 sps:$4 sm:$0xff]  }
  0x79   : > { %1100 = vmatpush2.bf16.msra.mxu0 %v2923_v5  ;;  %1143 = vmatpush2.bf16.msra.mxu1 %v2926_v6  ;;  %v3010_v5 = vld [vmem:[%s4033_s1 + $0x5c8] ss:$16 sps:$4 sm:$0xff]   ;;  %v3015_v6 = vld [vmem:[%s4033_s1 + $0x5a4] ss:$16 sps:$4 sm:$0xff]  }
  0x7a   : > { %1101 = vmatprep.subr.bf16.mxu0 %v2931_v7  ;;  %1144 = vmatprep.subr.bf16.mxu1 %v2934_v8  ;;  %v3018_v7 = vld [vmem:[%s4033_s1 + $0x5ac] ss:$16 sps:$4 sm:$0xff]   ;;  %v3013_v8 = vld [vmem:[%s4033_s1 + $0x5a0] ss:$16 sps:$4 sm:$0xff]  }
  0x7d   : > { %1102 = vmatpush2.bf16.msra.mxu0 %v2929_v9  ;;  %1145 = vmatpush2.bf16.msra.mxu1 %v2932_v10  ;;  %v3016_v9 = vld [vmem:[%s4033_s1 + $0x5a8] ss:$16 sps:$4 sm:$0xff]   ;;  %v3021_v10 = vld [vmem:[%s4033_s1 + $0x584] ss:$16 sps:$4 sm:$0xff]  }
  0x7e   : > { %1103 = vmatprep.subr.bf16.mxu0 %v2937_v11  ;;  %1146 = vmatprep.subr.bf16.mxu1 %v2940_v12  ;;  %v3024_v11 = vld [vmem:[%s4033_s1 + $0x58c] ss:$16 sps:$4 sm:$0xff]   ;;  %v3019_v12 = vld [vmem:[%s4033_s1 + $0x580] ss:$16 sps:$4 sm:$0xff]  }
  0x81   : > { %1104 = vmatpush2.bf16.msra.mxu0 %v2935_v13  ;;  %1147 = vmatpush2.bf16.msra.mxu1 %v2938_v14  ;;  %v3022_v13 = vld [vmem:[%s4033_s1 + $0x588] ss:$16 sps:$4 sm:$0xff]   ;;  %v3027_v14 = vld [vmem:[%s4033_s1 + $0x564] ss:$16 sps:$4 sm:$0xff]  }
  0x82   : > { %1105 = vmatprep.subr.bf16.mxu0 %v2943_v15  ;;  %1148 = vmatprep.subr.bf16.mxu1 %v2946_v16  ;;  %v3030_v15 = vld [vmem:[%s4033_s1 + $0x56c] ss:$16 sps:$4 sm:$0xff]   ;;  %v3025_v16 = vld [vmem:[%s4033_s1 + $0x560] ss:$16 sps:$4 sm:$0xff]  }
  0x85   : > { %1106 = vmatpush2.bf16.msra.mxu0 %v2941_v17  ;;  %1149 = vmatpush2.bf16.msra.mxu1 %v2944_v18  ;;  %v3028_v17 = vld [vmem:[%s4033_s1 + $0x568] ss:$16 sps:$4 sm:$0xff]   ;;  %v3774_v18 = vld [vmem:[%s3328_s4 + $0x10] sm:$0x77] }
  0x86   : > { %1107 = vmatprep.subr.bf16.mxu0 %v2949_v19  ;;  %1150 = vmatprep.subr.bf16.mxu1 %v2952_v20  ;;  %v3033_v19 = vld [vmem:[%s4033_s1 + $0x544] ss:$16 sps:$4 sm:$0xff]   ;;  %v3036_v20 = vld [vmem:[%s4033_s1 + $0x54c] ss:$16 sps:$4 sm:$0xff]  }
  0x89   : > { %1108 = vmatpush2.bf16.msra.mxu0 %v2947_v21  ;;  %1151 = vmatpush2.bf16.msra.mxu1 %v2950_v22  ;;  %v2671_v21 = vcombine.high %v3774_v18, %v3774_v18  ;;  %v3031_v22 = vld [vmem:[%s4033_s1 + $0x540] ss:$16 sps:$4 sm:$0xff]  }
  0x8a   : > { %1569 = vmatprep.subr.bf16.mxu0 %v2955_v23  ;;  %1612 = vmatprep.subr.bf16.mxu1 %v2958_v24  ;;  %v3034_v23 = vld [vmem:[%s4033_s1 + $0x548] ss:$16 sps:$4 sm:$0xff]   ;;  %v3039_v24 = vld [vmem:[%s4033_s1 + $0x524] ss:$16 sps:$4 sm:$0xff]  }
  0x8c   : > { %1110 = vmatmul.mubr.bf16.vlgmr.msra.gmra.mxu0 %v3365_v62  ;;  %1153 = vmatmul.mubr.bf16.vlgmr.msra.gmra.mxu1 %v3365_v62  ;;  %v2967_v62 = vld [vmem:[%s4033_s1 + $0x4a4] ss:$16 sps:$4 sm:$0xff]  }
  0x8d   : > { %1570 = vmatpush1.bf16.msra.mxu0 %v2953_v25  ;;  %1613 = vmatpush1.bf16.msra.mxu1 %v2956_v26  ;;  %v3042_v25 = vld [vmem:[%s4033_s1 + $0x52c] ss:$16 sps:$4 sm:$0xff]   ;;  %v1753_v26 = vshrl.u32 %v3635_v33, 16 }
  0x8e   : > { %1571 = vmatprep.subr.bf16.mxu0 %v2961_v27  ;;  %1614 = vmatprep.subr.bf16.mxu1 %v2964_v28  ;;  %v1756_v27 = vshll.u32 %v3635_v33, 16  ;;  %v1761_v28 = vshrl.u32 %v2671_v21, 16  ;;  %v3045_v33 = vld [vmem:[%s4033_s1 + $0x504] ss:$16 sps:$4 sm:$0xff]  }
  0x8f   : > { %1601 = vmatprep.mubr.bf16.mxu0 %v1246_v38  ;;  %1644 = vmatprep.mubr.bf16.mxu1 %v1246_v38 }
  0x90   : > { %v1758_v38 = vrot.slane %v1756_v27, 3  ;;  %v3118_v27 = vld [vmem:[%s4033_s1 + $0x7ac] ss:$16 sps:$4 sm:$0xff]  }
  0x91   : > { %1572 = vmatpush1.bf16.msra.mxu0 %v2959_v31  ;;  %1615 = vmatpush1.bf16.msra.mxu1 %v2962_v32  ;;  %v1764_v31 = vshll.u32 %v2671_v21, 16  ;;  %v3037_v32 = vld [vmem:[%s4033_s1 + $0x520] ss:$16 sps:$4 sm:$0xff]   ;;  %v3104_v21 = vld [vmem:[%s4033_s1 + $0x7e8] ss:$16 sps:$4 sm:$0xff]  }
  0x92   : > { %1573 = vmatprep.subr.bf16.mxu0 %v2967_v62  ;;  %1616 = vmatprep.subr.bf16.mxu1 %v2970_v35  ;;  %v3151_v62 = vld [vmem:[%s3328_s4 + $0x8] sm:$0xff] }
  0x93   : > { %v3806_v35 = vcombine.low %v3620_v29, %v3151_v62  ;;  %v3043_v29 = vld [vmem:[%s4033_s1 + $0x500] ss:$16 sps:$4 sm:$0xff]  }
  0x94   : > { %v3119_v62 = vld [vmem:[%s4033_s1 + $0x780] ss:$16 sps:$4 sm:$0xff]  }
  0x95   : > { %1574 = vmatpush1.bf16.msra.mxu0 %v2965_v37  ;;  %1617 = vmatpush1.bf16.msra.mxu1 %v2968_v39  ;;  %v1755_v37 = vrot.slane %v1753_v26, 2  ;;  %v1763_v39 = vrot.slane %v1761_v28, 2  ;;  %v3115_v26 = vld [vmem:[%s4033_s1 + $0x7a4] ss:$16 sps:$4 sm:$0xff]   ;;  %v3113_v28 = vld [vmem:[%s4033_s1 + $0x7a0] ss:$16 sps:$4 sm:$0xff]  }
  0x96   : > { %1575 = vmatprep.subr.bf16.mxu0 %v2973_v40  ;;  %1618 = vmatprep.subr.bf16.mxu1 %v2976_v41  ;;  %v1766_v40 = vrot.slane %v1764_v31, 3  ;;  %v1241_v41 = vrot.slane %v3806_v35, 2  ;;  %v3116_v31 = vld [vmem:[%s4033_s1 + $0x7a8] ss:$16 sps:$4 sm:$0xff]  }
  0x99   : > { %1576 = vmatpush1.bf16.msra.mxu0 %v2971_v42  ;;  %1619 = vmatpush1.bf16.msra.mxu1 %v2974_v43  ;;  %v1242_v42 = vrot.slane %v2540_v36, 2  ;;  %v3055_v43 = vld [vmem:[%s4033_s1 + $0x6e4] ss:$16 sps:$4 sm:$0xff]   ;;  %v3122_v36 = vld [vmem:[%s4033_s1 + $0x788] ss:$16 sps:$4 sm:$0xff]  }
  0x9a   : > { %1577 = vmatprep.subr.bf16.mxu0 %v2979_v44  ;;  %1620 = vmatprep.subr.bf16.mxu1 %v2982_v45  ;;  %v3058_v44 = vld [vmem:[%s4033_s1 + $0x6ec] ss:$16 sps:$4 sm:$0xff]   ;;  %v1759_v45 = vor.u32 %v1758_v38, %v1755_v37  ;;  %v3125_v37 = vld [vmem:[%s4033_s1 + $0x760] ss:$16 sps:$4 sm:$0xff]   ;;  %v3128_v38 = vld [vmem:[%s4033_s1 + $0x768] ss:$16 sps:$4 sm:$0xff]  }
  0x9d   : > { %1578 = vmatpush1.bf16.msra.mxu0 %v2977_v46  ;;  %1621 = vmatpush1.bf16.msra.mxu1 %v2980_v47  ;;  %v1767_v46 = vor.u32 %v1766_v40, %v1763_v39  ;;  %v1243_v47 = vsel %vm1240_vm1, %v1241_v41, %v1242_v42  ;;  %v2670_v39 = vcombine.low %v3774_v18, %v3774_v18  ;;  %v3133_v40 = vld [vmem:[%s4033_s1 + $0x744] ss:$16 sps:$4 sm:$0xff]   ;;  %v1739_v41 = vshll.u32 %v3806_v35, 16  ;;  %v3131_v18 = vld [vmem:[%s4033_s1 + $0x740] ss:$16 sps:$4 sm:$0xff]  }
  0x9e   : > { %1579 = vmatprep.subr.bf16.mxu0 %v2985_v49  ;;  %1622 = vmatprep.subr.bf16.mxu1 %v2988_v50  ;;  %v3053_v49 = vld [vmem:[%s4033_s1 + $0x6e0] ss:$16 sps:$4 sm:$0xff]   ;;  %v3056_v50 = vld [vmem:[%s4033_s1 + $0x6e8] ss:$16 sps:$4 sm:$0xff]  }
  0x9f   : > { %v3134_v42 = vld [vmem:[%s4033_s1 + $0x748] ss:$16 sps:$4 sm:$0xff]  }
  0xa1   : > { %1580 = vmatpush1.bf16.msra.mxu0 %v2983_v51  ;;  %1623 = vmatpush1.bf16.msra.mxu1 %v2986_v52  ;;  %v3061_v51 = vld [vmem:[%s4033_s1 + $0x6c4] ss:$16 sps:$4 sm:$0xff]   ;;  %v3064_v52 = vld [vmem:[%s4033_s1 + $0x6cc] ss:$16 sps:$4 sm:$0xff]  }
  0xa2   : > { %1581 = vmatprep.subr.bf16.mxu0 %v2991_v53  ;;  %1624 = vmatprep.subr.bf16.mxu1 %v2994_v54  ;;  %v1768_v53 = vsel %vm1734_vm2, %v1759_v45, %v1767_v46  ;;  %v3059_v54 = vld [vmem:[%s4033_s1 + $0x6c0] ss:$16 sps:$4 sm:$0xff]   ;;  %v3139_v45 = vld [vmem:[%s4033_s1 + $0x724] ss:$16 sps:$4 sm:$0xff]  }
  0xa5   : > { %1582 = vmatpush1.bf16.msra.mxu0 %v2989_v55  ;;  %1625 = vmatpush1.bf16.msra.mxu1 %v2992_v56  ;;  %v3062_v55 = vld [vmem:[%s4033_s1 + $0x6c8] ss:$16 sps:$4 sm:$0xff]   ;;  %v3067_v56 = vld [vmem:[%s4033_s1 + $0x6a4] ss:$16 sps:$4 sm:$0xff]  }
  0xa6   : > { %1583 = vmatprep.subr.bf16.mxu0 %v2997_v57  ;;  %1626 = vmatprep.subr.bf16.mxu1 %v3000_v58  ;;  %v3070_v57 = vld [vmem:[%s4033_s1 + $0x6ac] ss:$16 sps:$4 sm:$0xff]   ;;  %v3065_v58 = vld [vmem:[%s4033_s1 + $0x6a0] ss:$16 sps:$4 sm:$0xff]  }
  0xa9   : > { %1584 = vmatpush1.bf16.msra.mxu0 %v2995_v59  ;;  %1627 = vmatpush1.bf16.msra.mxu1 %v2998_v60  ;;  %v3068_v59 = vld [vmem:[%s4033_s1 + $0x6a8] ss:$16 sps:$4 sm:$0xff]   ;;  %v3073_v60 = vld [vmem:[%s4033_s1 + $0x684] ss:$16 sps:$4 sm:$0xff]  }
  0xaa   : > { %1585 = vmatprep.subr.bf16.mxu0 %v3003_v61  ;;  %1628 = vmatprep.subr.bf16.mxu1 %v3006_v63  ;;  %v3076_v61 = vld [vmem:[%s4033_s1 + $0x68c] ss:$16 sps:$4 sm:$0xff]   ;;  %v3071_v63 = vld [vmem:[%s4033_s1 + $0x680] ss:$16 sps:$4 sm:$0xff]  }
  0xad   : > { %1586 = vmatpush2.bf16.msra.mxu0 %v3001_v0  ;;  %1629 = vmatpush2.bf16.msra.mxu1 %v3004_v1  ;;  %v3074_v0 = vld [vmem:[%s4033_s1 + $0x688] ss:$16 sps:$4 sm:$0xff]   ;;  %v3079_v1 = vld [vmem:[%s4033_s1 + $0x664] ss:$16 sps:$4 sm:$0xff]  }
  0xae   : > { %1587 = vmatprep.subr.bf16.mxu0 %v3009_v2  ;;  %1630 = vmatprep.subr.bf16.mxu1 %v3012_v3  ;;  %v3082_v2 = vld [vmem:[%s4033_s1 + $0x66c] ss:$16 sps:$4 sm:$0xff]   ;;  %v3077_v3 = vld [vmem:[%s4033_s1 + $0x660] ss:$16 sps:$4 sm:$0xff]  }
  0xb1   : > { %1588 = vmatpush2.bf16.msra.mxu0 %v3007_v4  ;;  %1631 = vmatpush2.bf16.msra.mxu1 %v3010_v5  ;;  %v3080_v4 = vld [vmem:[%s4033_s1 + $0x668] ss:$16 sps:$4 sm:$0xff]   ;;  %v3085_v5 = vld [vmem:[%s4033_s1 + $0x644] ss:$16 sps:$4 sm:$0xff]  }
  0xb2   : > { %1589 = vmatprep.subr.bf16.mxu0 %v3015_v6  ;;  %1632 = vmatprep.subr.bf16.mxu1 %v3018_v7  ;;  %v3088_v6 = vld [vmem:[%s4033_s1 + $0x64c] ss:$16 sps:$4 sm:$0xff]   ;;  %v3083_v7 = vld [vmem:[%s4033_s1 + $0x640] ss:$16 sps:$4 sm:$0xff]  }
  0xb5   : > { %1590 = vmatpush2.bf16.msra.mxu0 %v3013_v8  ;;  %1633 = vmatpush2.bf16.msra.mxu1 %v3016_v9  ;;  %v3086_v8 = vld [vmem:[%s4033_s1 + $0x648] ss:$16 sps:$4 sm:$0xff]   ;;  %v3091_v9 = vld [vmem:[%s4033_s1 + $0x624] ss:$16 sps:$4 sm:$0xff]  }
  0xb6   : > { %1591 = vmatprep.subr.bf16.mxu0 %v3021_v10  ;;  %1634 = vmatprep.subr.bf16.mxu1 %v3024_v11  ;;  %v3094_v10 = vld [vmem:[%s4033_s1 + $0x62c] ss:$16 sps:$4 sm:$0xff]   ;;  %v3089_v11 = vld [vmem:[%s4033_s1 + $0x620] ss:$16 sps:$4 sm:$0xff]  }
  0xb9   : > { %1592 = vmatpush2.bf16.msra.mxu0 %v3019_v12  ;;  %1635 = vmatpush2.bf16.msra.mxu1 %v3022_v13  ;;  %v3092_v12 = vld [vmem:[%s4033_s1 + $0x628] ss:$16 sps:$4 sm:$0xff]   ;;  %v3097_v13 = vld [vmem:[%s4033_s1 + $0x604] ss:$16 sps:$4 sm:$0xff]  }
  0xba   : > { %1593 = vmatprep.subr.bf16.mxu0 %v3027_v14  ;;  %1636 = vmatprep.subr.bf16.mxu1 %v3030_v15  ;;  %v3100_v14 = vld [vmem:[%s4033_s1 + $0x60c] ss:$16 sps:$4 sm:$0xff]   ;;  %v3095_v15 = vld [vmem:[%s4033_s1 + $0x600] ss:$16 sps:$4 sm:$0xff]  }
  0xbd   : > { %1594 = vmatpush2.bf16.msra.mxu0 %v3025_v16  ;;  %1637 = vmatpush2.bf16.msra.mxu1 %v3028_v17  ;;  %v3098_v16 = vld [vmem:[%s4033_s1 + $0x608] ss:$16 sps:$4 sm:$0xff]   ;;  %v3103_v17 = vld [vmem:[%s4033_s1 + $0x7e4] ss:$16 sps:$4 sm:$0xff]  }
  0xbe   : > { %1595 = vmatprep.subr.bf16.mxu0 %v3033_v19  ;;  %1638 = vmatprep.subr.bf16.mxu1 %v3036_v20  ;;  %v3106_v19 = vld [vmem:[%s4033_s1 + $0x7ec] ss:$16 sps:$4 sm:$0xff]   ;;  %v3101_v20 = vld [vmem:[%s4033_s1 + $0x7e0] ss:$16 sps:$4 sm:$0xff]  }
  0xc1   : > { %1596 = vmatpush2.bf16.msra.mxu0 %v3031_v22  ;;  %1639 = vmatpush2.bf16.msra.mxu1 %v3034_v23  ;;  %v3109_v22 = vld [vmem:[%s4033_s1 + $0x7c4] ss:$16 sps:$4 sm:$0xff]   ;;  %v3112_v23 = vld [vmem:[%s4033_s1 + $0x7cc] ss:$16 sps:$4 sm:$0xff]  }
  0xc2   : > { %1597 = vmatprep.subr.bf16.mxu0 %v3039_v24  ;;  %1640 = vmatprep.subr.bf16.mxu1 %v3042_v25  ;;  %v3107_v24 = vld [vmem:[%s4033_s1 + $0x7c0] ss:$16 sps:$4 sm:$0xff]   ;;  %v3110_v25 = vld [vmem:[%s4033_s1 + $0x7c8] ss:$16 sps:$4 sm:$0xff]  }
  0xc5   : > { %1598 = vmatpush2.bf16.msra.mxu0 %v3037_v32  ;;  %1641 = vmatpush2.bf16.msra.mxu1 %v3040_v34  ;;  %v3121_v32 = vld [vmem:[%s4033_s1 + $0x784] ss:$16 sps:$4 sm:$0xff]   ;;  %v3124_v34 = vld [vmem:[%s4033_s1 + $0x78c] ss:$16 sps:$4 sm:$0xff]  }
  0xc6   : > { %1599 = vmatprep.subr.bf16.mxu0 %v3045_v33  ;;  %1642 = vmatprep.subr.bf16.mxu1 %v3048_v48  ;;  %v3127_v33 = vld [vmem:[%s4033_s1 + $0x764] ss:$16 sps:$4 sm:$0xff]   ;;  %v3130_v48 = vld [vmem:[%s4033_s1 + $0x76c] ss:$16 sps:$4 sm:$0xff]  }
  0xc9   : > { %1600 = vmatpush2.bf16.msra.mxu0 %v3043_v29  ;;  %1643 = vmatpush2.bf16.msra.mxu1 %v3046_v30  ;;  %v3136_v29 = vld [vmem:[%s4033_s1 + $0x74c] ss:$16 sps:$4 sm:$0xff]   ;;  %v1736_v30 = vshrl.u32 %v3806_v35, 16 }
  0xca   : > { %2091 = vmatprep.subr.bf16.mxu0 %v3055_v43  ;;  %2134 = vmatprep.subr.bf16.mxu1 %v3058_v44  ;;  %v1744_v43 = vshrl.u32 %v2670_v39, 16  ;;  %v1747_v44 = vshll.u32 %v2670_v39, 16  ;;  %v3142_v35 = vld [vmem:[%s4033_s1 + $0x72c] ss:$16 sps:$4 sm:$0xff]  }
  0xcb   : > { %v1738_v46 = vrot.slane %v1736_v30, 2 }
  0xcc   : > { %1602 = vmatmul.mubr.bf16.vlgmr.msra.gmra.mxu0 %v1243_v47  ;;  %1645 = vmatmul.mubr.bf16.vlgmr.msra.gmra.mxu1 %v1243_v47  ;;  %v1741_v47 = vrot.slane %v1739_v41, 3 }
  0xcd   : > { %2092 = vmatpush1.bf16.msra.mxu0 %v3053_v49  ;;  %2135 = vmatpush1.bf16.msra.mxu1 %v3056_v50  ;;  %v3137_v49 = vld [vmem:[%s4033_s1 + $0x720] ss:$16 sps:$4 sm:$0xff]   ;;  %v3140_v50 = vld [vmem:[%s4033_s1 + $0x728] ss:$16 sps:$4 sm:$0xff]  }
  0xce   : > { %2093 = vmatprep.subr.bf16.mxu0 %v3061_v51  ;;  %2136 = vmatprep.subr.bf16.mxu1 %v3064_v52  ;;  %v1746_v51 = vrot.slane %v1744_v43, 2  ;;  %v1749_v52 = vrot.slane %v1747_v44, 3 }
  0xcf   : > { %2123 = vmatprep.mubr.bf16.mxu0 %v1768_v53  ;;  %2166 = vmatprep.mubr.bf16.mxu1 %v1768_v53  ;;  %v3145_v53 = vld [vmem:[%s4033_s1 + $0x704] ss:$16 sps:$4 sm:$0xff]  }
  0xd1   : > { %2094 = vmatpush1.bf16.msra.mxu0 %v3059_v54  ;;  %2137 = vmatpush1.bf16.msra.mxu1 %v3062_v55  ;;  %v3148_v54 = vld [vmem:[%s4033_s1 + $0x70c] ss:$16 sps:$4 sm:$0xff]   ;;  %v3143_v55 = vld [vmem:[%s4033_s1 + $0x700] ss:$16 sps:$4 sm:$0xff]  }
  0xd2   : > { %2095 = vmatprep.subr.bf16.mxu0 %v3067_v56  ;;  %2138 = vmatprep.subr.bf16.mxu1 %v3070_v57  ;;  %v3146_v56 = vld [vmem:[%s4033_s1 + $0x708] ss:$16 sps:$4 sm:$0xff]   ;;  %v1742_v57 = vor.u32 %v1741_v47, %v1738_v46 }
  0xd5   : > { %2096 = vmatpush1.bf16.msra.mxu0 %v3065_v58  ;;  %2139 = vmatpush1.bf16.msra.mxu1 %v3068_v59  ;;  %v1750_v58 = vor.u32 %v1749_v52, %v1746_v51 }
  0xd6   : > { %2097 = vmatprep.subr.bf16.mxu0 %v3073_v60  ;;  %2140 = vmatprep.subr.bf16.mxu1 %v3076_v61 }
  0xd7   : > { %v1751_v59 = vsel %vm1734_vm2, %v1742_v57, %v1750_v58 }
  0xd9   : > { %2098 = vmatpush1.bf16.msra.mxu0 %v3071_v63  ;;  %2141 = vmatpush1.bf16.msra.mxu1 %v3074_v0 }
  0xda   : > { %2099 = vmatprep.subr.bf16.mxu0 %v3079_v1  ;;  %2142 = vmatprep.subr.bf16.mxu1 %v3082_v2 }
  0xdd   : > { %2100 = vmatpush1.bf16.msra.mxu0 %v3077_v3  ;;  %2143 = vmatpush1.bf16.msra.mxu1 %v3080_v4 }
  0xde   : > { %2101 = vmatprep.subr.bf16.mxu0 %v3085_v5  ;;  %2144 = vmatprep.subr.bf16.mxu1 %v3088_v6 }
  0xe1   : > { %2102 = vmatpush1.bf16.msra.mxu0 %v3083_v7  ;;  %2145 = vmatpush1.bf16.msra.mxu1 %v3086_v8 }
  0xe2   : > { %2103 = vmatprep.subr.bf16.mxu0 %v3091_v9  ;;  %2146 = vmatprep.subr.bf16.mxu1 %v3094_v10 }
  0xe5   : > { %2104 = vmatpush1.bf16.msra.mxu0 %v3089_v11  ;;  %2147 = vmatpush1.bf16.msra.mxu1 %v3092_v12 }
  0xe6   : > { %2105 = vmatprep.subr.bf16.mxu0 %v3097_v13  ;;  %2148 = vmatprep.subr.bf16.mxu1 %v3100_v14 }
  0xe9   : > { %2106 = vmatpush1.bf16.msra.mxu0 %v3095_v15  ;;  %2149 = vmatpush1.bf16.msra.mxu1 %v3098_v16 }
  0xea   : > { %2107 = vmatprep.subr.bf16.mxu0 %v3103_v17  ;;  %2150 = vmatprep.subr.bf16.mxu1 %v3106_v19 }
  0xed   : > { %2108 = vmatpush2.bf16.msra.mxu0 %v3101_v20  ;;  %2151 = vmatpush2.bf16.msra.mxu1 %v3104_v21 }
  0xee   : > { %2109 = vmatprep.subr.bf16.mxu0 %v3109_v22  ;;  %2152 = vmatprep.subr.bf16.mxu1 %v3112_v23 }
  0xf1   : > { %2110 = vmatpush2.bf16.msra.mxu0 %v3107_v24  ;;  %2153 = vmatpush2.bf16.msra.mxu1 %v3110_v25 }
  0xf2   : > { %2111 = vmatprep.subr.bf16.mxu0 %v3115_v26  ;;  %2154 = vmatprep.subr.bf16.mxu1 %v3118_v27 }
  0xf5   : > { %2112 = vmatpush2.bf16.msra.mxu0 %v3113_v28  ;;  %2155 = vmatpush2.bf16.msra.mxu1 %v3116_v31 }
  0xf6   : > { %2113 = vmatprep.subr.bf16.mxu0 %v3121_v32  ;;  %2156 = vmatprep.subr.bf16.mxu1 %v3124_v34 }
  0xf9   : > { %2114 = vmatpush2.bf16.msra.mxu0 %v3119_v62  ;;  %2157 = vmatpush2.bf16.msra.mxu1 %v3122_v36 }
  0xfa   : > { %2115 = vmatprep.subr.bf16.mxu0 %v3127_v33  ;;  %2158 = vmatprep.subr.bf16.mxu1 %v3130_v48 }
  0xfd   : > { %2116 = vmatpush2.bf16.msra.mxu0 %v3125_v37  ;;  %2159 = vmatpush2.bf16.msra.mxu1 %v3128_v38 }
  0xfe   : > { %2117 = vmatprep.subr.bf16.mxu0 %v3133_v40  ;;  %2160 = vmatprep.subr.bf16.mxu1 %v3136_v29 }
 0x101   : > { %2118 = vmatpush2.bf16.msra.mxu0 %v3131_v18  ;;  %2161 = vmatpush2.bf16.msra.mxu1 %v3134_v42 }
 0x102   : > { %2119 = vmatprep.subr.bf16.mxu0 %v3139_v45  ;;  %2162 = vmatprep.subr.bf16.mxu1 %v3142_v35 }
 0x105   : > { %2120 = vmatpush2.bf16.msra.mxu0 %v3137_v49  ;;  %2163 = vmatpush2.bf16.msra.mxu1 %v3140_v50 }
 0x106   : > { %2121 = vmatprep.subr.bf16.mxu0 %v3145_v53  ;;  %2164 = vmatprep.subr.bf16.mxu1 %v3148_v54 }
 0x109   : > { %2122 = vmatpush2.bf16.msra.mxu0 %v3143_v55  ;;  %2165 = vmatpush2.bf16.msra.mxu1 %v3146_v56  ;;  %v2736_v55 = vld [vmem:[%s4034_s2] ss:$0 sm:$0xff] }
 0x10c   : > { %2124 = vmatmul.mubr.bf16.vlgmr.msra.gmra.mxu0 %v1751_v59  ;;  %2167 = vmatmul.mubr.bf16.vlgmr.msra.gmra.mxu1 %v1751_v59  ;;  %v703_v60 = vpop.f32.mrf.mxu0  ;;  %v746_v61 = vpop.f32.mrf.mxu1 }
 0x10e   : > { %v705_v63 = vpop.f32.mrf.mxu0  ;;  %v748_v0 = vpop.f32.mrf.mxu1 }
 0x110   : > { %v707_v1 = vpop.f32.mrf.mxu0  ;;  %v750_v2 = vpop.f32.mrf.mxu1 }
 0x112   : > { %v709_v3 = vpop.f32.mrf.mxu0  ;;  %v752_v4 = vpop.f32.mrf.mxu1 }
 0x14c   : > { %v1111_v5 = vpop.f32.mrf.mxu0  ;;  %v1154_v6 = vpop.f32.mrf.mxu1 }
 0x14d   : > { %v1112_v22 = vadd.f32 %v1111_v5, %v703_v60  ;;  %v1155_v23 = vadd.f32 %v1154_v6, %v746_v61 }
 0x14e   : > { %v1113_v7 = vpop.f32.mrf.mxu0  ;;  %v1156_v8 = vpop.f32.mrf.mxu1 }
 0x14f   : > { %v1114_v24 = vadd.f32 %v1113_v7, %v705_v63  ;;  %v1157_v25 = vadd.f32 %v1156_v8, %v748_v0 }
 0x150   : > { %v1115_v9 = vpop.f32.mrf.mxu0  ;;  %v1158_v10 = vpop.f32.mrf.mxu1 }
 0x151   : > { %v1116_v62 = vadd.f32 %v1115_v9, %v707_v1  ;;  %v1159_v36 = vadd.f32 %v1158_v10, %v750_v2 }
 0x152   : > { %v1117_v11 = vpop.f32.mrf.mxu0  ;;  %v1160_v12 = vpop.f32.mrf.mxu1 }
 0x153   : > { %v1118_v33 = vadd.f32 %v1117_v11, %v709_v3  ;;  %v1161_v48 = vadd.f32 %v1160_v12, %v752_v4 }
 0x18c   : > { %v1603_v13 = vpop.f32.mrf.mxu0  ;;  %v1646_v14 = vpop.f32.mrf.mxu1 }
 0x18d   : > { %v1655_v28 = vadd.f32 %v1603_v13, %v1112_v22  ;;  %v1657_v31 = vadd.f32 %v1646_v14, %v1155_v23 }
 0x18e   : > { %v1605_v15 = vpop.f32.mrf.mxu0  ;;  %v1648_v16 = vpop.f32.mrf.mxu1 }
 0x18f   : > { %v1656_v32 = vadd.f32 %v1605_v15, %v1114_v24  ;;  %v1658_v34 = vadd.f32 %v1648_v16, %v1157_v25 }
 0x190   : > { %v1607_v17 = vpop.f32.mrf.mxu0  ;;  %v1650_v19 = vpop.f32.mrf.mxu1 }
 0x191   : > { %v1659_v41 = vadd.f32 %v1607_v17, %v1116_v62  ;;  %v1661_v18 = vadd.f32 %v1650_v19, %v1159_v36 }
 0x192   : > { %v1609_v20 = vpop.f32.mrf.mxu0  ;;  %v1652_v21 = vpop.f32.mrf.mxu1 }
 0x193   : > { %v1660_v44 = vadd.f32 %v1609_v20, %v1118_v33  ;;  %v1662_v45 = vadd.f32 %v1652_v21, %v1161_v48 }
 0x1cc   : > { %v2125_v26 = vpop.f32.mrf.mxu0  ;;  %v2168_v27 = vpop.f32.mrf.mxu1 }
 0x1cd   : > { %v2177_v39 = vadd.f32 %v2125_v26, %v1655_v28  ;;  %v2179_v40 = vadd.f32 %v2168_v27, %v1657_v31 }
 0x1ce   : > { %v2127_v37 = vpop.f32.mrf.mxu0  ;;  %v2170_v38 = vpop.f32.mrf.mxu1 }
 0x1cf   : > { %v2178_v29 = vadd.f32 %v2127_v37, %v1656_v32  ;;  %v2180_v30 = vadd.f32 %v2170_v38, %v1658_v34 }
 0x1d0   : > { %v2129_v42 = vpop.f32.mrf.mxu0  ;;  %v2172_v43 = vpop.f32.mrf.mxu1 }
 0x1d1   : > { %v2185_v35 = vmax.f32 %v2177_v39, %v2178_v29  ;;  %v2187_v46 = vmax.f32 %v2179_v40, %v2180_v30  ;;  %v2181_v47 = vadd.f32 %v2129_v42, %v1659_v41  ;;  %v2183_v52 = vadd.f32 %v2172_v43, %v1661_v18 }
 0x1d2   : > { %v2131_v49 = vpop.f32.mrf.mxu0  ;;  %v2174_v50 = vpop.f32.mrf.mxu1 }
 0x1d3   : > { %v2189_v51 = vmax.f32 %v2185_v35, %v2187_v46  ;;  %v2182_v53 = vadd.f32 %v2131_v49, %v1660_v44  ;;  %v2184_v54 = vadd.f32 %v2174_v50, %v1662_v45 }
 0x1d5   : > { %v2186_v56 = vmax.f32 %v2181_v47, %v2182_v53  ;;  %v2188_v57 = vmax.f32 %v2183_v52, %v2184_v54  ;;  %v2198_v58 = vadd.f32 %v2736_v55, %v2189_v51 }
 0x1d7   : > { %v2190_v59 = vmax.f32 %v2186_v56, %v2188_v57  ;;  %v2200_v61 = vmax.f32 %v2198_v58, 0.0 }
 0x1d9   : > { %v2199_v60 = vadd.f32 %v2736_v55, %v2190_v59 }
 0x1db   : > { %v2201_v63 = vmax.f32 %v2199_v60, 0.0 }
 0x1dd   : > { %v2747_v0 = vpack.c.bf16 %v2201_v63, %v2200_v61 }
 0x1df   : > { %2748 = vst [vmem:[%s175_s21] sm:$0xff] %v2747_v0  }
 0x1e0 PF: > { %s13_s12 = sadd.s32 1, %s3158_s12  }
 0x1e1   : > { %p10_p4 = scmp.ge.s32.totalorder %s13_s12, 4  }
 0x1e3   :  { %12 = sbr.rel (!%p10_p4) target bundleno = 1 (0x1), region = 65 }

// kernel: cnn8_forward.7
= control target key start
LH: loop header
LB: loop body
LE: loop exit
PB: predicated region body
PF: predicated region fallthrough
CT: control target
= control target key end

     0   :  { %s4505_s1 = inlined_call_operand.vmem [shape: bf16[1152,512], index: 1, kind: input, shape index: {}]   ;;  %s4506_s0 = inlined_call_operand.vmem [shape: bf16[8,1152], index: 0, kind: input, shape index: {}]   ;;  %s4507_s3 = inlined_call_operand.vmem [shape: bf16[512,128], index: 3, kind: input, shape index: {}]   ;;  %s4508_s2 = inlined_call_operand.vmem [shape: f32[1,512], index: 2, kind: input, shape index: {}]   ;;  %s4509_s4 = inlined_call_operand.vmem [shape: f32[1,128], index: 4, kind: input, shape index: {}]   ;;  %s4510_s5 = inlined_call_operand.vmem [shape: f32[8,128], index: 5, kind: output, shape index: {}]  }
   0x1   :  { %v2949_v0 = vld [vmem:[%s4505_s1 + $0xe4] ss:$16 sps:$4 sm:$0xff]   ;;  %v2953_v2 = vld [vmem:[%s4505_s1 + $0xe0] ss:$16 sps:$4 sm:$0xff]   ;;  %v22_v48 = vld [vmem:[%s4506_s0 + $0x8] sm:$0xff] }
   0x2   :  { %v2951_v1 = vld [vmem:[%s4505_s1 + $0x2e4] ss:$16 sps:$4 sm:$0xff]   ;;  %1808 = vmatprep.subr.bf16.mxu0 %v2949_v0  ;;  %v2954_v3 = vld [vmem:[%s4505_s1 + $0x2e0] ss:$16 sps:$4 sm:$0xff]   ;;  %v3605_v51 = vcombine.high %v22_v48, %v22_v48 }
   0x3   :  { %1849 = vmatprep.subr.bf16.mxu1 %v2951_v1  ;;  %v2955_v4 = vld [vmem:[%s4505_s1 + $0xc4] ss:$16 sps:$4 sm:$0xff]   ;;  %1809 = vmatpush1.bf16.msra.mxu0 %v2953_v2  ;;  %v2959_v6 = vld [vmem:[%s4505_s1 + $0xc0] ss:$16 sps:$4 sm:$0xff]  }
   0x4   :  { %1850 = vmatpush1.bf16.msra.mxu1 %v2954_v3  ;;  %v2957_v5 = vld [vmem:[%s4505_s1 + $0x2c4] ss:$16 sps:$4 sm:$0xff]   ;;  %1810 = vmatprep.subr.bf16.mxu0 %v2955_v4  ;;  %v2960_v7 = vld [vmem:[%s4505_s1 + $0x2c0] ss:$16 sps:$4 sm:$0xff]  }
   0x5   :  { %1851 = vmatprep.subr.bf16.mxu1 %v2957_v5  ;;  %v2961_v8 = vld [vmem:[%s4505_s1 + $0xa4] ss:$16 sps:$4 sm:$0xff]   ;;  %v2965_v10 = vld [vmem:[%s4505_s1 + $0xa0] ss:$16 sps:$4 sm:$0xff]   ;;  %1881 = vmatprep.mubr.bf16.mxu1 %v3605_v51 }
   0x6   :  { %v2963_v9 = vld [vmem:[%s4505_s1 + $0x2a4] ss:$16 sps:$4 sm:$0xff]   ;;  %v2966_v11 = vld [vmem:[%s4505_s1 + $0x2a0] ss:$16 sps:$4 sm:$0xff]  }
   0x7   :  { %1811 = vmatpush1.bf16.msra.mxu0 %v2959_v6  ;;  %v2967_v12 = vld [vmem:[%s4505_s1 + $0x84] ss:$16 sps:$4 sm:$0xff]   ;;  %v2971_v14 = vld [vmem:[%s4505_s1 + $0x80] ss:$16 sps:$4 sm:$0xff]  }
   0x8   :  { %1852 = vmatpush1.bf16.msra.mxu1 %v2960_v7  ;;  %1812 = vmatprep.subr.bf16.mxu0 %v2961_v8  ;;  %v2969_v13 = vld [vmem:[%s4505_s1 + $0x284] ss:$16 sps:$4 sm:$0xff]   ;;  %v2972_v15 = vld [vmem:[%s4505_s1 + $0x280] ss:$16 sps:$4 sm:$0xff]   ;;  %v3665_v7 = vcombine.low %v22_v48, %v22_v48 }
   0x9   :  { %1853 = vmatprep.subr.bf16.mxu1 %v2963_v9  ;;  %v2973_v16 = vld [vmem:[%s4505_s1 + $0x64] ss:$16 sps:$4 sm:$0xff]   ;;  %v2977_v18 = vld [vmem:[%s4505_s1 + $0x60] ss:$16 sps:$4 sm:$0xff]  }
   0xa   :  { %v2975_v17 = vld [vmem:[%s4505_s1 + $0x264] ss:$16 sps:$4 sm:$0xff]   ;;  %v2978_v19 = vld [vmem:[%s4505_s1 + $0x260] ss:$16 sps:$4 sm:$0xff]  }
   0xb   :  { %1813 = vmatpush1.bf16.msra.mxu0 %v2965_v10  ;;  %v2979_v20 = vld [vmem:[%s4505_s1 + $0x44] ss:$16 sps:$4 sm:$0xff]   ;;  %v2983_v22 = vld [vmem:[%s4505_s1 + $0x40] ss:$16 sps:$4 sm:$0xff]  }
   0xc   :  { %1854 = vmatpush1.bf16.msra.mxu1 %v2966_v11  ;;  %1814 = vmatprep.subr.bf16.mxu0 %v2967_v12  ;;  %v2981_v21 = vld [vmem:[%s4505_s1 + $0x244] ss:$16 sps:$4 sm:$0xff]   ;;  %v2984_v23 = vld [vmem:[%s4505_s1 + $0x240] ss:$16 sps:$4 sm:$0xff]  }
   0xd   :  { %1855 = vmatprep.subr.bf16.mxu1 %v2969_v13  ;;  %v2985_v24 = vld [vmem:[%s4505_s1 + $0x24] ss:$16 sps:$4 sm:$0xff]   ;;  %v2989_v26 = vld [vmem:[%s4505_s1 + $0x20] ss:$16 sps:$4 sm:$0xff]  }
   0xe   :  { %v2987_v25 = vld [vmem:[%s4505_s1 + $0x224] ss:$16 sps:$4 sm:$0xff]   ;;  %v2990_v27 = vld [vmem:[%s4505_s1 + $0x220] ss:$16 sps:$4 sm:$0xff]  }
   0xf   :  { %1815 = vmatpush1.bf16.msra.mxu0 %v2971_v14  ;;  %v2991_v28 = vld [vmem:[%s4505_s1 + $0x4] ss:$16 sps:$4 sm:$0xff]   ;;  %v2995_v30 = vld [vmem:[%s4505_s1] ss:$16 sps:$4 sm:$0xff]  }
  0x10   :  { %1856 = vmatpush1.bf16.msra.mxu1 %v2972_v15  ;;  %1816 = vmatprep.subr.bf16.mxu0 %v2973_v16  ;;  %v2993_v29 = vld [vmem:[%s4505_s1 + $0x204] ss:$16 sps:$4 sm:$0xff]   ;;  %v2996_v31 = vld [vmem:[%s4505_s1 + $0x200] ss:$16 sps:$4 sm:$0xff]  }
  0x11   :  { %1857 = vmatprep.subr.bf16.mxu1 %v2975_v17  ;;  %v2997_v32 = vld [vmem:[%s4505_s1 + $0x1e4] ss:$16 sps:$4 sm:$0xff]   ;;  %v3001_v34 = vld [vmem:[%s4505_s1 + $0x1e0] ss:$16 sps:$4 sm:$0xff]  }
  0x12   :  { %v2999_v33 = vld [vmem:[%s4505_s1 + $0x3e4] ss:$16 sps:$4 sm:$0xff]   ;;  %v3002_v35 = vld [vmem:[%s4505_s1 + $0x3e0] ss:$16 sps:$4 sm:$0xff]  }
  0x13   :  { %1817 = vmatpush1.bf16.msra.mxu0 %v2977_v18  ;;  %v3003_v36 = vld [vmem:[%s4505_s1 + $0x1c4] ss:$16 sps:$4 sm:$0xff]   ;;  %v3007_v38 = vld [vmem:[%s4505_s1 + $0x1c0] ss:$16 sps:$4 sm:$0xff]  }
  0x14   :  { %1858 = vmatpush1.bf16.msra.mxu1 %v2978_v19  ;;  %1818 = vmatprep.subr.bf16.mxu0 %v2979_v20  ;;  %v3005_v37 = vld [vmem:[%s4505_s1 + $0x3c4] ss:$16 sps:$4 sm:$0xff]   ;;  %v3008_v39 = vld [vmem:[%s4505_s1 + $0x3c0] ss:$16 sps:$4 sm:$0xff]  }
  0x15   :  { %1859 = vmatprep.subr.bf16.mxu1 %v2981_v21  ;;  %v3009_v40 = vld [vmem:[%s4505_s1 + $0x1a4] ss:$16 sps:$4 sm:$0xff]   ;;  %v3013_v42 = vld [vmem:[%s4505_s1 + $0x1a0] ss:$16 sps:$4 sm:$0xff]  }
  0x16   :  { %v3011_v41 = vld [vmem:[%s4505_s1 + $0x3a4] ss:$16 sps:$4 sm:$0xff]   ;;  %v3014_v43 = vld [vmem:[%s4505_s1 + $0x3a0] ss:$16 sps:$4 sm:$0xff]  }
  0x17   :  { %1819 = vmatpush1.bf16.msra.mxu0 %v2983_v22  ;;  %v3015_v44 = vld [vmem:[%s4505_s1 + $0x184] ss:$16 sps:$4 sm:$0xff]   ;;  %v3019_v49 = vld [vmem:[%s4505_s1 + $0x180] ss:$16 sps:$4 sm:$0xff]  }
  0x18   :  { %1860 = vmatpush1.bf16.msra.mxu1 %v2984_v23  ;;  %1820 = vmatprep.subr.bf16.mxu0 %v2985_v24  ;;  %v3017_v45 = vld [vmem:[%s4505_s1 + $0x384] ss:$16 sps:$4 sm:$0xff]   ;;  %v3020_v50 = vld [vmem:[%s4505_s1 + $0x380] ss:$16 sps:$4 sm:$0xff]  }
  0x19   :  { %1861 = vmatprep.subr.bf16.mxu1 %v2987_v25  ;;  %v21_v46 = vld [vmem:[%s4506_s0] sm:$0xff] }
  0x1a   :  { %v3594_v47 = vcombine.high %v21_v46, %v21_v46  ;;  %v3021_v52 = vld [vmem:[%s4505_s1 + $0x164] ss:$16 sps:$4 sm:$0xff]   ;;  %v3025_v54 = vld [vmem:[%s4505_s1 + $0x160] ss:$16 sps:$4 sm:$0xff]   ;;  %v3663_v6 = vcombine.low %v21_v46, %v21_v46 }
  0x1b   :  { %1821 = vmatpush1.bf16.msra.mxu0 %v2989_v26  ;;  %v3023_v53 = vld [vmem:[%s4505_s1 + $0x364] ss:$16 sps:$4 sm:$0xff]   ;;  %v3026_v55 = vld [vmem:[%s4505_s1 + $0x360] ss:$16 sps:$4 sm:$0xff]  }
  0x1c   :  { %1862 = vmatpush1.bf16.msra.mxu1 %v2990_v27  ;;  %1822 = vmatprep.subr.bf16.mxu0 %v2991_v28  ;;  %v3027_v56 = vld [vmem:[%s4505_s1 + $0x144] ss:$16 sps:$4 sm:$0xff]   ;;  %v3031_v58 = vld [vmem:[%s4505_s1 + $0x140] ss:$16 sps:$4 sm:$0xff]  }
  0x1d   :  { %1863 = vmatprep.subr.bf16.mxu1 %v2993_v29  ;;  %1840 = vmatprep.mubr.bf16.mxu0 %v3594_v47  ;;  %v3029_v57 = vld [vmem:[%s4505_s1 + $0x344] ss:$16 sps:$4 sm:$0xff]   ;;  %v3032_v59 = vld [vmem:[%s4505_s1 + $0x340] ss:$16 sps:$4 sm:$0xff]  }
  0x1e   :  { %v3033_v60 = vld [vmem:[%s4505_s1 + $0x124] ss:$16 sps:$4 sm:$0xff]   ;;  %v3037_v62 = vld [vmem:[%s4505_s1 + $0x120] ss:$16 sps:$4 sm:$0xff]  }
  0x1f   :  { %1823 = vmatpush1.bf16.msra.mxu0 %v2995_v30  ;;  %v3035_v61 = vld [vmem:[%s4505_s1 + $0x324] ss:$16 sps:$4 sm:$0xff]   ;;  %v3038_v63 = vld [vmem:[%s4505_s1 + $0x320] ss:$16 sps:$4 sm:$0xff]  }
  0x20   :  { %1864 = vmatpush1.bf16.msra.mxu1 %v2996_v31  ;;  %1824 = vmatprep.subr.bf16.mxu0 %v2997_v32  ;;  %v3039_v0 = vld [vmem:[%s4505_s1 + $0x104] ss:$16 sps:$4 sm:$0xff]   ;;  %v3043_v2 = vld [vmem:[%s4505_s1 + $0x100] ss:$16 sps:$4 sm:$0xff]  }
  0x21   :  { %1865 = vmatprep.subr.bf16.mxu1 %v2999_v33  ;;  %v3041_v1 = vld [vmem:[%s4505_s1 + $0x304] ss:$16 sps:$4 sm:$0xff]   ;;  %v3044_v3 = vld [vmem:[%s4505_s1 + $0x300] ss:$16 sps:$4 sm:$0xff]   ;;  %v3749_v33 = vld [vmem:[%s4506_s0 + $0x18] sm:$0xff] }
  0x22   :  { %v3051_v4 = vld [vmem:[%s4505_s1 + $0x4e4] ss:$16 sps:$4 sm:$0xff]   ;;  %v3049_v8 = vld [vmem:[%s4505_s1 + $0x4e0] ss:$16 sps:$4 sm:$0xff]  }
  0x23   :  { %1825 = vmatpush2.bf16.msra.mxu0 %v3001_v34  ;;  %v3054_v5 = vld [vmem:[%s4505_s1 + $0x6e4] ss:$16 sps:$4 sm:$0xff]   ;;  %v3052_v9 = vld [vmem:[%s4505_s1 + $0x6e0] ss:$16 sps:$4 sm:$0xff]  }
  0x24   :  { %1866 = vmatpush2.bf16.msra.mxu1 %v3002_v35  ;;  %1826 = vmatprep.subr.bf16.mxu0 %v3003_v36  ;;  %v3057_v10 = vld [vmem:[%s4505_s1 + $0x4c4] ss:$16 sps:$4 sm:$0xff]   ;;  %v3055_v12 = vld [vmem:[%s4505_s1 + $0x4c0] ss:$16 sps:$4 sm:$0xff]  }
  0x25   :  { %1867 = vmatprep.subr.bf16.mxu1 %v3005_v37  ;;  %v3060_v11 = vld [vmem:[%s4505_s1 + $0x6c4] ss:$16 sps:$4 sm:$0xff]   ;;  %v3058_v13 = vld [vmem:[%s4505_s1 + $0x6c0] ss:$16 sps:$4 sm:$0xff]   ;;  %v3763_v37 = vcombine.high %v3749_v33, %v3749_v33 }
  0x26   :  { %v3063_v14 = vld [vmem:[%s4505_s1 + $0x4a4] ss:$16 sps:$4 sm:$0xff]   ;;  %v3061_v16 = vld [vmem:[%s4505_s1 + $0x4a0] ss:$16 sps:$4 sm:$0xff]  }
  0x27   :  { %1827 = vmatpush2.bf16.msra.mxu0 %v3007_v38  ;;  %v3066_v15 = vld [vmem:[%s4505_s1 + $0x6a4] ss:$16 sps:$4 sm:$0xff]   ;;  %v3064_v17 = vld [vmem:[%s4505_s1 + $0x6a0] ss:$16 sps:$4 sm:$0xff]  }
  0x28   :  { %1868 = vmatpush2.bf16.msra.mxu1 %v3008_v39  ;;  %1828 = vmatprep.subr.bf16.mxu0 %v3009_v40  ;;  %v3069_v18 = vld [vmem:[%s4505_s1 + $0x484] ss:$16 sps:$4 sm:$0xff]   ;;  %v3067_v20 = vld [vmem:[%s4505_s1 + $0x480] ss:$16 sps:$4 sm:$0xff]  }
  0x29   :  { %1869 = vmatprep.subr.bf16.mxu1 %v3011_v41  ;;  %v3072_v19 = vld [vmem:[%s4505_s1 + $0x684] ss:$16 sps:$4 sm:$0xff]   ;;  %v3070_v21 = vld [vmem:[%s4505_s1 + $0x680] ss:$16 sps:$4 sm:$0xff]  }
  0x2a   :  { %v3075_v22 = vld [vmem:[%s4505_s1 + $0x464] ss:$16 sps:$4 sm:$0xff]   ;;  %v3073_v24 = vld [vmem:[%s4505_s1 + $0x460] ss:$16 sps:$4 sm:$0xff]  }
  0x2b   :  { %1829 = vmatpush2.bf16.msra.mxu0 %v3013_v42  ;;  %v3078_v23 = vld [vmem:[%s4505_s1 + $0x664] ss:$16 sps:$4 sm:$0xff]   ;;  %v3076_v25 = vld [vmem:[%s4505_s1 + $0x660] ss:$16 sps:$4 sm:$0xff]  }
  0x2c   :  { %1870 = vmatpush2.bf16.msra.mxu1 %v3014_v43  ;;  %1830 = vmatprep.subr.bf16.mxu0 %v3015_v44  ;;  %v3081_v26 = vld [vmem:[%s4505_s1 + $0x444] ss:$16 sps:$4 sm:$0xff]   ;;  %v3079_v28 = vld [vmem:[%s4505_s1 + $0x440] ss:$16 sps:$4 sm:$0xff]  }
  0x2d   :  { %1871 = vmatprep.subr.bf16.mxu1 %v3017_v45  ;;  %v3084_v27 = vld [vmem:[%s4505_s1 + $0x644] ss:$16 sps:$4 sm:$0xff]   ;;  %v3082_v29 = vld [vmem:[%s4505_s1 + $0x640] ss:$16 sps:$4 sm:$0xff]  }
  0x2e   :  { %v3087_v30 = vld [vmem:[%s4505_s1 + $0x424] ss:$16 sps:$4 sm:$0xff]   ;;  %v3085_v34 = vld [vmem:[%s4505_s1 + $0x420] ss:$16 sps:$4 sm:$0xff]  }
  0x2f   :  { %1831 = vmatpush2.bf16.msra.mxu0 %v3019_v49  ;;  %v3090_v31 = vld [vmem:[%s4505_s1 + $0x624] ss:$16 sps:$4 sm:$0xff]   ;;  %v3088_v35 = vld [vmem:[%s4505_s1 + $0x620] ss:$16 sps:$4 sm:$0xff]  }
  0x30   :  { %1872 = vmatpush2.bf16.msra.mxu1 %v3020_v50  ;;  %1832 = vmatprep.subr.bf16.mxu0 %v3021_v52  ;;  %v3744_v32 = vld [vmem:[%s4506_s0 + $0x10] sm:$0xff] }
  0x31   :  { %1873 = vmatprep.subr.bf16.mxu1 %v3023_v53  ;;  %v3759_v36 = vcombine.high %v3744_v32, %v3744_v32  ;;  %v3093_v38 = vld [vmem:[%s4505_s1 + $0x404] ss:$16 sps:$4 sm:$0xff]   ;;  %v3091_v40 = vld [vmem:[%s4505_s1 + $0x400] ss:$16 sps:$4 sm:$0xff]  }
  0x32   :  { %v3096_v39 = vld [vmem:[%s4505_s1 + $0x604] ss:$16 sps:$4 sm:$0xff]   ;;  %v3094_v41 = vld [vmem:[%s4505_s1 + $0x600] ss:$16 sps:$4 sm:$0xff]  }
  0x33   :  { %1833 = vmatpush2.bf16.msra.mxu0 %v3025_v54  ;;  %v3099_v42 = vld [vmem:[%s4505_s1 + $0x5e4] ss:$16 sps:$4 sm:$0xff]   ;;  %v3097_v44 = vld [vmem:[%s4505_s1 + $0x5e0] ss:$16 sps:$4 sm:$0xff]  }
  0x34   :  { %1874 = vmatpush2.bf16.msra.mxu1 %v3026_v55  ;;  %1834 = vmatprep.subr.bf16.mxu0 %v3027_v56  ;;  %v3102_v43 = vld [vmem:[%s4505_s1 + $0x7e4] ss:$16 sps:$4 sm:$0xff]   ;;  %v3100_v45 = vld [vmem:[%s4505_s1 + $0x7e0] ss:$16 sps:$4 sm:$0xff]  }
  0x35   :  { %1875 = vmatprep.subr.bf16.mxu1 %v3029_v57  ;;  %v3105_v46 = vld [vmem:[%s4505_s1 + $0x5c4] ss:$16 sps:$4 sm:$0xff]   ;;  %v3103_v49 = vld [vmem:[%s4505_s1 + $0x5c0] ss:$16 sps:$4 sm:$0xff]  }
  0x36   :  { %v3108_v48 = vld [vmem:[%s4505_s1 + $0x7c4] ss:$16 sps:$4 sm:$0xff]   ;;  %v3106_v50 = vld [vmem:[%s4505_s1 + $0x7c0] ss:$16 sps:$4 sm:$0xff]  }
  0x37   :  { %1835 = vmatpush2.bf16.msra.mxu0 %v3031_v58  ;;  %v3111_v52 = vld [vmem:[%s4505_s1 + $0x5a4] ss:$16 sps:$4 sm:$0xff]   ;;  %v3109_v54 = vld [vmem:[%s4505_s1 + $0x5a0] ss:$16 sps:$4 sm:$0xff]  }
  0x38   :  { %1876 = vmatpush2.bf16.msra.mxu1 %v3032_v59  ;;  %1836 = vmatprep.subr.bf16.mxu0 %v3033_v60  ;;  %v3114_v53 = vld [vmem:[%s4505_s1 + $0x7a4] ss:$16 sps:$4 sm:$0xff]   ;;  %v3112_v55 = vld [vmem:[%s4505_s1 + $0x7a0] ss:$16 sps:$4 sm:$0xff]  }
  0x39   :  { %1877 = vmatprep.subr.bf16.mxu1 %v3035_v61  ;;  %v3117_v56 = vld [vmem:[%s4505_s1 + $0x584] ss:$16 sps:$4 sm:$0xff]   ;;  %v3115_v58 = vld [vmem:[%s4505_s1 + $0x580] ss:$16 sps:$4 sm:$0xff]  }
  0x3a   :  { %v3120_v57 = vld [vmem:[%s4505_s1 + $0x784] ss:$16 sps:$4 sm:$0xff]   ;;  %v3118_v59 = vld [vmem:[%s4505_s1 + $0x780] ss:$16 sps:$4 sm:$0xff]  }
  0x3b   :  { %1837 = vmatpush2.bf16.msra.mxu0 %v3037_v62  ;;  %v3123_v60 = vld [vmem:[%s4505_s1 + $0x564] ss:$16 sps:$4 sm:$0xff]   ;;  %v3121_v62 = vld [vmem:[%s4505_s1 + $0x560] ss:$16 sps:$4 sm:$0xff]  }
  0x3c   :  { %1878 = vmatpush2.bf16.msra.mxu1 %v3038_v63  ;;  %1838 = vmatprep.subr.bf16.mxu0 %v3039_v0  ;;  %v3126_v61 = vld [vmem:[%s4505_s1 + $0x764] ss:$16 sps:$4 sm:$0xff]   ;;  %v3124_v63 = vld [vmem:[%s4505_s1 + $0x760] ss:$16 sps:$4 sm:$0xff]  }
  0x3d   :  { %1879 = vmatprep.subr.bf16.mxu1 %v3041_v1  ;;  %v3129_v0 = vld [vmem:[%s4505_s1 + $0x544] ss:$16 sps:$4 sm:$0xff]  }
  0x3e   :  { %v3132_v1 = vld [vmem:[%s4505_s1 + $0x744] ss:$16 sps:$4 sm:$0xff]  }
  0x3f   :  { %1839 = vmatpush2.bf16.msra.mxu0 %v3043_v2  ;;  %v3127_v2 = vld [vmem:[%s4505_s1 + $0x540] ss:$16 sps:$4 sm:$0xff]  }
  0x40   :  { %1880 = vmatpush2.bf16.msra.mxu1 %v3044_v3  ;;  %1890 = vmatprep.subr.bf16.mxu0 %v3051_v4  ;;  %v3130_v3 = vld [vmem:[%s4505_s1 + $0x740] ss:$16 sps:$4 sm:$0xff]   ;;  %v3135_v4 = vld [vmem:[%s4505_s1 + $0x524] ss:$16 sps:$4 sm:$0xff]  }
  0x41   :  { %1931 = vmatprep.subr.bf16.mxu1 %v3054_v5  ;;  %v3138_v5 = vld [vmem:[%s4505_s1 + $0x724] ss:$16 sps:$4 sm:$0xff]  }
  0x42   :  { %1841 = vmatmul.mubr.bf16.vlgmr.msra.gmra.mxu0 %v3663_v6 }
  0x43   :  { %1882 = vmatmul.mubr.bf16.vlgmr.msra.gmra.mxu1 %v3665_v7  ;;  %1891 = vmatpush1.bf16.msra.mxu0 %v3049_v8  ;;  %v3133_v8 = vld [vmem:[%s4505_s1 + $0x520] ss:$16 sps:$4 sm:$0xff]  }
  0x44   :  { %1932 = vmatpush1.bf16.msra.mxu1 %v3052_v9  ;;  %1892 = vmatprep.subr.bf16.mxu0 %v3057_v10  ;;  %v3136_v9 = vld [vmem:[%s4505_s1 + $0x720] ss:$16 sps:$4 sm:$0xff]   ;;  %v3141_v10 = vld [vmem:[%s4505_s1 + $0x504] ss:$16 sps:$4 sm:$0xff]  }
  0x45   :  { %1933 = vmatprep.subr.bf16.mxu1 %v3060_v11  ;;  %1922 = vmatprep.mubr.bf16.mxu0 %v3759_v36  ;;  %v3144_v11 = vld [vmem:[%s4505_s1 + $0x704] ss:$16 sps:$4 sm:$0xff]  }
  0x46   :  { %1963 = vmatprep.mubr.bf16.mxu1 %v3763_v37 }
  0x47   :  { %1893 = vmatpush1.bf16.msra.mxu0 %v3055_v12  ;;  %v3139_v12 = vld [vmem:[%s4505_s1 + $0x500] ss:$16 sps:$4 sm:$0xff]  }
  0x48   :  { %1934 = vmatpush1.bf16.msra.mxu1 %v3058_v13  ;;  %1894 = vmatprep.subr.bf16.mxu0 %v3063_v14  ;;  %v3142_v13 = vld [vmem:[%s4505_s1 + $0x700] ss:$16 sps:$4 sm:$0xff]   ;;  %v3151_v14 = vld [vmem:[%s4505_s1 + $0x8e4] ss:$16 sps:$4 sm:$0xff]  }
  0x49   :  { %1935 = vmatprep.subr.bf16.mxu1 %v3066_v15  ;;  %v3154_v15 = vld [vmem:[%s4505_s1 + $0xec] ss:$16 sps:$4 sm:$0xff]  }
  0x4b   :  { %1895 = vmatpush1.bf16.msra.mxu0 %v3061_v16  ;;  %v3883_v16 = vcombine.low %v3744_v32, %v3744_v32  ;;  %v3175_v32 = vld [vmem:[%s4505_s1 + $0x864] ss:$16 sps:$4 sm:$0xff]  }
  0x4c   :  { %1936 = vmatpush1.bf16.msra.mxu1 %v3064_v17  ;;  %1896 = vmatprep.subr.bf16.mxu0 %v3069_v18  ;;  %v3887_v17 = vcombine.low %v3749_v33, %v3749_v33  ;;  %v3149_v18 = vld [vmem:[%s4505_s1 + $0x8e0] ss:$16 sps:$4 sm:$0xff]   ;;  %v3178_v33 = vld [vmem:[%s4505_s1 + $0x6c] ss:$16 sps:$4 sm:$0xff]  }
  0x4d   :  { %1937 = vmatprep.subr.bf16.mxu1 %v3072_v19  ;;  %v3152_v19 = vld [vmem:[%s4505_s1 + $0xe8] ss:$16 sps:$4 sm:$0xff]  }
  0x4f   :  { %1897 = vmatpush1.bf16.msra.mxu0 %v3067_v20  ;;  %v3157_v20 = vld [vmem:[%s4505_s1 + $0x8c4] ss:$16 sps:$4 sm:$0xff]  }
  0x50   :  { %1938 = vmatpush1.bf16.msra.mxu1 %v3070_v21  ;;  %1898 = vmatprep.subr.bf16.mxu0 %v3075_v22  ;;  %v3160_v21 = vld [vmem:[%s4505_s1 + $0xcc] ss:$16 sps:$4 sm:$0xff]   ;;  %v3155_v22 = vld [vmem:[%s4505_s1 + $0x8c0] ss:$16 sps:$4 sm:$0xff]  }
  0x51   :  { %1939 = vmatprep.subr.bf16.mxu1 %v3078_v23  ;;  %v3158_v23 = vld [vmem:[%s4505_s1 + $0xc8] ss:$16 sps:$4 sm:$0xff]  }
  0x53   :  { %1899 = vmatpush1.bf16.msra.mxu0 %v3073_v24  ;;  %v3163_v24 = vld [vmem:[%s4505_s1 + $0x8a4] ss:$16 sps:$4 sm:$0xff]  }
  0x54   :  { %1940 = vmatpush1.bf16.msra.mxu1 %v3076_v25  ;;  %1900 = vmatprep.subr.bf16.mxu0 %v3081_v26  ;;  %v3166_v25 = vld [vmem:[%s4505_s1 + $0xac] ss:$16 sps:$4 sm:$0xff]   ;;  %v3422_v26 = vmov 0  }
  0x55   :  { %1941 = vmatprep.subr.bf16.mxu1 %v3084_v27  ;;  %v3161_v27 = vld [vmem:[%s4505_s1 + $0x8a0] ss:$16 sps:$4 sm:$0xff]  }
  0x57   :  { %1901 = vmatpush1.bf16.msra.mxu0 %v3079_v28  ;;  %v3164_v28 = vld [vmem:[%s4505_s1 + $0xa8] ss:$16 sps:$4 sm:$0xff]  }
  0x58   :  { %1942 = vmatpush1.bf16.msra.mxu1 %v3082_v29  ;;  %1902 = vmatprep.subr.bf16.mxu0 %v3087_v30  ;;  %v3169_v29 = vld [vmem:[%s4505_s1 + $0x884] ss:$16 sps:$4 sm:$0xff]   ;;  %v3167_v30 = vld [vmem:[%s4505_s1 + $0x880] ss:$16 sps:$4 sm:$0xff]  }
  0x59   :  { %1943 = vmatprep.subr.bf16.mxu1 %v3090_v31  ;;  %v3170_v31 = vld [vmem:[%s4505_s1 + $0x88] ss:$16 sps:$4 sm:$0xff]  }
  0x5b   :  { %1903 = vmatpush1.bf16.msra.mxu0 %v3085_v34  ;;  %v3173_v34 = vld [vmem:[%s4505_s1 + $0x860] ss:$16 sps:$4 sm:$0xff]  }
  0x5c   :  { %1944 = vmatpush1.bf16.msra.mxu1 %v3088_v35  ;;  %1904 = vmatprep.subr.bf16.mxu0 %v3093_v38  ;;  %v3176_v35 = vld [vmem:[%s4505_s1 + $0x68] ss:$16 sps:$4 sm:$0xff]   ;;  %v3181_v38 = vld [vmem:[%s4505_s1 + $0x844] ss:$16 sps:$4 sm:$0xff]  }
  0x5d   :  { %1945 = vmatprep.subr.bf16.mxu1 %v3096_v39  ;;  %v3184_v39 = vld [vmem:[%s4505_s1 + $0x4c] ss:$16 sps:$4 sm:$0xff]  }
  0x5f   :  { %1905 = vmatpush1.bf16.msra.mxu0 %v3091_v40  ;;  %v3179_v40 = vld [vmem:[%s4505_s1 + $0x840] ss:$16 sps:$4 sm:$0xff]  }
  0x60   :  { %1946 = vmatpush1.bf16.msra.mxu1 %v3094_v41  ;;  %1906 = vmatprep.subr.bf16.mxu0 %v3099_v42  ;;  %v3182_v41 = vld [vmem:[%s4505_s1 + $0x48] ss:$16 sps:$4 sm:$0xff]   ;;  %v3187_v42 = vld [vmem:[%s4505_s1 + $0x824] ss:$16 sps:$4 sm:$0xff]  }
  0x61   :  { %1947 = vmatprep.subr.bf16.mxu1 %v3102_v43  ;;  %v3190_v43 = vld [vmem:[%s4505_s1 + $0x2c] ss:$16 sps:$4 sm:$0xff]  }
  0x63   :  { %1907 = vmatpush2.bf16.msra.mxu0 %v3097_v44  ;;  %v3185_v44 = vld [vmem:[%s4505_s1 + $0x820] ss:$16 sps:$4 sm:$0xff]  }
  0x64   :  { %1948 = vmatpush2.bf16.msra.mxu1 %v3100_v45  ;;  %1908 = vmatprep.subr.bf16.mxu0 %v3105_v46  ;;  %v3188_v45 = vld [vmem:[%s4505_s1 + $0x28] ss:$16 sps:$4 sm:$0xff]   ;;  %v3193_v46 = vld [vmem:[%s4505_s1 + $0x804] ss:$16 sps:$4 sm:$0xff]  }
  0x65   :  { %1949 = vmatprep.subr.bf16.mxu1 %v3108_v48  ;;  %v3196_v48 = vld [vmem:[%s4505_s1 + $0xc] ss:$16 sps:$4 sm:$0xff]  }
  0x67   :  { %1909 = vmatpush2.bf16.msra.mxu0 %v3103_v49  ;;  %v3191_v49 = vld [vmem:[%s4505_s1 + $0x800] ss:$16 sps:$4 sm:$0xff]  }
  0x68   :  { %1950 = vmatpush2.bf16.msra.mxu1 %v3106_v50  ;;  %1910 = vmatprep.subr.bf16.mxu0 %v3111_v52  ;;  %v3194_v50 = vld [vmem:[%s4505_s1 + $0x8] ss:$16 sps:$4 sm:$0xff]   ;;  %v3200_v52 = vld [vmem:[%s4505_s1 + $0x1ec] ss:$16 sps:$4 sm:$0xff]  }
  0x69   :  { %1951 = vmatprep.subr.bf16.mxu1 %v3114_v53  ;;  %v3203_v53 = vld [vmem:[%s4505_s1 + $0x2ec] ss:$16 sps:$4 sm:$0xff]  }
  0x6b   :  { %1911 = vmatpush2.bf16.msra.mxu0 %v3109_v54  ;;  %v3992_v54 = vld [vmem:[%s4506_s0 + $0x20] ss:$0 sps:$4 sm:$0xff]  }
  0x6c   :  { %1952 = vmatpush2.bf16.msra.mxu1 %v3112_v55  ;;  %1912 = vmatprep.subr.bf16.mxu0 %v3117_v56  ;;  %v3198_v55 = vld [vmem:[%s4505_s1 + $0x1e8] ss:$16 sps:$4 sm:$0xff]  }
  0x6d   :  { %1953 = vmatprep.subr.bf16.mxu1 %v3120_v57  ;;  %v3201_v56 = vld [vmem:[%s4505_s1 + $0x2e8] ss:$16 sps:$4 sm:$0xff]   ;;  %v3206_v57 = vld [vmem:[%s4505_s1 + $0x1cc] ss:$16 sps:$4 sm:$0xff]  }
  0x6f   :  { %1913 = vmatpush2.bf16.msra.mxu0 %v3115_v58  ;;  %v3209_v58 = vld [vmem:[%s4505_s1 + $0x2cc] ss:$16 sps:$4 sm:$0xff]  }
  0x70   :  { %1954 = vmatpush2.bf16.msra.mxu1 %v3118_v59  ;;  %1914 = vmatprep.subr.bf16.mxu0 %v3123_v60  ;;  %v3204_v59 = vld [vmem:[%s4505_s1 + $0x1c8] ss:$16 sps:$4 sm:$0xff]  }
  0x71   :  { %1955 = vmatprep.subr.bf16.mxu1 %v3126_v61  ;;  %v3207_v60 = vld [vmem:[%s4505_s1 + $0x2c8] ss:$16 sps:$4 sm:$0xff]   ;;  %v3212_v61 = vld [vmem:[%s4505_s1 + $0x1ac] ss:$16 sps:$4 sm:$0xff]  }
  0x73   :  { %1915 = vmatpush2.bf16.msra.mxu0 %v3121_v62  ;;  %v3215_v62 = vld [vmem:[%s4505_s1 + $0x2ac] ss:$16 sps:$4 sm:$0xff]  }
  0x74   :  { %1956 = vmatpush2.bf16.msra.mxu1 %v3124_v63  ;;  %1916 = vmatprep.subr.bf16.mxu0 %v3129_v0  ;;  %v3210_v63 = vld [vmem:[%s4505_s1 + $0x1a8] ss:$16 sps:$4 sm:$0xff]  }
  0x75   :  { %1957 = vmatprep.subr.bf16.mxu1 %v3132_v1  ;;  %v3213_v0 = vld [vmem:[%s4505_s1 + $0x2a8] ss:$16 sps:$4 sm:$0xff]   ;;  %v3218_v1 = vld [vmem:[%s4505_s1 + $0x18c] ss:$16 sps:$4 sm:$0xff]  }
  0x77   :  { %1917 = vmatpush2.bf16.msra.mxu0 %v3127_v2  ;;  %v3216_v2 = vld [vmem:[%s4505_s1 + $0x188] ss:$16 sps:$4 sm:$0xff]  }
  0x78   :  { %1958 = vmatpush2.bf16.msra.mxu1 %v3130_v3  ;;  %1918 = vmatprep.subr.bf16.mxu0 %v3135_v4  ;;  %v3219_v3 = vld [vmem:[%s4505_s1 + $0x288] ss:$16 sps:$4 sm:$0xff]   ;;  %v3224_v4 = vld [vmem:[%s4505_s1 + $0x16c] ss:$16 sps:$4 sm:$0xff]  }
  0x79   :  { %1959 = vmatprep.subr.bf16.mxu1 %v3138_v5  ;;  %v3227_v5 = vld [vmem:[%s4505_s1 + $0x26c] ss:$16 sps:$4 sm:$0xff]  }
  0x7b   :  { %1919 = vmatpush2.bf16.msra.mxu0 %v3133_v8  ;;  %v3222_v8 = vld [vmem:[%s4505_s1 + $0x168] ss:$16 sps:$4 sm:$0xff]  }
  0x7c   :  { %1960 = vmatpush2.bf16.msra.mxu1 %v3136_v9  ;;  %1920 = vmatprep.subr.bf16.mxu0 %v3141_v10  ;;  %v3225_v9 = vld [vmem:[%s4505_s1 + $0x268] ss:$16 sps:$4 sm:$0xff]   ;;  %v3230_v10 = vld [vmem:[%s4505_s1 + $0x14c] ss:$16 sps:$4 sm:$0xff]  }
  0x7d   :  { %1961 = vmatprep.subr.bf16.mxu1 %v3144_v11  ;;  %v3233_v11 = vld [vmem:[%s4505_s1 + $0x24c] ss:$16 sps:$4 sm:$0xff]  }
  0x7f   :  { %1921 = vmatpush2.bf16.msra.mxu0 %v3139_v12  ;;  %v3228_v12 = vld [vmem:[%s4505_s1 + $0x148] ss:$16 sps:$4 sm:$0xff]  }
  0x80   :  { %1962 = vmatpush2.bf16.msra.mxu1 %v3142_v13  ;;  %1972 = vmatprep.subr.bf16.mxu0 %v3151_v14  ;;  %v3231_v13 = vld [vmem:[%s4505_s1 + $0x248] ss:$16 sps:$4 sm:$0xff]   ;;  %v3236_v14 = vld [vmem:[%s4505_s1 + $0x12c] ss:$16 sps:$4 sm:$0xff]  }
  0x81   :  { %2013 = vmatprep.subr.bf16.mxu1 %v3154_v15  ;;  %v3239_v15 = vld [vmem:[%s4505_s1 + $0x22c] ss:$16 sps:$4 sm:$0xff]  }
  0x82   :  { %1923 = vmatmul.mubr.bf16.vlgmr.msra.gmra.mxu0 %v3883_v16 }
  0x83   :  { %1964 = vmatmul.mubr.bf16.vlgmr.msra.gmra.mxu1 %v3887_v17  ;;  %1973 = vmatpush1.bf16.msra.mxu0 %v3149_v18  ;;  %v3234_v18 = vld [vmem:[%s4505_s1 + $0x128] ss:$16 sps:$4 sm:$0xff]  }
  0x84   :  { %2014 = vmatpush1.bf16.msra.mxu1 %v3152_v19  ;;  %1974 = vmatprep.subr.bf16.mxu0 %v3157_v20  ;;  %v3237_v19 = vld [vmem:[%s4505_s1 + $0x228] ss:$16 sps:$4 sm:$0xff]   ;;  %v3242_v20 = vld [vmem:[%s4505_s1 + $0x10c] ss:$16 sps:$4 sm:$0xff]  }
  0x85   :  { %2015 = vmatprep.subr.bf16.mxu1 %v3160_v21  ;;  %2004 = vmatprep.mubr.bf16.mxu0 %v3422_v26  ;;  %v3245_v21 = vld [vmem:[%s4505_s1 + $0x20c] ss:$16 sps:$4 sm:$0xff]  }
  0x86   :  { %2045 = vmatprep.mubr.bf16.mxu1 %v3594_v47  ;;  %v3172_v47 = vld [vmem:[%s4505_s1 + $0x8c] ss:$16 sps:$4 sm:$0xff]  }
  0x87   :  { %1975 = vmatpush1.bf16.msra.mxu0 %v3155_v22  ;;  %v3240_v22 = vld [vmem:[%s4505_s1 + $0x108] ss:$16 sps:$4 sm:$0xff]  }
  0x88   :  { %2016 = vmatpush1.bf16.msra.mxu1 %v3158_v23  ;;  %1976 = vmatprep.subr.bf16.mxu0 %v3163_v24  ;;  %v3243_v23 = vld [vmem:[%s4505_s1 + $0x208] ss:$16 sps:$4 sm:$0xff]   ;;  %v3248_v24 = vld [vmem:[%s4505_s1 + $0x3ec] ss:$16 sps:$4 sm:$0xff]  }
  0x89   :  { %2017 = vmatprep.subr.bf16.mxu1 %v3166_v25  ;;  %v3251_v25 = vld [vmem:[%s4505_s1 + $0x4ec] ss:$16 sps:$4 sm:$0xff]  }
  0x8b   :  { %1977 = vmatpush1.bf16.msra.mxu0 %v3161_v27  ;;  %v3246_v27 = vld [vmem:[%s4505_s1 + $0x3e8] ss:$16 sps:$4 sm:$0xff]  }
  0x8c   :  { %2018 = vmatpush1.bf16.msra.mxu1 %v3164_v28  ;;  %1978 = vmatprep.subr.bf16.mxu0 %v3169_v29  ;;  %v3249_v28 = vld [vmem:[%s4505_s1 + $0x4e8] ss:$16 sps:$4 sm:$0xff]   ;;  %v3254_v29 = vld [vmem:[%s4505_s1 + $0x3cc] ss:$16 sps:$4 sm:$0xff]  }
  0x8d   :  { %2019 = vmatprep.subr.bf16.mxu1 %v3172_v47  ;;  %v3257_v47 = vld [vmem:[%s4505_s1 + $0x4cc] ss:$16 sps:$4 sm:$0xff]  }
  0x8f   :  { %1979 = vmatpush1.bf16.msra.mxu0 %v3167_v30  ;;  %v3252_v30 = vld [vmem:[%s4505_s1 + $0x3c8] ss:$16 sps:$4 sm:$0xff]  }
  0x90   :  { %2020 = vmatpush1.bf16.msra.mxu1 %v3170_v31  ;;  %1980 = vmatprep.subr.bf16.mxu0 %v3175_v32  ;;  %v3255_v31 = vld [vmem:[%s4505_s1 + $0x4c8] ss:$16 sps:$4 sm:$0xff]   ;;  %v3260_v32 = vld [vmem:[%s4505_s1 + $0x3ac] ss:$16 sps:$4 sm:$0xff]  }
  0x91   :  { %2021 = vmatprep.subr.bf16.mxu1 %v3178_v33  ;;  %v3258_v33 = vld [vmem:[%s4505_s1 + $0x3a8] ss:$16 sps:$4 sm:$0xff]  }
  0x93   :  { %1981 = vmatpush1.bf16.msra.mxu0 %v3173_v34  ;;  %v3261_v34 = vld [vmem:[%s4505_s1 + $0x4a8] ss:$16 sps:$4 sm:$0xff]  }
  0x94   :  { %2022 = vmatpush1.bf16.msra.mxu1 %v3176_v35  ;;  %1982 = vmatprep.subr.bf16.mxu0 %v3181_v38  ;;  %v3266_v35 = vld [vmem:[%s4505_s1 + $0x38c] ss:$16 sps:$4 sm:$0xff]   ;;  %v3264_v38 = vld [vmem:[%s4505_s1 + $0x388] ss:$16 sps:$4 sm:$0xff]  }
  0x95   :  { %2023 = vmatprep.subr.bf16.mxu1 %v3184_v39  ;;  %v3267_v39 = vld [vmem:[%s4505_s1 + $0x488] ss:$16 sps:$4 sm:$0xff]  }
  0x97   :  { %1983 = vmatpush1.bf16.msra.mxu0 %v3179_v40  ;;  %v3272_v40 = vld [vmem:[%s4505_s1 + $0x36c] ss:$16 sps:$4 sm:$0xff]  }
  0x98   :  { %2024 = vmatpush1.bf16.msra.mxu1 %v3182_v41  ;;  %1984 = vmatprep.subr.bf16.mxu0 %v3187_v42  ;;  %v3275_v41 = vld [vmem:[%s4505_s1 + $0x46c] ss:$16 sps:$4 sm:$0xff]   ;;  %v3270_v42 = vld [vmem:[%s4505_s1 + $0x368] ss:$16 sps:$4 sm:$0xff]  }
  0x99   :  { %2025 = vmatprep.subr.bf16.mxu1 %v3190_v43  ;;  %v3273_v43 = vld [vmem:[%s4505_s1 + $0x468] ss:$16 sps:$4 sm:$0xff]  }
  0x9b   :  { %1985 = vmatpush1.bf16.msra.mxu0 %v3185_v44  ;;  %v3278_v44 = vld [vmem:[%s4505_s1 + $0x34c] ss:$16 sps:$4 sm:$0xff]  }
  0x9c   :  { %2026 = vmatpush1.bf16.msra.mxu1 %v3188_v45  ;;  %1986 = vmatprep.subr.bf16.mxu0 %v3193_v46  ;;  %v3281_v45 = vld [vmem:[%s4505_s1 + $0x44c] ss:$16 sps:$4 sm:$0xff]   ;;  %v3276_v46 = vld [vmem:[%s4505_s1 + $0x348] ss:$16 sps:$4 sm:$0xff]  }
  0x9d   :  { %2027 = vmatprep.subr.bf16.mxu1 %v3196_v48  ;;  %v3279_v48 = vld [vmem:[%s4505_s1 + $0x448] ss:$16 sps:$4 sm:$0xff]  }
  0x9f   :  { %1987 = vmatpush1.bf16.msra.mxu0 %v3191_v49  ;;  %v3284_v49 = vld [vmem:[%s4505_s1 + $0x32c] ss:$16 sps:$4 sm:$0xff]  }
  0xa0   :  { %2028 = vmatpush1.bf16.msra.mxu1 %v3194_v50  ;;  %2054 = vmatprep.subr.bf16.mxu0 %v3203_v53  ;;  %v3287_v50 = vld [vmem:[%s4505_s1 + $0x42c] ss:$16 sps:$4 sm:$0xff]   ;;  %v3285_v53 = vld [vmem:[%s4505_s1 + $0x428] ss:$16 sps:$4 sm:$0xff]  }
  0xa1   :  { %2029 = vmatprep.subr.bf16.mxu1 %v3200_v52  ;;  %v3282_v52 = vld [vmem:[%s4505_s1 + $0x328] ss:$16 sps:$4 sm:$0xff]  }
  0xa2   :  { %2005 = vmatmul.mubr.bf16.vlgmr.msra.gmra.mxu0 %v3992_v54 }
  0xa3   :  { %2055 = vmatpush1.bf16.msra.mxu0 %v3201_v56  ;;  %2086 = vmatprep.mubr.bf16.mxu0 %v3605_v51  ;;  %v3221_v51 = vld [vmem:[%s4505_s1 + $0x28c] ss:$16 sps:$4 sm:$0xff]  }
  0xa4   :  { %2030 = vmatpush2.bf16.msra.mxu1 %v3198_v55  ;;  %2056 = vmatprep.subr.bf16.mxu0 %v3209_v58  ;;  %v3290_v55 = vld [vmem:[%s4505_s1 + $0x30c] ss:$16 sps:$4 sm:$0xff]   ;;  %v3291_v58 = vld [vmem:[%s4505_s1 + $0x408] ss:$16 sps:$4 sm:$0xff]  }
  0xa5   :  { %2031 = vmatprep.subr.bf16.mxu1 %v3206_v57  ;;  %v3293_v56 = vld [vmem:[%s4505_s1 + $0x40c] ss:$16 sps:$4 sm:$0xff]   ;;  %v3288_v57 = vld [vmem:[%s4505_s1 + $0x308] ss:$16 sps:$4 sm:$0xff]  }
  0xa7   :  { %2057 = vmatpush1.bf16.msra.mxu0 %v3207_v60  ;;  %v3299_v60 = vld [vmem:[%s4505_s1 + $0x6ec] ss:$16 sps:$4 sm:$0xff]  }
  0xa8   :  { %2032 = vmatpush2.bf16.msra.mxu1 %v3204_v59  ;;  %2058 = vmatprep.subr.bf16.mxu0 %v3215_v62  ;;  %v3296_v59 = vld [vmem:[%s4505_s1 + $0x5ec] ss:$16 sps:$4 sm:$0xff]   ;;  %v3297_v62 = vld [vmem:[%s4505_s1 + $0x6e8] ss:$16 sps:$4 sm:$0xff]  }
  0xa9   :  { %2033 = vmatprep.subr.bf16.mxu1 %v3212_v61  ;;  %v3294_v61 = vld [vmem:[%s4505_s1 + $0x5e8] ss:$16 sps:$4 sm:$0xff]  }
  0xab   :  { %2059 = vmatpush1.bf16.msra.mxu0 %v3213_v0  ;;  %v3305_v0 = vld [vmem:[%s4505_s1 + $0x6cc] ss:$16 sps:$4 sm:$0xff]  }
  0xac   :  { %2034 = vmatpush2.bf16.msra.mxu1 %v3210_v63  ;;  %2060 = vmatprep.subr.bf16.mxu0 %v3221_v51  ;;  %v3302_v63 = vld [vmem:[%s4505_s1 + $0x5cc] ss:$16 sps:$4 sm:$0xff]   ;;  %v3303_v51 = vld [vmem:[%s4505_s1 + $0x6c8] ss:$16 sps:$4 sm:$0xff]  }
  0xad   :  { %2035 = vmatprep.subr.bf16.mxu1 %v3218_v1  ;;  %v3300_v1 = vld [vmem:[%s4505_s1 + $0x5c8] ss:$16 sps:$4 sm:$0xff]  }
  0xaf   :  { %2061 = vmatpush1.bf16.msra.mxu0 %v3219_v3  ;;  %v3306_v3 = vld [vmem:[%s4505_s1 + $0x5a8] ss:$16 sps:$4 sm:$0xff]  }
  0xb0   :  { %2036 = vmatpush2.bf16.msra.mxu1 %v3216_v2  ;;  %2062 = vmatprep.subr.bf16.mxu0 %v3227_v5  ;;  %v3308_v2 = vld [vmem:[%s4505_s1 + $0x5ac] ss:$16 sps:$4 sm:$0xff]  }
  0xb1   :  { %2037 = vmatprep.subr.bf16.mxu1 %v3224_v4  ;;  %v3309_v4 = vld [vmem:[%s4505_s1 + $0x6a8] ss:$16 sps:$4 sm:$0xff]   ;;  %v3314_v5 = vld [vmem:[%s4505_s1 + $0x58c] ss:$16 sps:$4 sm:$0xff]  }
  0xb3   :  { %2063 = vmatpush1.bf16.msra.mxu0 %v3225_v9  ;;  %v3315_v9 = vld [vmem:[%s4505_s1 + $0x688] ss:$16 sps:$4 sm:$0xff]  }
  0xb4   :  { %2038 = vmatpush2.bf16.msra.mxu1 %v3222_v8  ;;  %2064 = vmatprep.subr.bf16.mxu0 %v3233_v11  ;;  %v3312_v8 = vld [vmem:[%s4505_s1 + $0x588] ss:$16 sps:$4 sm:$0xff]   ;;  %v3323_v11 = vld [vmem:[%s4505_s1 + $0x66c] ss:$16 sps:$4 sm:$0xff]  }
  0xb5   :  { %2039 = vmatprep.subr.bf16.mxu1 %v3230_v10  ;;  %v3320_v10 = vld [vmem:[%s4505_s1 + $0x56c] ss:$16 sps:$4 sm:$0xff]  }
  0xb7   :  { %2065 = vmatpush1.bf16.msra.mxu0 %v3231_v13  ;;  %v3321_v13 = vld [vmem:[%s4505_s1 + $0x668] ss:$16 sps:$4 sm:$0xff]  }
  0xb8   :  { %2040 = vmatpush2.bf16.msra.mxu1 %v3228_v12  ;;  %2066 = vmatprep.subr.bf16.mxu0 %v3239_v15  ;;  %v3318_v12 = vld [vmem:[%s4505_s1 + $0x568] ss:$16 sps:$4 sm:$0xff]   ;;  %v3329_v15 = vld [vmem:[%s4505_s1 + $0x64c] ss:$16 sps:$4 sm:$0xff]  }
  0xb9   :  { %2041 = vmatprep.subr.bf16.mxu1 %v3236_v14  ;;  %v3326_v14 = vld [vmem:[%s4505_s1 + $0x54c] ss:$16 sps:$4 sm:$0xff]  }
  0xbb   :  { %2067 = vmatpush1.bf16.msra.mxu0 %v3237_v19  ;;  %v3327_v19 = vld [vmem:[%s4505_s1 + $0x648] ss:$16 sps:$4 sm:$0xff]  }
  0xbc   :  { %2042 = vmatpush2.bf16.msra.mxu1 %v3234_v18  ;;  %2068 = vmatprep.subr.bf16.mxu0 %v3245_v21  ;;  %v3324_v18 = vld [vmem:[%s4505_s1 + $0x548] ss:$16 sps:$4 sm:$0xff]   ;;  %v3332_v21 = vld [vmem:[%s4505_s1 + $0x52c] ss:$16 sps:$4 sm:$0xff]  }
  0xbd   :  { %2043 = vmatprep.subr.bf16.mxu1 %v3242_v20  ;;  %v316_v20 = vlaneseq }
  0xbf   :  { %2069 = vmatpush1.bf16.msra.mxu0 %v3243_v23  ;;  %v3330_v23 = vld [vmem:[%s4505_s1 + $0x528] ss:$16 sps:$4 sm:$0xff]  }
  0xc0   :  { %2044 = vmatpush2.bf16.msra.mxu1 %v3240_v22  ;;  %2070 = vmatprep.subr.bf16.mxu0 %v3248_v24  ;;  %v3335_v22 = vld [vmem:[%s4505_s1 + $0x62c] ss:$16 sps:$4 sm:$0xff]   ;;  %v3333_v24 = vld [vmem:[%s4505_s1 + $0x628] ss:$16 sps:$4 sm:$0xff]  }
  0xc1   :  { %2095 = vmatprep.subr.bf16.mxu1 %v3251_v25  ;;  %v4270_v25 = vshrl.u32 %v316_v20, 7  ;;  %v3393_v20 = vld [vmem:[%s4507_s3 + $0x30] sm:$0xff]  }
  0xc3   :  { %2046 = vmatmul.mubr.bf16.vlgmr.msra.gmra.mxu1 %v3663_v6  ;;  %2071 = vmatpush2.bf16.msra.mxu0 %v3246_v27  ;;  %v3263_v6 = vld [vmem:[%s4505_s1 + $0x4ac] ss:$16 sps:$4 sm:$0xff]  }
  0xc4   :  { %2096 = vmatpush1.bf16.msra.mxu1 %v3249_v28  ;;  %2072 = vmatprep.subr.bf16.mxu0 %v3254_v29  ;;  %v3338_v27 = vld [vmem:[%s4505_s1 + $0x50c] ss:$16 sps:$4 sm:$0xff]   ;;  %v3336_v29 = vld [vmem:[%s4505_s1 + $0x508] ss:$16 sps:$4 sm:$0xff]  }
  0xc5   :  { %2097 = vmatprep.subr.bf16.mxu1 %v3257_v47  ;;  %2127 = vmatprep.mubr.bf16.mxu1 %v3759_v36  ;;  %v3269_v36 = vld [vmem:[%s4505_s1 + $0x48c] ss:$16 sps:$4 sm:$0xff]   ;;  %v3339_v47 = vld [vmem:[%s4505_s1 + $0x608] ss:$16 sps:$4 sm:$0xff]  }
  0xc6   :  { %v3341_v28 = vld [vmem:[%s4505_s1 + $0x60c] ss:$16 sps:$4 sm:$0xff]  }
  0xc7   :  { %2073 = vmatpush2.bf16.msra.mxu0 %v3252_v30  ;;  %v318_v30 = vsub.s32 0, %v4270_v25 }
  0xc8   :  { %2098 = vmatpush1.bf16.msra.mxu1 %v3255_v31  ;;  %2074 = vmatprep.subr.bf16.mxu0 %v3260_v32  ;;  %v4288_v31 = vld [vmem:[%s4508_s2] sm:$0xf]  ;;  %v3344_v32 = vld [vmem:[%s4505_s1 + $0x7ec] ss:$16 sps:$4 sm:$0xff]  }
  0xc9   :  { %2099 = vmatprep.subr.bf16.mxu1 %v3263_v6  ;;  %v3347_v6 = vld [vmem:[%s4505_s1 + $0x8ec] ss:$16 sps:$4 sm:$0xff]  }
  0xcb   :  { %2075 = vmatpush2.bf16.msra.mxu0 %v3258_v33  ;;  %v322_v33 = vsub.s32 1, %v4270_v25 }
  0xcc   :  { %2100 = vmatpush1.bf16.msra.mxu1 %v3261_v34  ;;  %2076 = vmatprep.subr.bf16.mxu0 %v3266_v35  ;;  %v319_v34 = vrot.slane %v4288_v31, %v318_v30  ;;  %v3342_v35 = vld [vmem:[%s4505_s1 + $0x7e8] ss:$16 sps:$4 sm:$0xff]   ;;  %v3404_v30 = vld [vmem:[%s4507_s3 + $0x40] sm:$0xff]  }
  0xcd   :  { %2101 = vmatprep.subr.bf16.mxu1 %v3269_v36  ;;  %v3345_v36 = vld [vmem:[%s4505_s1 + $0x8e8] ss:$16 sps:$4 sm:$0xff]  }
  0xcf   :  { %2077 = vmatpush2.bf16.msra.mxu0 %v3264_v38  ;;  %v3350_v38 = vld [vmem:[%s4505_s1 + $0x7cc] ss:$16 sps:$4 sm:$0xff]  }
  0xd0   :  { %2102 = vmatpush1.bf16.msra.mxu1 %v3267_v39  ;;  %2078 = vmatprep.subr.bf16.mxu0 %v3272_v40  ;;  %v3353_v39 = vld [vmem:[%s4505_s1 + $0x8cc] ss:$16 sps:$4 sm:$0xff]   ;;  %v323_v40 = vrot.slane %v4288_v31, %v322_v33 }
  0xd1   :  { %2103 = vmatprep.subr.bf16.mxu1 %v3275_v41 }
  0xd3   :  { %2079 = vmatpush2.bf16.msra.mxu0 %v3270_v42 }
  0xd4   :  { %2104 = vmatpush1.bf16.msra.mxu1 %v3273_v43  ;;  %2080 = vmatprep.subr.bf16.mxu0 %v3278_v44  ;;  %v3348_v44 = vld [vmem:[%s4505_s1 + $0x7c8] ss:$16 sps:$4 sm:$0xff]  }
  0xd5   :  { %2105 = vmatprep.subr.bf16.mxu1 %v3281_v45  ;;  %v3351_v45 = vld [vmem:[%s4505_s1 + $0x8c8] ss:$16 sps:$4 sm:$0xff]  }
  0xd7   :  { %2081 = vmatpush2.bf16.msra.mxu0 %v3276_v46 }
  0xd8   :  { %2106 = vmatpush1.bf16.msra.mxu1 %v3279_v48  ;;  %2082 = vmatprep.subr.bf16.mxu0 %v3284_v49  ;;  %v3356_v49 = vld [vmem:[%s4505_s1 + $0x7ac] ss:$16 sps:$4 sm:$0xff]  }
  0xd9   :  { %2107 = vmatprep.subr.bf16.mxu1 %v3287_v50 }
  0xdb   :  { %2083 = vmatpush2.bf16.msra.mxu0 %v3282_v52 }
  0xdc   :  { %2108 = vmatpush1.bf16.msra.mxu1 %v3285_v53  ;;  %2084 = vmatprep.subr.bf16.mxu0 %v3290_v55 }
  0xdd   :  { %2109 = vmatprep.subr.bf16.mxu1 %v3293_v56 }
  0xdf   :  { %2085 = vmatpush2.bf16.msra.mxu0 %v3288_v57  ;;  %v3354_v57 = vld [vmem:[%s4505_s1 + $0x7a8] ss:$16 sps:$4 sm:$0xff]  }
  0xe0   :  { %2110 = vmatpush1.bf16.msra.mxu1 %v3291_v58  ;;  %2136 = vmatprep.subr.bf16.mxu0 %v3299_v60  ;;  %v3357_v58 = vld [vmem:[%s4505_s1 + $0x8a8] ss:$16 sps:$4 sm:$0xff]  }
  0xe1   :  { %2111 = vmatprep.subr.bf16.mxu1 %v3296_v59 }
  0xe2   :  { %2087 = vmatmul.mubr.bf16.vlgmr.msra.gmra.mxu0 %v3665_v7  ;;  %v3311_v7 = vld [vmem:[%s4505_s1 + $0x6ac] ss:$16 sps:$4 sm:$0xff]  }
  0xe3   :  { %2137 = vmatpush1.bf16.msra.mxu0 %v3297_v62  ;;  %2168 = vmatprep.mubr.bf16.mxu0 %v3763_v37  ;;  %v3317_v37 = vld [vmem:[%s4505_s1 + $0x68c] ss:$16 sps:$4 sm:$0xff]   ;;  %v3360_v62 = vld [vmem:[%s4505_s1 + $0x788] ss:$16 sps:$4 sm:$0xff]  }
  0xe4   :  { %2112 = vmatpush2.bf16.msra.mxu1 %v3294_v61  ;;  %2138 = vmatprep.subr.bf16.mxu0 %v3305_v0  ;;  %v3365_v61 = vld [vmem:[%s4505_s1 + $0x88c] ss:$16 sps:$4 sm:$0xff]  }
  0xe5   :  { %2113 = vmatprep.subr.bf16.mxu1 %v3302_v63  ;;  %v3363_v63 = vld [vmem:[%s4505_s1 + $0x888] ss:$16 sps:$4 sm:$0xff]   ;;  %v3368_v0 = vld [vmem:[%s4505_s1 + $0x76c] ss:$16 sps:$4 sm:$0xff]  }
  0xe7   :  { %2139 = vmatpush1.bf16.msra.mxu0 %v3303_v51  ;;  %v3366_v51 = vld [vmem:[%s4505_s1 + $0x768] ss:$16 sps:$4 sm:$0xff]  }
  0xe8   :  { %2114 = vmatpush2.bf16.msra.mxu1 %v3300_v1  ;;  %2140 = vmatprep.subr.bf16.mxu0 %v3311_v7  ;;  %v3371_v1 = vld [vmem:[%s4505_s1 + $0x86c] ss:$16 sps:$4 sm:$0xff]  }
  0xe9   :  { %2115 = vmatprep.subr.bf16.mxu1 %v3308_v2  ;;  %v3369_v2 = vld [vmem:[%s4505_s1 + $0x868] ss:$16 sps:$4 sm:$0xff]   ;;  %v3374_v7 = vld [vmem:[%s4505_s1 + $0x74c] ss:$16 sps:$4 sm:$0xff]  }
  0xeb   :  { %2141 = vmatpush1.bf16.msra.mxu0 %v3309_v4  ;;  %v3372_v4 = vld [vmem:[%s4505_s1 + $0x748] ss:$16 sps:$4 sm:$0xff]  }
  0xec   :  { %2116 = vmatpush2.bf16.msra.mxu1 %v3306_v3  ;;  %2142 = vmatprep.subr.bf16.mxu0 %v3317_v37  ;;  %v3377_v3 = vld [vmem:[%s4505_s1 + $0x84c] ss:$16 sps:$4 sm:$0xff]  }
  0xed   :  { %2117 = vmatprep.subr.bf16.mxu1 %v3314_v5  ;;  %v3375_v5 = vld [vmem:[%s4505_s1 + $0x848] ss:$16 sps:$4 sm:$0xff]   ;;  %v3380_v37 = vld [vmem:[%s4505_s1 + $0x72c] ss:$16 sps:$4 sm:$0xff]  }
  0xef   :  { %2143 = vmatpush1.bf16.msra.mxu0 %v3315_v9  ;;  %v3378_v9 = vld [vmem:[%s4505_s1 + $0x728] ss:$16 sps:$4 sm:$0xff]  }
  0xf0   :  { %2118 = vmatpush2.bf16.msra.mxu1 %v3312_v8  ;;  %2144 = vmatprep.subr.bf16.mxu0 %v3323_v11  ;;  %v3383_v8 = vld [vmem:[%s4505_s1 + $0x82c] ss:$16 sps:$4 sm:$0xff]  }
  0xf1   :  { %2119 = vmatprep.subr.bf16.mxu1 %v3320_v10  ;;  %v3381_v10 = vld [vmem:[%s4505_s1 + $0x828] ss:$16 sps:$4 sm:$0xff]   ;;  %v3386_v11 = vld [vmem:[%s4505_s1 + $0x70c] ss:$16 sps:$4 sm:$0xff]  }
  0xf3   :  { %2145 = vmatpush1.bf16.msra.mxu0 %v3321_v13  ;;  %v3384_v13 = vld [vmem:[%s4505_s1 + $0x708] ss:$16 sps:$4 sm:$0xff]  }
  0xf4   :  { %2120 = vmatpush2.bf16.msra.mxu1 %v3318_v12  ;;  %2146 = vmatprep.subr.bf16.mxu0 %v3329_v15  ;;  %v3389_v12 = vld [vmem:[%s4505_s1 + $0x80c] ss:$16 sps:$4 sm:$0xff]  }
  0xf5   :  { %2121 = vmatprep.subr.bf16.mxu1 %v3326_v14  ;;  %v3387_v14 = vld [vmem:[%s4505_s1 + $0x808] ss:$16 sps:$4 sm:$0xff]  }
  0xf6   :  { %v3390_v15 = vld [vmem:[%s4507_s3 + $0x78] sm:$0xff]  }
  0xf7   :  { %2147 = vmatpush1.bf16.msra.mxu0 %v3327_v19  ;;  %v3392_v19 = vld [vmem:[%s4507_s3 + $0x70] sm:$0xff]  }
  0xf8   :  { %2122 = vmatpush2.bf16.msra.mxu1 %v3324_v18  ;;  %2148 = vmatprep.subr.bf16.mxu0 %v3335_v22  ;;  %v3391_v18 = vld [vmem:[%s4507_s3 + $0x38] sm:$0xff]   ;;  %v3395_v22 = vld [vmem:[%s4507_s3 + $0x28] sm:$0xff]  }
  0xf9   :  { %2123 = vmatprep.subr.bf16.mxu1 %v3332_v21  ;;  %v3394_v21 = vld [vmem:[%s4507_s3 + $0x68] sm:$0xff]  }
  0xfb   :  { %2149 = vmatpush1.bf16.msra.mxu0 %v3333_v24  ;;  %v3399_v24 = vld [vmem:[%s4507_s3 + $0x18] sm:$0xff]  }
  0xfc   :  { %2124 = vmatpush2.bf16.msra.mxu1 %v3330_v23  ;;  %2150 = vmatprep.subr.bf16.mxu0 %v3341_v28  ;;  %v3398_v23 = vld [vmem:[%s4507_s3 + $0x58] sm:$0xff]   ;;  %v3401_v28 = vld [vmem:[%s4507_s3 + $0x10] sm:$0xff]  }
  0xfd   :  { %2125 = vmatprep.subr.bf16.mxu1 %v3338_v27  ;;  %v3400_v27 = vld [vmem:[%s4507_s3 + $0x50] sm:$0xff]  }
  0xff   :  { %2151 = vmatpush1.bf16.msra.mxu0 %v3339_v47  ;;  %v3403_v47 = vld [vmem:[%s4507_s3 + $0x8] sm:$0xff]  }
 0x100   :  { %2126 = vmatpush2.bf16.msra.mxu1 %v3336_v29  ;;  %2152 = vmatprep.subr.bf16.mxu0 %v3344_v32  ;;  %v3402_v29 = vld [vmem:[%s4507_s3 + $0x48] sm:$0xff]   ;;  %v3405_v32 = vld [vmem:[%s4507_s3] sm:$0xff]  }
 0x101   :  { %2177 = vmatprep.subr.bf16.mxu1 %v3347_v6 }
 0x102   :  { %v1842_v41 = vpop.f32.mrf.mxu0 }
 0x103   :  { %v1883_v42 = vpop.f32.mrf.mxu1  ;;  %2128 = vmatmul.mubr.bf16.vlgmr.msra.gmra.mxu1 %v3883_v16  ;;  %v1843_v43 = vadd.f32 %v1842_v41, %v319_v34  ;;  %2153 = vmatpush2.bf16.msra.mxu0 %v3342_v35  ;;  %v3359_v16 = vld [vmem:[%s4505_s1 + $0x8ac] ss:$16 sps:$4 sm:$0xff]  }
 0x104   :  { %2178 = vmatpush1.bf16.msra.mxu1 %v3345_v36  ;;  %v1844_v46 = vpop.f32.mrf.mxu0  ;;  %2154 = vmatprep.subr.bf16.mxu0 %v3350_v38  ;;  %v3406_v41 = vld [vmem:[%s4507_s3 + $0xf8] sm:$0xff]  }
 0x105   :  { %v1885_v48 = vpop.f32.mrf.mxu1  ;;  %2179 = vmatprep.subr.bf16.mxu1 %v3353_v39  ;;  %v4324_v50 = vadd.f32 %v1883_v42, %v1843_v43  ;;  %v1845_v52 = vadd.f32 %v1844_v46, %v323_v40  ;;  %2209 = vmatprep.mubr.bf16.mxu1 %v3422_v26  ;;  %v3362_v26 = vld [vmem:[%s4505_s1 + $0x78c] ss:$16 sps:$4 sm:$0xff]   ;;  %v3408_v43 = vld [vmem:[%s4507_s3 + $0xf0] sm:$0xff]  }
 0x106   :  { %v1846_v53 = vpop.f32.mrf.mxu0  ;;  %v3407_v42 = vld [vmem:[%s4507_s3 + $0xb8] sm:$0xff]   ;;  %v3411_v46 = vld [vmem:[%s4507_s3 + $0xa8] sm:$0xff]  }
 0x107   :  { %v1887_v55 = vpop.f32.mrf.mxu1  ;;  %v4327_v56 = vadd.f32 %v1885_v48, %v1845_v52  ;;  %2155 = vmatpush2.bf16.msra.mxu0 %v3348_v44  ;;  %v3409_v44 = vld [vmem:[%s4507_s3 + $0xb0] sm:$0xff]   ;;  %v3412_v48 = vld [vmem:[%s4507_s3 + $0xe0] sm:$0xff]   ;;  %v3415_v52 = vld [vmem:[%s4507_s3 + $0x98] sm:$0xff]  }
 0x108   :  { %2180 = vmatpush1.bf16.msra.mxu1 %v3351_v45  ;;  %v1847_v59 = vpop.f32.mrf.mxu0  ;;  %2156 = vmatprep.subr.bf16.mxu0 %v3356_v49  ;;  %v3410_v45 = vld [vmem:[%s4507_s3 + $0xe8] sm:$0xff]   ;;  %v3413_v49 = vld [vmem:[%s4507_s3 + $0xa0] sm:$0xff]  }
 0x109   :  { %v1888_v60 = vpop.f32.mrf.mxu1  ;;  %2181 = vmatprep.subr.bf16.mxu1 %v3359_v16  ;;  %v3414_v16 = vld [vmem:[%s4507_s3 + $0xd8] sm:$0xff]   ;;  %v3417_v59 = vld [vmem:[%s4507_s3 + $0x90] sm:$0xff]  }
 0x10b   :  { %2157 = vmatpush2.bf16.msra.mxu0 %v3354_v57  ;;  %v3416_v57 = vld [vmem:[%s4507_s3 + $0xd0] sm:$0xff]  }
 0x10c   :  { %2182 = vmatpush1.bf16.msra.mxu1 %v3357_v58  ;;  %2158 = vmatprep.subr.bf16.mxu0 %v3362_v26 }
 0x10d   :  { %2183 = vmatprep.subr.bf16.mxu1 %v3365_v61 }
 0x10f   :  { %2159 = vmatpush2.bf16.msra.mxu0 %v3360_v62 }
 0x110   :  { %2184 = vmatpush1.bf16.msra.mxu1 %v3363_v63  ;;  %2160 = vmatprep.subr.bf16.mxu0 %v3368_v0  ;;  %v3419_v63 = vld [vmem:[%s4507_s3 + $0x88] sm:$0xff]  }
 0x111   :  { %2185 = vmatprep.subr.bf16.mxu1 %v3371_v1 }
 0x113   :  { %2161 = vmatpush2.bf16.msra.mxu0 %v3366_v51 }
 0x114   :  { %2186 = vmatpush1.bf16.msra.mxu1 %v3369_v2  ;;  %2162 = vmatprep.subr.bf16.mxu0 %v3374_v7  ;;  %v3420_v7 = vld [vmem:[%s4507_s3 + $0xc0] sm:$0xff]  }
 0x115   :  { %2187 = vmatprep.subr.bf16.mxu1 %v3377_v3 }
 0x117   :  { %2163 = vmatpush2.bf16.msra.mxu0 %v3372_v4  ;;  %v3421_v4 = vld [vmem:[%s4507_s3 + $0x80] sm:$0xff]  }
 0x118   :  { %2188 = vmatpush1.bf16.msra.mxu1 %v3375_v5  ;;  %2164 = vmatprep.subr.bf16.mxu0 %v3380_v37 }
 0x119   :  { %2189 = vmatprep.subr.bf16.mxu1 %v3383_v8 }
 0x11b   :  { %2165 = vmatpush2.bf16.msra.mxu0 %v3378_v9 }
 0x11c   :  { %2190 = vmatpush1.bf16.msra.mxu1 %v3381_v10  ;;  %2166 = vmatprep.subr.bf16.mxu0 %v3386_v11 }
 0x11d   :  { %2191 = vmatprep.subr.bf16.mxu1 %v3389_v12 }
 0x11f   :  { %2167 = vmatpush2.bf16.msra.mxu0 %v3384_v13 }
 0x120   :  { %2192 = vmatpush1.bf16.msra.mxu1 %v3387_v14  ;;  %2904 = vmatprep.subr.bf16.mxu0 %v3390_v15 }
 0x121   :  { %2926 = vmatprep.subr.bf16.mxu1 %v3406_v41 }
 0x122   :  { %2169 = vmatmul.mubr.bf16.vlgmr.msra.gmra.mxu0 %v3887_v17  ;;  %v3396_v17 = vld [vmem:[%s4507_s3 + $0x60] sm:$0xff]  }
 0x123   :  { %2210 = vmatmul.mubr.bf16.vlgmr.msra.gmra.mxu1 %v3992_v54  ;;  %2905 = vmatpush3.bf16.msra.mxu0 %v3391_v18  ;;  %v3397_v54 = vld [vmem:[%s4507_s3 + $0x20] sm:$0xff]  }
 0x124   :  { %2906 = vmatprep.subr.bf16.mxu0 %v3392_v19  ;;  %2927 = vmatpush3.bf16.msra.mxu1 %v3407_v42 }
 0x125   :  { %2928 = vmatprep.subr.bf16.mxu1 %v3408_v43 }
 0x127   :  { %2907 = vmatpush3.bf16.msra.mxu0 %v3393_v20 }
 0x128   :  { %2908 = vmatprep.subr.bf16.mxu0 %v3394_v21  ;;  %2929 = vmatpush3.bf16.msra.mxu1 %v3409_v44  ;;  %v326_v21 = vsub.s32 2, %v4270_v25 }
 0x129   :  { %2930 = vmatprep.subr.bf16.mxu1 %v3410_v45 }
 0x12b   :  { %2909 = vmatpush3.bf16.msra.mxu0 %v3395_v22  ;;  %v330_v22 = vsub.s32 3, %v4270_v25 }
 0x12c   :  { %2910 = vmatprep.subr.bf16.mxu0 %v3396_v17  ;;  %2931 = vmatpush3.bf16.msra.mxu1 %v3411_v46  ;;  %v327_v17 = vrot.slane %v4288_v31, %v326_v21 }
 0x12d   :  { %2932 = vmatprep.subr.bf16.mxu1 %v3412_v48 }
 0x12f   :  { %2911 = vmatpush3.bf16.msra.mxu0 %v3397_v54  ;;  %v331_v54 = vrot.slane %v4288_v31, %v330_v22 }
 0x130   :  { %2912 = vmatprep.subr.bf16.mxu0 %v3398_v23  ;;  %2933 = vmatpush3.bf16.msra.mxu1 %v3413_v49 }
 0x131   :  { %2934 = vmatprep.subr.bf16.mxu1 %v3414_v16 }
 0x133   :  { %2913 = vmatpush3.bf16.msra.mxu0 %v3399_v24 }
 0x134   :  { %2914 = vmatprep.subr.bf16.mxu0 %v3400_v27  ;;  %2935 = vmatpush3.bf16.msra.mxu1 %v3415_v52  ;;  %v2871_v52 = vld [vmem:[%s4509_s4] ss:$0 sm:$0xff] }
 0x135   :  { %2936 = vmatprep.subr.bf16.mxu1 %v3416_v57 }
 0x137   :  { %2915 = vmatpush3.bf16.msra.mxu0 %v3401_v28 }
 0x138   :  { %2916 = vmatprep.subr.bf16.mxu0 %v3402_v29  ;;  %2937 = vmatpush3.bf16.msra.mxu1 %v3417_v59 }
 0x13b   :  { %2917 = vmatpush3.bf16.msra.mxu0 %v3403_v47 }
 0x13c   :  { %2918 = vmatprep.subr.bf16.mxu0 %v3404_v30 }
 0x13f   :  { %2919 = vmatpush3.bf16.msra.mxu0 %v3405_v32 }
 0x142   :  { %v1924_v6 = vpop.f32.mrf.mxu0 }
 0x143   :  { %v1965_v33 = vpop.f32.mrf.mxu1  ;;  %v1925_v53 = vadd.f32 %v1924_v6, %v4324_v50  ;;  %v3418_v50 = vld [vmem:[%s4507_s3 + $0xc8] sm:$0xff]  }
 0x144   :  { %v1926_v34 = vpop.f32.mrf.mxu0  ;;  %2938 = vmatprep.subr.bf16.mxu1 %v3418_v50 }
 0x145   :  { %v1967_v35 = vpop.f32.mrf.mxu1  ;;  %v1927_v55 = vadd.f32 %v1926_v34, %v4327_v56  ;;  %v1966_v58 = vadd.f32 %v1965_v33, %v1925_v53  ;;  %2939 = vmatpush3.bf16.msra.mxu1 %v3419_v63 }
 0x146   :  { %v1928_v36 = vpop.f32.mrf.mxu0  ;;  %2940 = vmatprep.subr.bf16.mxu1 %v3420_v7 }
 0x147   :  { %v1969_v38 = vpop.f32.mrf.mxu1  ;;  %v1968_v26 = vadd.f32 %v1967_v35, %v1927_v55 }
 0x148   :  { %v1929_v39 = vpop.f32.mrf.mxu0 }
 0x149   :  { %v1970_v40 = vpop.f32.mrf.mxu1  ;;  %2941 = vmatpush3.bf16.msra.mxu1 %v3421_v4 }
 0x162   :  { %v2006_v60 = vpop.f32.mrf.mxu0 }
 0x163   :  { %v2007_v61 = vadd.f32 %v2006_v60, %v1966_v58 }
 0x164   :  { %v2008_v62 = vpop.f32.mrf.mxu0 }
 0x165   :  { %v2009_v56 = vadd.f32 %v2008_v62, %v1968_v26  ;;  %v2218_v0 = vmax.f32 %v2007_v61, 0.0 }
 0x166   :  { %v2010_v1 = vpop.f32.mrf.mxu0 }
 0x167   :  { %v2219_v51 = vmax.f32 %v2009_v56, 0.0  ;;  %v2222_v5 = vpack.c.bf16 %v2218_v0, %v2218_v0 }
 0x168   :  { %v2011_v2 = vpop.f32.mrf.mxu0 }
 0x169   :  { %v2223_v3 = vpack.c.bf16 %v2219_v51, %v2219_v51 }
 0x16b   :  { %2521 = vmatprep.mubr.bf16.mxu0 %v2223_v3 }
 0x16c   :  { %2522 = vmatmul.mubr.bf16.vlgmr.msra.gmra.mxu0 %v2222_v5 }
 0x183   :  { %v2047_v37 = vpop.f32.mrf.mxu1 }
 0x184   :  { %v2048_v23 = vadd.f32 %v2047_v37, %v327_v17 }
 0x185   :  { %v2049_v8 = vpop.f32.mrf.mxu1 }
 0x186   :  { %v2050_v24 = vadd.f32 %v2049_v8, %v331_v54 }
 0x187   :  { %v2051_v9 = vpop.f32.mrf.mxu1 }
 0x189   :  { %v2052_v10 = vpop.f32.mrf.mxu1 }
 0x1a2   :  { %v2088_v11 = vpop.f32.mrf.mxu0 }
 0x1a3   :  { %v2089_v27 = vadd.f32 %v2088_v11, %v2048_v23 }
 0x1a4   :  { %v2090_v12 = vpop.f32.mrf.mxu0 }
 0x1a5   :  { %v2091_v28 = vadd.f32 %v2090_v12, %v2050_v24 }
 0x1a6   :  { %v2092_v13 = vpop.f32.mrf.mxu0 }
 0x1a8   :  { %v2093_v14 = vpop.f32.mrf.mxu0 }
 0x1c3   :  { %v2129_v15 = vpop.f32.mrf.mxu1 }
 0x1c4   :  { %v2130_v29 = vadd.f32 %v2129_v15, %v2089_v27 }
 0x1c5   :  { %v2131_v18 = vpop.f32.mrf.mxu1 }
 0x1c6   :  { %v2132_v32 = vadd.f32 %v2131_v18, %v2091_v28 }
 0x1c7   :  { %v2133_v19 = vpop.f32.mrf.mxu1 }
 0x1c9   :  { %v2134_v20 = vpop.f32.mrf.mxu1 }
 0x1e2   :  { %v2170_v47 = vpop.f32.mrf.mxu0 }
 0x1e3   :  { %v2211_v30 = vpop.f32.mrf.mxu1  ;;  %v2171_v6 = vadd.f32 %v2170_v47, %v2130_v29 }
 0x1e4   :  { %v2172_v33 = vpop.f32.mrf.mxu0 }
 0x1e5   :  { %v2213_v34 = vpop.f32.mrf.mxu1  ;;  %v2212_v35 = vadd.f32 %v2211_v30, %v2171_v6  ;;  %v2173_v36 = vadd.f32 %v2172_v33, %v2132_v32 }
 0x1e6   :  { %v2174_v38 = vpop.f32.mrf.mxu0 }
 0x1e7   :  { %v2215_v39 = vpop.f32.mrf.mxu1  ;;  %v2214_v25 = vadd.f32 %v2213_v34, %v2173_v36  ;;  %v2220_v40 = vmax.f32 %v2212_v35, 0.0 }
 0x1e8   :  { %v2175_v41 = vpop.f32.mrf.mxu0 }
 0x1e9   :  { %v2216_v42 = vpop.f32.mrf.mxu1  ;;  %v2221_v31 = vmax.f32 %v2214_v25, 0.0  ;;  %v2224_v44 = vpack.c.bf16 %v2220_v40, %v2220_v40 }
 0x1eb   :  { %v2225_v43 = vpack.c.bf16 %v2221_v31, %v2221_v31 }
 0x1ed   :  { %2561 = vmatprep.mubr.bf16.mxu1 %v2225_v43 }
 0x1ee   :  { %2562 = vmatmul.mubr.bf16.vlgmr.msra.gmra.mxu1 %v2224_v44 }
 0x22c   :  { %v2920_v45 = vpop.f32.mrf.mxu0 }
 0x22e   :  { %v2921_v46 = vpop.f32.mrf.mxu0 }
 0x22f   :  { %v2922_v48 = vadd.f32 %v2921_v46, %v2920_v45 }
 0x230   :  { %v2923_v49 = vpop.f32.mrf.mxu0 }
 0x231   :  { %v2524_v57 = vadd.f32 %v2922_v48, %v2871_v52 }
 0x232   :  { %v2924_v16 = vpop.f32.mrf.mxu0 }
 0x2ae   :  { %v2942_v53 = vpop.f32.mrf.mxu1 }
 0x2b0   :  { %v2943_v55 = vpop.f32.mrf.mxu1 }
 0x2b1   :  { %v2944_v58 = vadd.f32 %v2943_v55, %v2942_v53 }
 0x2b2   :  { %v2945_v59 = vpop.f32.mrf.mxu1 }
 0x2b3   :  { %v2564_v60 = vadd.f32 %v2944_v58, %v2524_v57 }
 0x2b4   :  { %v2946_v26 = vpop.f32.mrf.mxu1 }
 0x2b5   :  { %2569 = vst [vmem:[%s4510_s5] sm:$0xff] %v2564_v60 }

</bundles_post_ra>
